<compile_context>
chip_gen: v5e
topology: v5e:2x2
jax: 0.10.0
libtpu: 0.0.40
codegen_flags: <defaults>
</compile_context>

<pallas_src>
import functools
import math

import jax
import jax.numpy as jnp
from jax.experimental import pallas as pl
from jax.experimental.pallas import tpu as pltpu

F32 = jnp.float32
BF16 = jnp.bfloat16


# ---------------- packed 1-D parameter table (cuts DMA descriptor count) ----

def _vec_layout(d_model, d_ff, e_layers):
    entries = []
    for l in range(e_layers):
        entries += [((l, 'bo'), d_model),
                    ((l, 'ln1_g'), d_model), ((l, 'ln1_b'), d_model),
                    ((l, 'b1'), d_ff), ((l, 'b2'), d_model),
                    ((l, 'ln2_g'), d_model), ((l, 'ln2_b'), d_model)]
    entries += [('enc_g', d_model), ('enc_b', d_model),
                ('pre_b', d_model // 2), ('fc_b', 1)]
    width = max(128, -(-max(s for _, s in entries) // 128) * 128)
    rows = {name: (i, size) for i, (name, size) in enumerate(entries)}
    return entries, rows, width


def _pack_vec(params, entries, rows, width):
    def fetch(name):
        if isinstance(name, tuple):
            l, k = name
            return params['layers'][l][k]
        return params[name]

    buf = jnp.zeros((len(entries), width), F32)
    for name, size in entries:
        r = rows[name][0]
        buf = buf.at[r, :size].set(fetch(name).astype(F32))
    return buf


# ------------------------------ fused kernel --------------------------------

def fused_informer_kernel(x_ref, tf_ref, pe_ref, mask_ref, sel_ref, vec_ref,
                          bstk_ref, tokw_ref, timew_ref, wqkv_ref, wo_ref,
                          w1_ref, w2_ref, prew_ref, fcw_ref, out_ref, *,
                          n_heads, n_layers, n_batch, seq_len, d_model, rows):
    BL = n_batch * seq_len
    hd = d_model // n_heads
    scale = 1.0 / math.sqrt(hd)

    def vec(name):
        r, n = rows[name]
        return vec_ref[r, :n]                      # (n,) f32, offset-0 lane read

    def mm(a, b):                                  # bf16 MXU, f32 accumulate
        return jnp.dot(a.astype(BF16), b.astype(BF16),
                       preferred_element_type=F32)

    def ln(v, g, b, eps=1e-5):
        mu = jnp.mean(v, axis=-1, keepdims=True)
        var = jnp.mean((v - mu) ** 2, axis=-1, keepdims=True)
        return (v - mu) * jax.lax.rsqrt(var + eps) * g + b

    def stdz(v, eps=1e-5):                         # LN with affine folded away
        mu = jnp.mean(v, axis=-1, keepdims=True)
        var = jnp.mean((v - mu) ** 2, axis=-1, keepdims=True)
        return (v - mu) * jax.lax.rsqrt(var + eps)

    # ---- DataEmbedding: standardized circular-conv taps (input-LN gamma is
    #      folded into tokw, its beta term + timeF bias + positional embedding
    #      arrive as one additive constant) + timeF linear.  Dropout = id.
    tok = (mm(stdz(x_ref[0]), tokw_ref[0])
           + mm(stdz(x_ref[1]), tokw_ref[1])
           + mm(stdz(x_ref[2]), tokw_ref[2]))
    h = tok + mm(tf_ref[...], timew_ref[...]) + pe_ref[...]         # (BL, D)

    neg_mask = mask_ref[...]                       # (H*BL, H*BL), host-built

    # ---- Encoder layers (ProbAttention == exact dense attention at this L).
    for l in range(n_layers):
        # Heads stacked on SUBLANES: row = head*BL + (b*L + t).  Per-head
        # projection weights are pre-split host-side -> static ref reads,
        # sublane concat; zero lane movement.
        def proj(j):
            parts = [mm(h, wqkv_ref[l, j, hh]) for hh in range(n_heads)]
            return jnp.concatenate(parts, axis=0) + bstk_ref[l, j]   # (H*BL, hd)

        q_s, k_s, v_s = proj(0), proj(1), proj(2)

        # One MXU dot for ALL heads' scores; combined head+sample block mask.
        s = jax.lax.dot_general(
            q_s.astype(BF16), k_s.astype(BF16),
            (((1,), (1,)), ((), ())),
            preferred_element_type=F32) * scale + neg_mask           # (H*BL, H*BL)
        s = s - jnp.max(s, axis=-1, keepdims=True)
        e = jnp.exp(s)
        p = e * pl.reciprocal(jnp.sum(e, axis=-1, keepdims=True), approx=True)

        ctx = mm(p, v_s)                                             # (H*BL, hd)

        # Output projection accumulated per head (sublane-aligned slices of
        # ctx, per-head Wo blocks from a static leading-axis ref read).
        attn = mm(ctx[0:BL], wo_ref[l, 0])
        for hh in range(1, n_heads):
            attn = attn + mm(ctx[hh * BL:(hh + 1) * BL], wo_ref[l, hh])
        attn = attn + vec((l, 'bo'))                                 # (BL, D)

        h1 = ln(h + attn, vec((l, 'ln1_g')), vec((l, 'ln1_b')))
        y = jnp.maximum(mm(h1, w1_ref[l]) + vec((l, 'b1')), 0.0)
        y = mm(y, w2_ref[l]) + vec((l, 'b2'))
        h = ln(h1 + y, vec((l, 'ln2_g')), vec((l, 'ln2_b')))

    # ---- Last-timestep select via an exact f32 one-hot matmul, then the
    #      encoder's final LayerNorm (per-position -> commutes with the
    #      slice), then pre_fc + relu + fc.
    last = jnp.dot(sel_ref[...], h, preferred_element_type=F32)     # (B, D)
    xn = ln(last, vec('enc_g'), vec('enc_b'))
    z = jnp.maximum(mm(xn, prew_ref[...]) + vec('pre_b'), 0.0)
    out_ref[...] = mm(z, fcw_ref[...]) + vec('fc_b')                 # (B, 1)


# ------------------------------ wrapper / glue -------------------------------

def positional_embedding(L, D):
    pos = jnp.arange(L, dtype=F32)[:, None]
    div = jnp.exp(jnp.arange(0, D, 2, dtype=F32) * (-math.log(10000.0) / D))
    pe = jnp.zeros((L, D), dtype=F32)
    pe = pe.at[:, 0::2].set(jnp.sin(pos * div))
    pe = pe.at[:, 1::2].set(jnp.cos(pos * div))
    return pe


def informer_forward(x, time_features, params, *, n_heads):
    # x: (B, 1, L, enc_in).  squeeze(1) + LayerNorm(enc_in); the unsqueeze(1)
    # before the conv token embedding is pure layout glue (BLC layout).
    x = jnp.squeeze(x, axis=1)                     # (B, L, enc_in)
    B, L, enc_in = x.shape
    d_model = params['time_w'].shape[-1]
    d_ff = params['layers'][0]['w1'].shape[-1]
    e_layers = len(params['layers'])
    hd = d_model // n_heads
    BL = B * L

    # ProbAttention(factor=3) selects every query & key only when
    # 3*ceil(ln L) >= L, making it EXACTLY dense attention.  Guard loudly.
    if 3 * math.ceil(math.log(L)) < L:
        raise ValueError(
            f"ProbAttention no longer equals full attention for L={L}; "
            "the fused kernel would silently diverge from the reference.")

    # --- host-side layout prep (tiny one-time ops, fused by XLA) ---
    # Circular conv taps: LayerNorm(enc_in) commutes with a roll along L, so
    # the +-1 rolled copies are exact; stacked into ONE input array.
    x_stack = jnp.stack([jnp.roll(x, 1, axis=1), x, jnp.roll(x, -1, axis=1)],
                        axis=0).reshape(3, BL, enc_in).astype(F32)
    tf = time_features.reshape(BL, -1).astype(F32)

    # Fold the input-LN affine into the conv-tap weights (W' = diag(g)W); the
    # beta term (b @ W_t, summed over taps), the timeF bias and the positional
    # embedding become one additive constant.  Token-conv bias assumed absent
    # (standard Informer TokenEmbedding uses bias=False).
    in_g, in_b = params['in_g'], params['in_b']
    tok_w = jnp.stack([params['tok_w0'], params['tok_w1'], params['tok_w2']], 0)
    tok_w_folded = (tok_w * in_g[None, :, None]).astype(BF16)       # (3,C,D)
    beta_const = jnp.einsum('c,tcd->d', in_b, tok_w)
    pe_const = (jnp.tile(positional_embedding(L, d_model), (B, 1))
                + params['time_b'][None, :] + beta_const[None, :]).astype(F32)

    # Combined head+sample block-diagonal additive mask for stacked-heads
    # attention (row = head*BL + b*L + t), built host-side.
    idx = jnp.arange(n_heads * BL)
    head = idx // BL
    sample = (idx % BL) // L
    valid = (head[:, None] == head[None, :]) & (sample[:, None] == sample[None, :])
    neg_mask = jnp.where(valid, 0.0, -1e30).astype(F32)

    # One-hot last-timestep selector (exact f32 matmul gather in-kernel).
    sel = jax.nn.one_hot(jnp.arange(B) * L + (L - 1), BL, dtype=F32)  # (B, BL)

    entries, rows, width = _vec_layout(d_model, d_ff, e_layers)
    vec_pack = _pack_vec(params, entries, rows, width)

    # Per-head weight splits, stacked across (layer, q/k/v, head) -> few DMAs.
    def split_cols(w):                              # (D,D) -> (H, D, hd)
        return w.reshape(d_model, n_heads, hd).transpose(1, 0, 2)

    wqkv_h = jnp.stack([
        jnp.stack([split_cols(lp['wq']), split_cols(lp['wk']),
                   split_cols(lp['wv'])], axis=0)
        for lp in params['layers']], axis=0).astype(BF16)   # (nl,3,H,D,hd)
    wo_h = jnp.stack([lp['wo'].reshape(n_heads, hd, d_model)
                      for lp in params['layers']], axis=0).astype(BF16)  # (nl,H,hd,D)
    w1 = jnp.stack([lp['w1'] for lp in params['layers']], 0).astype(BF16)
    w2 = jnp.stack([lp['w2'] for lp in params['layers']], 0).astype(BF16)

    # Q/K/V biases broadcast host-side to the stacked-heads layout.
    def stack_bias(b):                              # (D,) -> (H*BL, hd)
        return jnp.tile(b.reshape(n_heads, 1, hd),
                        (1, BL, 1)).reshape(n_heads * BL, hd)
    bstk = jnp.stack([
        jnp.stack([stack_bias(lp['bq']), stack_bias(lp['bk']),
                   stack_bias(lp['bv'])], axis=0)
        for lp in params['layers']], axis=0).astype(F32)    # (nl,3,H*BL,hd)

    time_w = params['time_w'].astype(BF16)
    pre_w = params['pre_w'].astype(BF16)
    fc_w = params['fc_w'].astype(BF16)

    args = [x_stack, tf, pe_const, neg_mask, sel, vec_pack, bstk,
            tok_w_folded, time_w, wqkv_h, wo_h, w1, w2, pre_w, fc_w]

    kern = functools.partial(
        fused_informer_kernel, n_heads=n_heads, n_layers=e_layers,
        n_batch=B, seq_len=L, d_model=d_model, rows=rows)

    # No grid: whole model (<1 MiB weights + a tiny activation) is resident in
    # VMEM on every TPU generation; a single invocation avoids the 1-step
    # pipeline scaffolding.  (At much larger B, add a parallel batch grid axis
    # so v7x's second TensorCore is used and the (H*BL)^2 scores stay < VMEM.)
    vmem_spec = pl.BlockSpec(memory_space=pltpu.MemorySpace.VMEM)
    return pl.pallas_call(
        kern,
        out_shape=jax.ShapeDtypeStruct((B, 1), F32),
        in_specs=[vmem_spec] * len(args),
        out_specs=vmem_spec,
    )(*args)


# ------------------------------ parameter init -------------------------------

def init_params(key, enc_in, d_model, n_heads, d_ff, e_layers):
    keys = iter(jax.random.split(key, 4 + 6 * e_layers))

    def xav(shape, fan_in, fan_out):
        lim = math.sqrt(6.0 / (fan_in + fan_out))
        return jax.random.uniform(next(keys), shape, F32, -lim, lim)

    p = {
        'in_g': jnp.ones((enc_in,), F32),
        'in_b': jnp.zeros((enc_in,), F32),
        'time_b': jnp.zeros((d_model,), F32),
        'enc_g': jnp.ones((d_model,), F32),
        'enc_b': jnp.zeros((d_model,), F32),
        'pre_b': jnp.zeros((d_model // 2,), F32),
        'fc_b': jnp.zeros((1,), F32),
    }
    tok = xav((3, enc_in, d_model), enc_in * 3, d_model * 3)  # conv taps (in,out)
    p['tok_w0'], p['tok_w1'], p['tok_w2'] = tok[0], tok[1], tok[2]
    p['time_w'] = xav((4, d_model), 4, d_model)
    p['pre_w'] = xav((d_model, d_model // 2), d_model, d_model // 2)
    p['fc_w'] = xav((d_model // 2, 1), d_model // 2, 1)

    layers = []
    for _ in range(e_layers):
        layers.append({
            'wq': xav((d_model, d_model), d_model, d_model),
            'bq': jnp.zeros((d_model,), F32),
            'wk': xav((d_model, d_model), d_model, d_model),
            'bk': jnp.zeros((d_model,), F32),
            'wv': xav((d_model, d_model), d_model, d_model),
            'bv': jnp.zeros((d_model,), F32),
            'wo': xav((d_model, d_model), d_model, d_model),
            'bo': jnp.zeros((d_model,), F32),
            'ln1_g': jnp.ones((d_model,), F32),
            'ln1_b': jnp.zeros((d_model,), F32),
            'w1': xav((d_model, d_ff), d_model, d_ff),
            'b1': jnp.zeros((d_ff,), F32),
            'w2': xav((d_ff, d_model), d_ff, d_model),
            'b2': jnp.zeros((d_model,), F32),
            'ln2_g': jnp.ones((d_model,), F32),
            'ln2_b': jnp.zeros((d_model,), F32),
        })
    p['layers'] = layers
    return p


# ----------------------------------- main ------------------------------------

if __name__ == "__main__":
    B, L = 2, 8
    enc_in, d_model, n_heads, e_layers, d_ff = 16, 64, 4, 2, 256

    key = jax.random.PRNGKey(0)
    kx, kt, kp = jax.random.split(key, 3)
    x = jax.random.normal(kx, (B, 1, L, enc_in), F32)
    time_features = jax.random.normal(kt, (B, L, 4), F32)
    params = init_params(kp, enc_in, d_model, n_heads, d_ff, e_layers)

    fwd = jax.jit(functools.partial(informer_forward, n_heads=n_heads))
    out = jax.block_until_ready(fwd(x, time_features, params))
    assert out.shape == (B, 1)
    assert bool(jnp.all(jnp.isfinite(out)))
    print("KERNEL_OK")
</pallas_src>

<mosaic_0001>
module attributes {stable_mosaic.version = 11 : i64} {
  func.func @fused_informer_kernel(%arg0: memref<3x16x16xf32, #tpu.memory_space<vmem>>, %arg1: memref<16x4xf32, #tpu.memory_space<vmem>>, %arg2: memref<16x64xf32, #tpu.memory_space<vmem>>, %arg3: memref<64x64xf32, #tpu.memory_space<vmem>>, %arg4: memref<2x16xf32, #tpu.memory_space<vmem>>, %arg5: memref<18x256xf32, #tpu.memory_space<vmem>>, %arg6: memref<2x3x64x16xf32, #tpu.memory_space<vmem>>, %arg7: memref<3x16x64xbf16, #tpu.memory_space<vmem>>, %arg8: memref<4x64xbf16, #tpu.memory_space<vmem>>, %arg9: memref<2x3x4x64x16xbf16, #tpu.memory_space<vmem>>, %arg10: memref<2x4x16x64xbf16, #tpu.memory_space<vmem>>, %arg11: memref<2x64x256xbf16, #tpu.memory_space<vmem>>, %arg12: memref<2x256x64xbf16, #tpu.memory_space<vmem>>, %arg13: memref<64x32xbf16, #tpu.memory_space<vmem>>, %arg14: memref<32x1xbf16, #tpu.memory_space<vmem>>, %arg15: memref<2x1xf32, #tpu.memory_space<vmem>>) attributes {dimension_semantics = [], scalar_prefetch = 0 : i64, scratch_operands = 0 : i64, tpu.core_type = #tpu.core_type<tc>} {
    %c0 = arith.constant 0 : index
    %c0_0 = arith.constant 0 : index
    %c0_1 = arith.constant 0 : index
    %0 = vector.load %arg0[%c0, %c0_0, %c0_1] : memref<3x16x16xf32, #tpu.memory_space<vmem>>, vector<1x16x16xf32>
    %1 = vector.shape_cast %0 : vector<1x16x16xf32> to vector<16x16xf32>
    %cst = arith.constant dense<0.000000e+00> : vector<16xf32>
    %2 = vector.multi_reduction <add>, %1, %cst [1] : vector<16x16xf32> to vector<16xf32>
    %3 = vector.shape_cast %2 : vector<16xf32> to vector<16x1xf32>
    %cst_2 = arith.constant 1.600000e+01 : f32
    %4 = vector.broadcast %cst_2 : f32 to vector<16x1xf32>
    %5 = arith.divf %3, %4 : vector<16x1xf32>
    %6 = vector.broadcast %5 : vector<16x1xf32> to vector<16x16xf32>
    %7 = arith.subf %1, %6 : vector<16x16xf32>
    %8 = arith.mulf %7, %7 : vector<16x16xf32>
    %cst_3 = arith.constant dense<0.000000e+00> : vector<16xf32>
    %9 = vector.multi_reduction <add>, %8, %cst_3 [1] : vector<16x16xf32> to vector<16xf32>
    %10 = vector.shape_cast %9 : vector<16xf32> to vector<16x1xf32>
    %cst_4 = arith.constant 1.600000e+01 : f32
    %11 = vector.broadcast %cst_4 : f32 to vector<16x1xf32>
    %12 = arith.divf %10, %11 : vector<16x1xf32>
    %13 = vector.broadcast %5 : vector<16x1xf32> to vector<16x16xf32>
    %14 = arith.subf %1, %13 : vector<16x16xf32>
    %cst_5 = arith.constant 9.99999974E-6 : f32
    %15 = vector.broadcast %cst_5 : f32 to vector<16x1xf32>
    %16 = arith.addf %12, %15 : vector<16x1xf32>
    %17 = math.rsqrt %16 : vector<16x1xf32>
    %18 = vector.broadcast %17 : vector<16x1xf32> to vector<16x16xf32>
    %19 = arith.mulf %14, %18 : vector<16x16xf32>
    %c0_6 = arith.constant 0 : index
    %c0_7 = arith.constant 0 : index
    %c0_8 = arith.constant 0 : index
    %20 = vector.load %arg7[%c0_6, %c0_7, %c0_8] : memref<3x16x64xbf16, #tpu.memory_space<vmem>>, vector<1x16x64xbf16>
    %21 = vector.shape_cast %20 : vector<1x16x64xbf16> to vector<16x64xbf16>
    %22 = arith.truncf %19 : vector<16x16xf32> to vector<16x16xbf16>
    %cst_9 = arith.constant dense<0.000000e+00> : vector<16x64xf32>
    %23 = tpu.matmul %22, %21, %cst_9 {dimension_numbers = #tpu.dot_dimension_numbers<[1], [0], [0], [1], [0, 0, 1, 1], [], []>} : vector<16x16xbf16>, vector<16x64xbf16>, vector<16x64xf32> -> vector<16x64xf32>
    %c1 = arith.constant 1 : index
    %c0_10 = arith.constant 0 : index
    %c0_11 = arith.constant 0 : index
    %24 = vector.load %arg0[%c1, %c0_10, %c0_11] : memref<3x16x16xf32, #tpu.memory_space<vmem>>, vector<1x16x16xf32>
    %25 = vector.shape_cast %24 : vector<1x16x16xf32> to vector<16x16xf32>
    %cst_12 = arith.constant dense<0.000000e+00> : vector<16xf32>
    %26 = vector.multi_reduction <add>, %25, %cst_12 [1] : vector<16x16xf32> to vector<16xf32>
    %27 = vector.shape_cast %26 : vector<16xf32> to vector<16x1xf32>
    %cst_13 = arith.constant 1.600000e+01 : f32
    %28 = vector.broadcast %cst_13 : f32 to vector<16x1xf32>
    %29 = arith.divf %27, %28 : vector<16x1xf32>
    %30 = vector.broadcast %29 : vector<16x1xf32> to vector<16x16xf32>
    %31 = arith.subf %25, %30 : vector<16x16xf32>
    %32 = arith.mulf %31, %31 : vector<16x16xf32>
    %cst_14 = arith.constant dense<0.000000e+00> : vector<16xf32>
    %33 = vector.multi_reduction <add>, %32, %cst_14 [1] : vector<16x16xf32> to vector<16xf32>
    %34 = vector.shape_cast %33 : vector<16xf32> to vector<16x1xf32>
    %cst_15 = arith.constant 1.600000e+01 : f32
    %35 = vector.broadcast %cst_15 : f32 to vector<16x1xf32>
    %36 = arith.divf %34, %35 : vector<16x1xf32>
    %37 = vector.broadcast %29 : vector<16x1xf32> to vector<16x16xf32>
    %38 = arith.subf %25, %37 : vector<16x16xf32>
    %cst_16 = arith.constant 9.99999974E-6 : f32
    %39 = vector.broadcast %cst_16 : f32 to vector<16x1xf32>
    %40 = arith.addf %36, %39 : vector<16x1xf32>
    %41 = math.rsqrt %40 : vector<16x1xf32>
    %42 = vector.broadcast %41 : vector<16x1xf32> to vector<16x16xf32>
    %43 = arith.mulf %38, %42 : vector<16x16xf32>
    %c1_17 = arith.constant 1 : index
    %c0_18 = arith.constant 0 : index
    %c0_19 = arith.constant 0 : index
    %44 = vector.load %arg7[%c1_17, %c0_18, %c0_19] : memref<3x16x64xbf16, #tpu.memory_space<vmem>>, vector<1x16x64xbf16>
    %45 = vector.shape_cast %44 : vector<1x16x64xbf16> to vector<16x64xbf16>
    %46 = arith.truncf %43 : vector<16x16xf32> to vector<16x16xbf16>
    %cst_20 = arith.constant dense<0.000000e+00> : vector<16x64xf32>
    %47 = tpu.matmul %46, %45, %cst_20 {dimension_numbers = #tpu.dot_dimension_numbers<[1], [0], [0], [1], [0, 0, 1, 1], [], []>} : vector<16x16xbf16>, vector<16x64xbf16>, vector<16x64xf32> -> vector<16x64xf32>
    %48 = arith.addf %23, %47 : vector<16x64xf32>
    %c2 = arith.constant 2 : index
    %c0_21 = arith.constant 0 : index
    %c0_22 = arith.constant 0 : index
    %49 = vector.load %arg0[%c2, %c0_21, %c0_22] : memref<3x16x16xf32, #tpu.memory_space<vmem>>, vector<1x16x16xf32>
    %50 = vector.shape_cast %49 : vector<1x16x16xf32> to vector<16x16xf32>
    %cst_23 = arith.constant dense<0.000000e+00> : vector<16xf32>
    %51 = vector.multi_reduction <add>, %50, %cst_23 [1] : vector<16x16xf32> to vector<16xf32>
    %52 = vector.shape_cast %51 : vector<16xf32> to vector<16x1xf32>
    %cst_24 = arith.constant 1.600000e+01 : f32
    %53 = vector.broadcast %cst_24 : f32 to vector<16x1xf32>
    %54 = arith.divf %52, %53 : vector<16x1xf32>
    %55 = vector.broadcast %54 : vector<16x1xf32> to vector<16x16xf32>
    %56 = arith.subf %50, %55 : vector<16x16xf32>
    %57 = arith.mulf %56, %56 : vector<16x16xf32>
    %cst_25 = arith.constant dense<0.000000e+00> : vector<16xf32>
    %58 = vector.multi_reduction <add>, %57, %cst_25 [1] : vector<16x16xf32> to vector<16xf32>
    %59 = vector.shape_cast %58 : vector<16xf32> to vector<16x1xf32>
    %cst_26 = arith.constant 1.600000e+01 : f32
    %60 = vector.broadcast %cst_26 : f32 to vector<16x1xf32>
    %61 = arith.divf %59, %60 : vector<16x1xf32>
    %62 = vector.broadcast %54 : vector<16x1xf32> to vector<16x16xf32>
    %63 = arith.subf %50, %62 : vector<16x16xf32>
    %cst_27 = arith.constant 9.99999974E-6 : f32
    %64 = vector.broadcast %cst_27 : f32 to vector<16x1xf32>
    %65 = arith.addf %61, %64 : vector<16x1xf32>
    %66 = math.rsqrt %65 : vector<16x1xf32>
    %67 = vector.broadcast %66 : vector<16x1xf32> to vector<16x16xf32>
    %68 = arith.mulf %63, %67 : vector<16x16xf32>
    %c2_28 = arith.constant 2 : index
    %c0_29 = arith.constant 0 : index
    %c0_30 = arith.constant 0 : index
    %69 = vector.load %arg7[%c2_28, %c0_29, %c0_30] : memref<3x16x64xbf16, #tpu.memory_space<vmem>>, vector<1x16x64xbf16>
    %70 = vector.shape_cast %69 : vector<1x16x64xbf16> to vector<16x64xbf16>
    %71 = arith.truncf %68 : vector<16x16xf32> to vector<16x16xbf16>
    %cst_31 = arith.constant dense<0.000000e+00> : vector<16x64xf32>
    %72 = tpu.matmul %71, %70, %cst_31 {dimension_numbers = #tpu.dot_dimension_numbers<[1], [0], [0], [1], [0, 0, 1, 1], [], []>} : vector<16x16xbf16>, vector<16x64xbf16>, vector<16x64xf32> -> vector<16x64xf32>
    %73 = arith.addf %48, %72 : vector<16x64xf32>
    %c0_32 = arith.constant 0 : index
    %c0_33 = arith.constant 0 : index
    %74 = vector.load %arg1[%c0_32, %c0_33] : memref<16x4xf32, #tpu.memory_space<vmem>>, vector<16x4xf32>
    %c0_34 = arith.constant 0 : index
    %c0_35 = arith.constant 0 : index
    %75 = vector.load %arg8[%c0_34, %c0_35] : memref<4x64xbf16, #tpu.memory_space<vmem>>, vector<4x64xbf16>
    %76 = arith.truncf %74 : vector<16x4xf32> to vector<16x4xbf16>
    %cst_36 = arith.constant dense<0.000000e+00> : vector<16x64xf32>
    %77 = tpu.matmul %76, %75, %cst_36 {dimension_numbers = #tpu.dot_dimension_numbers<[1], [0], [0], [1], [0, 0, 1, 1], [], []>} : vector<16x4xbf16>, vector<4x64xbf16>, vector<16x64xf32> -> vector<16x64xf32>
    %78 = arith.addf %73, %77 : vector<16x64xf32>
    %c0_37 = arith.constant 0 : index
    %c0_38 = arith.constant 0 : index
    %79 = vector.load %arg2[%c0_37, %c0_38] : memref<16x64xf32, #tpu.memory_space<vmem>>, vector<16x64xf32>
    %80 = arith.addf %78, %79 : vector<16x64xf32>
    %c0_39 = arith.constant 0 : index
    %c0_40 = arith.constant 0 : index
    %81 = vector.load %arg3[%c0_39, %c0_40] : memref<64x64xf32, #tpu.memory_space<vmem>>, vector<64x64xf32>
    %c0_41 = arith.constant 0 : index
    %c0_42 = arith.constant 0 : index
    %c0_43 = arith.constant 0 : index
    %c0_44 = arith.constant 0 : index
    %c0_45 = arith.constant 0 : index
    %82 = vector.load %arg9[%c0_41, %c0_42, %c0_43, %c0_44, %c0_45] : memref<2x3x4x64x16xbf16, #tpu.memory_space<vmem>>, vector<1x1x1x64x16xbf16>
    %83 = vector.shape_cast %82 : vector<1x1x1x64x16xbf16> to vector<64x16xbf16>
    %84 = arith.truncf %80 : vector<16x64xf32> to vector<16x64xbf16>
    %cst_46 = arith.constant dense<0.000000e+00> : vector<16x16xf32>
    %85 = tpu.matmul %84, %83, %cst_46 {dimension_numbers = #tpu.dot_dimension_numbers<[1], [0], [0], [1], [0, 0, 1, 1], [], []>} : vector<16x64xbf16>, vector<64x16xbf16>, vector<16x16xf32> -> vector<16x16xf32>
    %c0_47 = arith.constant 0 : index
    %c0_48 = arith.constant 0 : index
    %c1_49 = arith.constant 1 : index
    %c0_50 = arith.constant 0 : index
    %c0_51 = arith.constant 0 : index
    %86 = vector.load %arg9[%c0_47, %c0_48, %c1_49, %c0_50, %c0_51] : memref<2x3x4x64x16xbf16, #tpu.memory_space<vmem>>, vector<1x1x1x64x16xbf16>
    %87 = vector.shape_cast %86 : vector<1x1x1x64x16xbf16> to vector<64x16xbf16>
    %88 = arith.truncf %80 : vector<16x64xf32> to vector<16x64xbf16>
    %cst_52 = arith.constant dense<0.000000e+00> : vector<16x16xf32>
    %89 = tpu.matmul %88, %87, %cst_52 {dimension_numbers = #tpu.dot_dimension_numbers<[1], [0], [0], [1], [0, 0, 1, 1], [], []>} : vector<16x64xbf16>, vector<64x16xbf16>, vector<16x16xf32> -> vector<16x16xf32>
    %c0_53 = arith.constant 0 : index
    %c0_54 = arith.constant 0 : index
    %c2_55 = arith.constant 2 : index
    %c0_56 = arith.constant 0 : index
    %c0_57 = arith.constant 0 : index
    %90 = vector.load %arg9[%c0_53, %c0_54, %c2_55, %c0_56, %c0_57] : memref<2x3x4x64x16xbf16, #tpu.memory_space<vmem>>, vector<1x1x1x64x16xbf16>
    %91 = vector.shape_cast %90 : vector<1x1x1x64x16xbf16> to vector<64x16xbf16>
    %92 = arith.truncf %80 : vector<16x64xf32> to vector<16x64xbf16>
    %cst_58 = arith.constant dense<0.000000e+00> : vector<16x16xf32>
    %93 = tpu.matmul %92, %91, %cst_58 {dimension_numbers = #tpu.dot_dimension_numbers<[1], [0], [0], [1], [0, 0, 1, 1], [], []>} : vector<16x64xbf16>, vector<64x16xbf16>, vector<16x16xf32> -> vector<16x16xf32>
    %c0_59 = arith.constant 0 : index
    %c0_60 = arith.constant 0 : index
    %c3 = arith.constant 3 : index
    %c0_61 = arith.constant 0 : index
    %c0_62 = arith.constant 0 : index
    %94 = vector.load %arg9[%c0_59, %c0_60, %c3, %c0_61, %c0_62] : memref<2x3x4x64x16xbf16, #tpu.memory_space<vmem>>, vector<1x1x1x64x16xbf16>
    %95 = vector.shape_cast %94 : vector<1x1x1x64x16xbf16> to vector<64x16xbf16>
    %96 = arith.truncf %80 : vector<16x64xf32> to vector<16x64xbf16>
    %cst_63 = arith.constant dense<0.000000e+00> : vector<16x16xf32>
    %97 = tpu.matmul %96, %95, %cst_63 {dimension_numbers = #tpu.dot_dimension_numbers<[1], [0], [0], [1], [0, 0, 1, 1], [], []>} : vector<16x64xbf16>, vector<64x16xbf16>, vector<16x16xf32> -> vector<16x16xf32>
    %98 = tpu.concatenate %85, %89, %93, %97 in 0 : vector<16x16xf32>, vector<16x16xf32>, vector<16x16xf32>, vector<16x16xf32> -> vector<64x16xf32>
    %c0_64 = arith.constant 0 : index
    %c0_65 = arith.constant 0 : index
    %c0_66 = arith.constant 0 : index
    %c0_67 = arith.constant 0 : index
    %99 = vector.load %arg6[%c0_64, %c0_65, %c0_66, %c0_67] : memref<2x3x64x16xf32, #tpu.memory_space<vmem>>, vector<1x1x64x16xf32>
    %100 = vector.shape_cast %99 : vector<1x1x64x16xf32> to vector<64x16xf32>
    %101 = arith.addf %98, %100 : vector<64x16xf32>
    %c0_68 = arith.constant 0 : index
    %c1_69 = arith.constant 1 : index
    %c0_70 = arith.constant 0 : index
    %c0_71 = arith.constant 0 : index
    %c0_72 = arith.constant 0 : index
    %102 = vector.load %arg9[%c0_68, %c1_69, %c0_70, %c0_71, %c0_72] : memref<2x3x4x64x16xbf16, #tpu.memory_space<vmem>>, vector<1x1x1x64x16xbf16>
    %103 = vector.shape_cast %102 : vector<1x1x1x64x16xbf16> to vector<64x16xbf16>
    %104 = arith.truncf %80 : vector<16x64xf32> to vector<16x64xbf16>
    %cst_73 = arith.constant dense<0.000000e+00> : vector<16x16xf32>
    %105 = tpu.matmul %104, %103, %cst_73 {dimension_numbers = #tpu.dot_dimension_numbers<[1], [0], [0], [1], [0, 0, 1, 1], [], []>} : vector<16x64xbf16>, vector<64x16xbf16>, vector<16x16xf32> -> vector<16x16xf32>
    %c0_74 = arith.constant 0 : index
    %c1_75 = arith.constant 1 : index
    %c1_76 = arith.constant 1 : index
    %c0_77 = arith.constant 0 : index
    %c0_78 = arith.constant 0 : index
    %106 = vector.load %arg9[%c0_74, %c1_75, %c1_76, %c0_77, %c0_78] : memref<2x3x4x64x16xbf16, #tpu.memory_space<vmem>>, vector<1x1x1x64x16xbf16>
    %107 = vector.shape_cast %106 : vector<1x1x1x64x16xbf16> to vector<64x16xbf16>
    %108 = arith.truncf %80 : vector<16x64xf32> to vector<16x64xbf16>
    %cst_79 = arith.constant dense<0.000000e+00> : vector<16x16xf32>
    %109 = tpu.matmul %108, %107, %cst_79 {dimension_numbers = #tpu.dot_dimension_numbers<[1], [0], [0], [1], [0, 0, 1, 1], [], []>} : vector<16x64xbf16>, vector<64x16xbf16>, vector<16x16xf32> -> vector<16x16xf32>
    %c0_80 = arith.constant 0 : index
    %c1_81 = arith.constant 1 : index
    %c2_82 = arith.constant 2 : index
    %c0_83 = arith.constant 0 : index
    %c0_84 = arith.constant 0 : index
    %110 = vector.load %arg9[%c0_80, %c1_81, %c2_82, %c0_83, %c0_84] : memref<2x3x4x64x16xbf16, #tpu.memory_space<vmem>>, vector<1x1x1x64x16xbf16>
    %111 = vector.shape_cast %110 : vector<1x1x1x64x16xbf16> to vector<64x16xbf16>
    %112 = arith.truncf %80 : vector<16x64xf32> to vector<16x64xbf16>
    %cst_85 = arith.constant dense<0.000000e+00> : vector<16x16xf32>
    %113 = tpu.matmul %112, %111, %cst_85 {dimension_numbers = #tpu.dot_dimension_numbers<[1], [0], [0], [1], [0, 0, 1, 1], [], []>} : vector<16x64xbf16>, vector<64x16xbf16>, vector<16x16xf32> -> vector<16x16xf32>
    %c0_86 = arith.constant 0 : index
    %c1_87 = arith.constant 1 : index
    %c3_88 = arith.constant 3 : index
    %c0_89 = arith.constant 0 : index
    %c0_90 = arith.constant 0 : index
    %114 = vector.load %arg9[%c0_86, %c1_87, %c3_88, %c0_89, %c0_90] : memref<2x3x4x64x16xbf16, #tpu.memory_space<vmem>>, vector<1x1x1x64x16xbf16>
    %115 = vector.shape_cast %114 : vector<1x1x1x64x16xbf16> to vector<64x16xbf16>
    %116 = arith.truncf %80 : vector<16x64xf32> to vector<16x64xbf16>
    %cst_91 = arith.constant dense<0.000000e+00> : vector<16x16xf32>
    %117 = tpu.matmul %116, %115, %cst_91 {dimension_numbers = #tpu.dot_dimension_numbers<[1], [0], [0], [1], [0, 0, 1, 1], [], []>} : vector<16x64xbf16>, vector<64x16xbf16>, vector<16x16xf32> -> vector<16x16xf32>
    %118 = tpu.concatenate %105, %109, %113, %117 in 0 : vector<16x16xf32>, vector<16x16xf32>, vector<16x16xf32>, vector<16x16xf32> -> vector<64x16xf32>
    %c0_92 = arith.constant 0 : index
    %c1_93 = arith.constant 1 : index
    %c0_94 = arith.constant 0 : index
    %c0_95 = arith.constant 0 : index
    %119 = vector.load %arg6[%c0_92, %c1_93, %c0_94, %c0_95] : memref<2x3x64x16xf32, #tpu.memory_space<vmem>>, vector<1x1x64x16xf32>
    %120 = vector.shape_cast %119 : vector<1x1x64x16xf32> to vector<64x16xf32>
    %121 = arith.addf %118, %120 : vector<64x16xf32>
    %c0_96 = arith.constant 0 : index
    %c2_97 = arith.constant 2 : index
    %c0_98 = arith.constant 0 : index
    %c0_99 = arith.constant 0 : index
    %c0_100 = arith.constant 0 : index
    %122 = vector.load %arg9[%c0_96, %c2_97, %c0_98, %c0_99, %c0_100] : memref<2x3x4x64x16xbf16, #tpu.memory_space<vmem>>, vector<1x1x1x64x16xbf16>
    %123 = vector.shape_cast %122 : vector<1x1x1x64x16xbf16> to vector<64x16xbf16>
    %124 = arith.truncf %80 : vector<16x64xf32> to vector<16x64xbf16>
    %cst_101 = arith.constant dense<0.000000e+00> : vector<16x16xf32>
    %125 = tpu.matmul %124, %123, %cst_101 {dimension_numbers = #tpu.dot_dimension_numbers<[1], [0], [0], [1], [0, 0, 1, 1], [], []>} : vector<16x64xbf16>, vector<64x16xbf16>, vector<16x16xf32> -> vector<16x16xf32>
    %c0_102 = arith.constant 0 : index
    %c2_103 = arith.constant 2 : index
    %c1_104 = arith.constant 1 : index
    %c0_105 = arith.constant 0 : index
    %c0_106 = arith.constant 0 : index
    %126 = vector.load %arg9[%c0_102, %c2_103, %c1_104, %c0_105, %c0_106] : memref<2x3x4x64x16xbf16, #tpu.memory_space<vmem>>, vector<1x1x1x64x16xbf16>
    %127 = vector.shape_cast %126 : vector<1x1x1x64x16xbf16> to vector<64x16xbf16>
    %128 = arith.truncf %80 : vector<16x64xf32> to vector<16x64xbf16>
    %cst_107 = arith.constant dense<0.000000e+00> : vector<16x16xf32>
    %129 = tpu.matmul %128, %127, %cst_107 {dimension_numbers = #tpu.dot_dimension_numbers<[1], [0], [0], [1], [0, 0, 1, 1], [], []>} : vector<16x64xbf16>, vector<64x16xbf16>, vector<16x16xf32> -> vector<16x16xf32>
    %c0_108 = arith.constant 0 : index
    %c2_109 = arith.constant 2 : index
    %c2_110 = arith.constant 2 : index
    %c0_111 = arith.constant 0 : index
    %c0_112 = arith.constant 0 : index
    %130 = vector.load %arg9[%c0_108, %c2_109, %c2_110, %c0_111, %c0_112] : memref<2x3x4x64x16xbf16, #tpu.memory_space<vmem>>, vector<1x1x1x64x16xbf16>
    %131 = vector.shape_cast %130 : vector<1x1x1x64x16xbf16> to vector<64x16xbf16>
    %132 = arith.truncf %80 : vector<16x64xf32> to vector<16x64xbf16>
    %cst_113 = arith.constant dense<0.000000e+00> : vector<16x16xf32>
    %133 = tpu.matmul %132, %131, %cst_113 {dimension_numbers = #tpu.dot_dimension_numbers<[1], [0], [0], [1], [0, 0, 1, 1], [], []>} : vector<16x64xbf16>, vector<64x16xbf16>, vector<16x16xf32> -> vector<16x16xf32>
    %c0_114 = arith.constant 0 : index
    %c2_115 = arith.constant 2 : index
    %c3_116 = arith.constant 3 : index
    %c0_117 = arith.constant 0 : index
    %c0_118 = arith.constant 0 : index
    %134 = vector.load %arg9[%c0_114, %c2_115, %c3_116, %c0_117, %c0_118] : memref<2x3x4x64x16xbf16, #tpu.memory_space<vmem>>, vector<1x1x1x64x16xbf16>
    %135 = vector.shape_cast %134 : vector<1x1x1x64x16xbf16> to vector<64x16xbf16>
    %136 = arith.truncf %80 : vector<16x64xf32> to vector<16x64xbf16>
    %cst_119 = arith.constant dense<0.000000e+00> : vector<16x16xf32>
    %137 = tpu.matmul %136, %135, %cst_119 {dimension_numbers = #tpu.dot_dimension_numbers<[1], [0], [0], [1], [0, 0, 1, 1], [], []>} : vector<16x64xbf16>, vector<64x16xbf16>, vector<16x16xf32> -> vector<16x16xf32>
    %138 = tpu.concatenate %125, %129, %133, %137 in 0 : vector<16x16xf32>, vector<16x16xf32>, vector<16x16xf32>, vector<16x16xf32> -> vector<64x16xf32>
    %c0_120 = arith.constant 0 : index
    %c2_121 = arith.constant 2 : index
    %c0_122 = arith.constant 0 : index
    %c0_123 = arith.constant 0 : index
    %139 = vector.load %arg6[%c0_120, %c2_121, %c0_122, %c0_123] : memref<2x3x64x16xf32, #tpu.memory_space<vmem>>, vector<1x1x64x16xf32>
    %140 = vector.shape_cast %139 : vector<1x1x64x16xf32> to vector<64x16xf32>
    %141 = arith.addf %138, %140 : vector<64x16xf32>
    %142 = arith.truncf %101 : vector<64x16xf32> to vector<64x16xbf16>
    %143 = arith.truncf %121 : vector<64x16xf32> to vector<64x16xbf16>
    %cst_124 = arith.constant dense<0.000000e+00> : vector<64x64xf32>
    %144 = tpu.matmul %142, %143, %cst_124 {dimension_numbers = #tpu.dot_dimension_numbers<[1], [1], [0], [0], [0, 0, 1, 0], [], []>} : vector<64x16xbf16>, vector<64x16xbf16>, vector<64x64xf32> -> vector<64x64xf32>
    %cst_125 = arith.constant 2.500000e-01 : f32
    %145 = vector.broadcast %cst_125 : f32 to vector<64x64xf32>
    %146 = arith.mulf %144, %145 : vector<64x64xf32>
    %147 = arith.addf %146, %81 : vector<64x64xf32>
    %cst_126 = arith.constant dense<0xFF800000> : vector<64xf32>
    %148 = vector.multi_reduction <maximumf>, %147, %cst_126 [1] : vector<64x64xf32> to vector<64xf32>
    %149 = vector.shape_cast %148 : vector<64xf32> to vector<64x1xf32>
    %150 = vector.broadcast %149 : vector<64x1xf32> to vector<64x64xf32>
    %151 = arith.subf %147, %150 : vector<64x64xf32>
    %152 = math.exp %151 : vector<64x64xf32>
    %cst_127 = arith.constant dense<0.000000e+00> : vector<64xf32>
    %153 = vector.multi_reduction <add>, %152, %cst_127 [1] : vector<64x64xf32> to vector<64xf32>
    %154 = vector.shape_cast %153 : vector<64xf32> to vector<64x1xf32>
    %155 = tpu.reciprocal %154 {approx = true} : vector<64x1xf32> -> vector<64x1xf32>
    %156 = vector.broadcast %155 : vector<64x1xf32> to vector<64x64xf32>
    %157 = arith.mulf %152, %156 : vector<64x64xf32>
    %158 = arith.truncf %157 : vector<64x64xf32> to vector<64x64xbf16>
    %159 = arith.truncf %141 : vector<64x16xf32> to vector<64x16xbf16>
    %cst_128 = arith.constant dense<0.000000e+00> : vector<64x16xf32>
    %160 = tpu.matmul %158, %159, %cst_128 {dimension_numbers = #tpu.dot_dimension_numbers<[1], [0], [0], [1], [0, 0, 1, 1], [], []>} : vector<64x64xbf16>, vector<64x16xbf16>, vector<64x16xf32> -> vector<64x16xf32>
    %161 = vector.extract_strided_slice %160 {offsets = [0, 0], sizes = [16, 16], strides = [1, 1]} : vector<64x16xf32> to vector<16x16xf32>
    %c0_129 = arith.constant 0 : index
    %c0_130 = arith.constant 0 : index
    %c0_131 = arith.constant 0 : index
    %c0_132 = arith.constant 0 : index
    %162 = vector.load %arg10[%c0_129, %c0_130, %c0_131, %c0_132] : memref<2x4x16x64xbf16, #tpu.memory_space<vmem>>, vector<1x1x16x64xbf16>
    %163 = vector.shape_cast %162 : vector<1x1x16x64xbf16> to vector<16x64xbf16>
    %164 = arith.truncf %161 : vector<16x16xf32> to vector<16x16xbf16>
    %cst_133 = arith.constant dense<0.000000e+00> : vector<16x64xf32>
    %165 = tpu.matmul %164, %163, %cst_133 {dimension_numbers = #tpu.dot_dimension_numbers<[1], [0], [0], [1], [0, 0, 1, 1], [], []>} : vector<16x16xbf16>, vector<16x64xbf16>, vector<16x64xf32> -> vector<16x64xf32>
    %166 = vector.extract_strided_slice %160 {offsets = [16, 0], sizes = [16, 16], strides = [1, 1]} : vector<64x16xf32> to vector<16x16xf32>
    %c0_134 = arith.constant 0 : index
    %c1_135 = arith.constant 1 : index
    %c0_136 = arith.constant 0 : index
    %c0_137 = arith.constant 0 : index
    %167 = vector.load %arg10[%c0_134, %c1_135, %c0_136, %c0_137] : memref<2x4x16x64xbf16, #tpu.memory_space<vmem>>, vector<1x1x16x64xbf16>
    %168 = vector.shape_cast %167 : vector<1x1x16x64xbf16> to vector<16x64xbf16>
    %169 = arith.truncf %166 : vector<16x16xf32> to vector<16x16xbf16>
    %cst_138 = arith.constant dense<0.000000e+00> : vector<16x64xf32>
    %170 = tpu.matmul %169, %168, %cst_138 {dimension_numbers = #tpu.dot_dimension_numbers<[1], [0], [0], [1], [0, 0, 1, 1], [], []>} : vector<16x16xbf16>, vector<16x64xbf16>, vector<16x64xf32> -> vector<16x64xf32>
    %171 = arith.addf %165, %170 : vector<16x64xf32>
    %172 = vector.extract_strided_slice %160 {offsets = [32, 0], sizes = [16, 16], strides = [1, 1]} : vector<64x16xf32> to vector<16x16xf32>
    %c0_139 = arith.constant 0 : index
    %c2_140 = arith.constant 2 : index
    %c0_141 = arith.constant 0 : index
    %c0_142 = arith.constant 0 : index
    %173 = vector.load %arg10[%c0_139, %c2_140, %c0_141, %c0_142] : memref<2x4x16x64xbf16, #tpu.memory_space<vmem>>, vector<1x1x16x64xbf16>
    %174 = vector.shape_cast %173 : vector<1x1x16x64xbf16> to vector<16x64xbf16>
    %175 = arith.truncf %172 : vector<16x16xf32> to vector<16x16xbf16>
    %cst_143 = arith.constant dense<0.000000e+00> : vector<16x64xf32>
    %176 = tpu.matmul %175, %174, %cst_143 {dimension_numbers = #tpu.dot_dimension_numbers<[1], [0], [0], [1], [0, 0, 1, 1], [], []>} : vector<16x16xbf16>, vector<16x64xbf16>, vector<16x64xf32> -> vector<16x64xf32>
    %177 = arith.addf %171, %176 : vector<16x64xf32>
    %178 = vector.extract_strided_slice %160 {offsets = [48, 0], sizes = [16, 16], strides = [1, 1]} : vector<64x16xf32> to vector<16x16xf32>
    %c0_144 = arith.constant 0 : index
    %c3_145 = arith.constant 3 : index
    %c0_146 = arith.constant 0 : index
    %c0_147 = arith.constant 0 : index
    %179 = vector.load %arg10[%c0_144, %c3_145, %c0_146, %c0_147] : memref<2x4x16x64xbf16, #tpu.memory_space<vmem>>, vector<1x1x16x64xbf16>
    %180 = vector.shape_cast %179 : vector<1x1x16x64xbf16> to vector<16x64xbf16>
    %181 = arith.truncf %178 : vector<16x16xf32> to vector<16x16xbf16>
    %cst_148 = arith.constant dense<0.000000e+00> : vector<16x64xf32>
    %182 = tpu.matmul %181, %180, %cst_148 {dimension_numbers = #tpu.dot_dimension_numbers<[1], [0], [0], [1], [0, 0, 1, 1], [], []>} : vector<16x16xbf16>, vector<16x64xbf16>, vector<16x64xf32> -> vector<16x64xf32>
    %183 = arith.addf %177, %182 : vector<16x64xf32>
    %c0_149 = arith.constant 0 : index
    %c0_150 = arith.constant 0 : index
    %184 = vector.load %arg5[%c0_149, %c0_150] : memref<18x256xf32, #tpu.memory_space<vmem>>, vector<1x64xf32>
    %185 = vector.shape_cast %184 : vector<1x64xf32> to vector<64xf32>
    %186 = vector.shape_cast %185 : vector<64xf32> to vector<1x64xf32>
    %187 = vector.broadcast %186 : vector<1x64xf32> to vector<16x64xf32>
    %188 = arith.addf %183, %187 : vector<16x64xf32>
    %189 = arith.addf %80, %188 : vector<16x64xf32>
    %c1_151 = arith.constant 1 : index
    %c0_152 = arith.constant 0 : index
    %190 = vector.load %arg5[%c1_151, %c0_152] : memref<18x256xf32, #tpu.memory_space<vmem>>, vector<1x64xf32>
    %191 = vector.shape_cast %190 : vector<1x64xf32> to vector<64xf32>
    %c2_153 = arith.constant 2 : index
    %c0_154 = arith.constant 0 : index
    %192 = vector.load %arg5[%c2_153, %c0_154] : memref<18x256xf32, #tpu.memory_space<vmem>>, vector<1x64xf32>
    %193 = vector.shape_cast %192 : vector<1x64xf32> to vector<64xf32>
    %cst_155 = arith.constant dense<0.000000e+00> : vector<16xf32>
    %194 = vector.multi_reduction <add>, %189, %cst_155 [1] : vector<16x64xf32> to vector<16xf32>
    %195 = vector.shape_cast %194 : vector<16xf32> to vector<16x1xf32>
    %cst_156 = arith.constant 6.400000e+01 : f32
    %196 = vector.broadcast %cst_156 : f32 to vector<16x1xf32>
    %197 = arith.divf %195, %196 : vector<16x1xf32>
    %198 = vector.broadcast %197 : vector<16x1xf32> to vector<16x64xf32>
    %199 = arith.subf %189, %198 : vector<16x64xf32>
    %200 = arith.mulf %199, %199 : vector<16x64xf32>
    %cst_157 = arith.constant dense<0.000000e+00> : vector<16xf32>
    %201 = vector.multi_reduction <add>, %200, %cst_157 [1] : vector<16x64xf32> to vector<16xf32>
    %202 = vector.shape_cast %201 : vector<16xf32> to vector<16x1xf32>
    %cst_158 = arith.constant 6.400000e+01 : f32
    %203 = vector.broadcast %cst_158 : f32 to vector<16x1xf32>
    %204 = arith.divf %202, %203 : vector<16x1xf32>
    %205 = vector.broadcast %197 : vector<16x1xf32> to vector<16x64xf32>
    %206 = arith.subf %189, %205 : vector<16x64xf32>
    %cst_159 = arith.constant 9.99999974E-6 : f32
    %207 = vector.broadcast %cst_159 : f32 to vector<16x1xf32>
    %208 = arith.addf %204, %207 : vector<16x1xf32>
    %209 = math.rsqrt %208 : vector<16x1xf32>
    %210 = vector.broadcast %209 : vector<16x1xf32> to vector<16x64xf32>
    %211 = arith.mulf %206, %210 : vector<16x64xf32>
    %212 = vector.shape_cast %191 : vector<64xf32> to vector<1x64xf32>
    %213 = vector.broadcast %212 : vector<1x64xf32> to vector<16x64xf32>
    %214 = arith.mulf %211, %213 : vector<16x64xf32>
    %215 = vector.shape_cast %193 : vector<64xf32> to vector<1x64xf32>
    %216 = vector.broadcast %215 : vector<1x64xf32> to vector<16x64xf32>
    %217 = arith.addf %214, %216 : vector<16x64xf32>
    %c0_160 = arith.constant 0 : index
    %c0_161 = arith.constant 0 : index
    %c0_162 = arith.constant 0 : index
    %218 = vector.load %arg11[%c0_160, %c0_161, %c0_162] : memref<2x64x256xbf16, #tpu.memory_space<vmem>>, vector<1x64x256xbf16>
    %219 = vector.shape_cast %218 : vector<1x64x256xbf16> to vector<64x256xbf16>
    %220 = arith.truncf %217 : vector<16x64xf32> to vector<16x64xbf16>
    %cst_163 = arith.constant dense<0.000000e+00> : vector<16x256xf32>
    %221 = tpu.matmul %220, %219, %cst_163 {dimension_numbers = #tpu.dot_dimension_numbers<[1], [0], [0], [1], [0, 0, 1, 1], [], []>} : vector<16x64xbf16>, vector<64x256xbf16>, vector<16x256xf32> -> vector<16x256xf32>
    %c3_164 = arith.constant 3 : index
    %c0_165 = arith.constant 0 : index
    %222 = vector.load %arg5[%c3_164, %c0_165] : memref<18x256xf32, #tpu.memory_space<vmem>>, vector<1x256xf32>
    %223 = vector.shape_cast %222 : vector<1x256xf32> to vector<256xf32>
    %224 = vector.shape_cast %223 : vector<256xf32> to vector<1x256xf32>
    %225 = vector.broadcast %224 : vector<1x256xf32> to vector<16x256xf32>
    %226 = arith.addf %221, %225 : vector<16x256xf32>
    %cst_166 = arith.constant 0.000000e+00 : f32
    %227 = vector.broadcast %cst_166 : f32 to vector<16x256xf32>
    %228 = arith.maximumf %226, %227 : vector<16x256xf32>
    %c0_167 = arith.constant 0 : index
    %c0_168 = arith.constant 0 : index
    %c0_169 = arith.constant 0 : index
    %229 = vector.load %arg12[%c0_167, %c0_168, %c0_169] : memref<2x256x64xbf16, #tpu.memory_space<vmem>>, vector<1x256x64xbf16>
    %230 = vector.shape_cast %229 : vector<1x256x64xbf16> to vector<256x64xbf16>
    %231 = arith.truncf %228 : vector<16x256xf32> to vector<16x256xbf16>
    %cst_170 = arith.constant dense<0.000000e+00> : vector<16x64xf32>
    %232 = tpu.matmul %231, %230, %cst_170 {dimension_numbers = #tpu.dot_dimension_numbers<[1], [0], [0], [1], [0, 0, 1, 1], [], []>} : vector<16x256xbf16>, vector<256x64xbf16>, vector<16x64xf32> -> vector<16x64xf32>
    %c4 = arith.constant 4 : index
    %c0_171 = arith.constant 0 : index
    %233 = vector.load %arg5[%c4, %c0_171] : memref<18x256xf32, #tpu.memory_space<vmem>>, vector<1x64xf32>
    %234 = vector.shape_cast %233 : vector<1x64xf32> to vector<64xf32>
    %235 = vector.shape_cast %234 : vector<64xf32> to vector<1x64xf32>
    %236 = vector.broadcast %235 : vector<1x64xf32> to vector<16x64xf32>
    %237 = arith.addf %232, %236 : vector<16x64xf32>
    %238 = arith.addf %217, %237 : vector<16x64xf32>
    %c5 = arith.constant 5 : index
    %c0_172 = arith.constant 0 : index
    %239 = vector.load %arg5[%c5, %c0_172] : memref<18x256xf32, #tpu.memory_space<vmem>>, vector<1x64xf32>
    %240 = vector.shape_cast %239 : vector<1x64xf32> to vector<64xf32>
    %c6 = arith.constant 6 : index
    %c0_173 = arith.constant 0 : index
    %241 = vector.load %arg5[%c6, %c0_173] : memref<18x256xf32, #tpu.memory_space<vmem>>, vector<1x64xf32>
    %242 = vector.shape_cast %241 : vector<1x64xf32> to vector<64xf32>
    %cst_174 = arith.constant dense<0.000000e+00> : vector<16xf32>
    %243 = vector.multi_reduction <add>, %238, %cst_174 [1] : vector<16x64xf32> to vector<16xf32>
    %244 = vector.shape_cast %243 : vector<16xf32> to vector<16x1xf32>
    %cst_175 = arith.constant 6.400000e+01 : f32
    %245 = vector.broadcast %cst_175 : f32 to vector<16x1xf32>
    %246 = arith.divf %244, %245 : vector<16x1xf32>
    %247 = vector.broadcast %246 : vector<16x1xf32> to vector<16x64xf32>
    %248 = arith.subf %238, %247 : vector<16x64xf32>
    %249 = arith.mulf %248, %248 : vector<16x64xf32>
    %cst_176 = arith.constant dense<0.000000e+00> : vector<16xf32>
    %250 = vector.multi_reduction <add>, %249, %cst_176 [1] : vector<16x64xf32> to vector<16xf32>
    %251 = vector.shape_cast %250 : vector<16xf32> to vector<16x1xf32>
    %cst_177 = arith.constant 6.400000e+01 : f32
    %252 = vector.broadcast %cst_177 : f32 to vector<16x1xf32>
    %253 = arith.divf %251, %252 : vector<16x1xf32>
    %254 = vector.broadcast %246 : vector<16x1xf32> to vector<16x64xf32>
    %255 = arith.subf %238, %254 : vector<16x64xf32>
    %cst_178 = arith.constant 9.99999974E-6 : f32
    %256 = vector.broadcast %cst_178 : f32 to vector<16x1xf32>
    %257 = arith.addf %253, %256 : vector<16x1xf32>
    %258 = math.rsqrt %257 : vector<16x1xf32>
    %259 = vector.broadcast %258 : vector<16x1xf32> to vector<16x64xf32>
    %260 = arith.mulf %255, %259 : vector<16x64xf32>
    %261 = vector.shape_cast %240 : vector<64xf32> to vector<1x64xf32>
    %262 = vector.broadcast %261 : vector<1x64xf32> to vector<16x64xf32>
    %263 = arith.mulf %260, %262 : vector<16x64xf32>
    %264 = vector.shape_cast %242 : vector<64xf32> to vector<1x64xf32>
    %265 = vector.broadcast %264 : vector<1x64xf32> to vector<16x64xf32>
    %266 = arith.addf %263, %265 : vector<16x64xf32>
    %c1_179 = arith.constant 1 : index
    %c0_180 = arith.constant 0 : index
    %c0_181 = arith.constant 0 : index
    %c0_182 = arith.constant 0 : index
    %c0_183 = arith.constant 0 : index
    %267 = vector.load %arg9[%c1_179, %c0_180, %c0_181, %c0_182, %c0_183] : memref<2x3x4x64x16xbf16, #tpu.memory_space<vmem>>, vector<1x1x1x64x16xbf16>
    %268 = vector.shape_cast %267 : vector<1x1x1x64x16xbf16> to vector<64x16xbf16>
    %269 = arith.truncf %266 : vector<16x64xf32> to vector<16x64xbf16>
    %cst_184 = arith.constant dense<0.000000e+00> : vector<16x16xf32>
    %270 = tpu.matmul %269, %268, %cst_184 {dimension_numbers = #tpu.dot_dimension_numbers<[1], [0], [0], [1], [0, 0, 1, 1], [], []>} : vector<16x64xbf16>, vector<64x16xbf16>, vector<16x16xf32> -> vector<16x16xf32>
    %c1_185 = arith.constant 1 : index
    %c0_186 = arith.constant 0 : index
    %c1_187 = arith.constant 1 : index
    %c0_188 = arith.constant 0 : index
    %c0_189 = arith.constant 0 : index
    %271 = vector.load %arg9[%c1_185, %c0_186, %c1_187, %c0_188, %c0_189] : memref<2x3x4x64x16xbf16, #tpu.memory_space<vmem>>, vector<1x1x1x64x16xbf16>
    %272 = vector.shape_cast %271 : vector<1x1x1x64x16xbf16> to vector<64x16xbf16>
    %273 = arith.truncf %266 : vector<16x64xf32> to vector<16x64xbf16>
    %cst_190 = arith.constant dense<0.000000e+00> : vector<16x16xf32>
    %274 = tpu.matmul %273, %272, %cst_190 {dimension_numbers = #tpu.dot_dimension_numbers<[1], [0], [0], [1], [0, 0, 1, 1], [], []>} : vector<16x64xbf16>, vector<64x16xbf16>, vector<16x16xf32> -> vector<16x16xf32>
    %c1_191 = arith.constant 1 : index
    %c0_192 = arith.constant 0 : index
    %c2_193 = arith.constant 2 : index
    %c0_194 = arith.constant 0 : index
    %c0_195 = arith.constant 0 : index
    %275 = vector.load %arg9[%c1_191, %c0_192, %c2_193, %c0_194, %c0_195] : memref<2x3x4x64x16xbf16, #tpu.memory_space<vmem>>, vector<1x1x1x64x16xbf16>
    %276 = vector.shape_cast %275 : vector<1x1x1x64x16xbf16> to vector<64x16xbf16>
    %277 = arith.truncf %266 : vector<16x64xf32> to vector<16x64xbf16>
    %cst_196 = arith.constant dense<0.000000e+00> : vector<16x16xf32>
    %278 = tpu.matmul %277, %276, %cst_196 {dimension_numbers = #tpu.dot_dimension_numbers<[1], [0], [0], [1], [0, 0, 1, 1], [], []>} : vector<16x64xbf16>, vector<64x16xbf16>, vector<16x16xf32> -> vector<16x16xf32>
    %c1_197 = arith.constant 1 : index
    %c0_198 = arith.constant 0 : index
    %c3_199 = arith.constant 3 : index
    %c0_200 = arith.constant 0 : index
    %c0_201 = arith.constant 0 : index
    %279 = vector.load %arg9[%c1_197, %c0_198, %c3_199, %c0_200, %c0_201] : memref<2x3x4x64x16xbf16, #tpu.memory_space<vmem>>, vector<1x1x1x64x16xbf16>
    %280 = vector.shape_cast %279 : vector<1x1x1x64x16xbf16> to vector<64x16xbf16>
    %281 = arith.truncf %266 : vector<16x64xf32> to vector<16x64xbf16>
    %cst_202 = arith.constant dense<0.000000e+00> : vector<16x16xf32>
    %282 = tpu.matmul %281, %280, %cst_202 {dimension_numbers = #tpu.dot_dimension_numbers<[1], [0], [0], [1], [0, 0, 1, 1], [], []>} : vector<16x64xbf16>, vector<64x16xbf16>, vector<16x16xf32> -> vector<16x16xf32>
    %283 = tpu.concatenate %270, %274, %278, %282 in 0 : vector<16x16xf32>, vector<16x16xf32>, vector<16x16xf32>, vector<16x16xf32> -> vector<64x16xf32>
    %c1_203 = arith.constant 1 : index
    %c0_204 = arith.constant 0 : index
    %c0_205 = arith.constant 0 : index
    %c0_206 = arith.constant 0 : index
    %284 = vector.load %arg6[%c1_203, %c0_204, %c0_205, %c0_206] : memref<2x3x64x16xf32, #tpu.memory_space<vmem>>, vector<1x1x64x16xf32>
    %285 = vector.shape_cast %284 : vector<1x1x64x16xf32> to vector<64x16xf32>
    %286 = arith.addf %283, %285 : vector<64x16xf32>
    %c1_207 = arith.constant 1 : index
    %c1_208 = arith.constant 1 : index
    %c0_209 = arith.constant 0 : index
    %c0_210 = arith.constant 0 : index
    %c0_211 = arith.constant 0 : index
    %287 = vector.load %arg9[%c1_207, %c1_208, %c0_209, %c0_210, %c0_211] : memref<2x3x4x64x16xbf16, #tpu.memory_space<vmem>>, vector<1x1x1x64x16xbf16>
    %288 = vector.shape_cast %287 : vector<1x1x1x64x16xbf16> to vector<64x16xbf16>
    %289 = arith.truncf %266 : vector<16x64xf32> to vector<16x64xbf16>
    %cst_212 = arith.constant dense<0.000000e+00> : vector<16x16xf32>
    %290 = tpu.matmul %289, %288, %cst_212 {dimension_numbers = #tpu.dot_dimension_numbers<[1], [0], [0], [1], [0, 0, 1, 1], [], []>} : vector<16x64xbf16>, vector<64x16xbf16>, vector<16x16xf32> -> vector<16x16xf32>
    %c1_213 = arith.constant 1 : index
    %c1_214 = arith.constant 1 : index
    %c1_215 = arith.constant 1 : index
    %c0_216 = arith.constant 0 : index
    %c0_217 = arith.constant 0 : index
    %291 = vector.load %arg9[%c1_213, %c1_214, %c1_215, %c0_216, %c0_217] : memref<2x3x4x64x16xbf16, #tpu.memory_space<vmem>>, vector<1x1x1x64x16xbf16>
    %292 = vector.shape_cast %291 : vector<1x1x1x64x16xbf16> to vector<64x16xbf16>
    %293 = arith.truncf %266 : vector<16x64xf32> to vector<16x64xbf16>
    %cst_218 = arith.constant dense<0.000000e+00> : vector<16x16xf32>
    %294 = tpu.matmul %293, %292, %cst_218 {dimension_numbers = #tpu.dot_dimension_numbers<[1], [0], [0], [1], [0, 0, 1, 1], [], []>} : vector<16x64xbf16>, vector<64x16xbf16>, vector<16x16xf32> -> vector<16x16xf32>
    %c1_219 = arith.constant 1 : index
    %c1_220 = arith.constant 1 : index
    %c2_221 = arith.constant 2 : index
    %c0_222 = arith.constant 0 : index
    %c0_223 = arith.constant 0 : index
    %295 = vector.load %arg9[%c1_219, %c1_220, %c2_221, %c0_222, %c0_223] : memref<2x3x4x64x16xbf16, #tpu.memory_space<vmem>>, vector<1x1x1x64x16xbf16>
    %296 = vector.shape_cast %295 : vector<1x1x1x64x16xbf16> to vector<64x16xbf16>
    %297 = arith.truncf %266 : vector<16x64xf32> to vector<16x64xbf16>
    %cst_224 = arith.constant dense<0.000000e+00> : vector<16x16xf32>
    %298 = tpu.matmul %297, %296, %cst_224 {dimension_numbers = #tpu.dot_dimension_numbers<[1], [0], [0], [1], [0, 0, 1, 1], [], []>} : vector<16x64xbf16>, vector<64x16xbf16>, vector<16x16xf32> -> vector<16x16xf32>
    %c1_225 = arith.constant 1 : index
    %c1_226 = arith.constant 1 : index
    %c3_227 = arith.constant 3 : index
    %c0_228 = arith.constant 0 : index
    %c0_229 = arith.constant 0 : index
    %299 = vector.load %arg9[%c1_225, %c1_226, %c3_227, %c0_228, %c0_229] : memref<2x3x4x64x16xbf16, #tpu.memory_space<vmem>>, vector<1x1x1x64x16xbf16>
    %300 = vector.shape_cast %299 : vector<1x1x1x64x16xbf16> to vector<64x16xbf16>
    %301 = arith.truncf %266 : vector<16x64xf32> to vector<16x64xbf16>
    %cst_230 = arith.constant dense<0.000000e+00> : vector<16x16xf32>
    %302 = tpu.matmul %301, %300, %cst_230 {dimension_numbers = #tpu.dot_dimension_numbers<[1], [0], [0], [1], [0, 0, 1, 1], [], []>} : vector<16x64xbf16>, vector<64x16xbf16>, vector<16x16xf32> -> vector<16x16xf32>
    %303 = tpu.concatenate %290, %294, %298, %302 in 0 : vector<16x16xf32>, vector<16x16xf32>, vector<16x16xf32>, vector<16x16xf32> -> vector<64x16xf32>
    %c1_231 = arith.constant 1 : index
    %c1_232 = arith.constant 1 : index
    %c0_233 = arith.constant 0 : index
    %c0_234 = arith.constant 0 : index
    %304 = vector.load %arg6[%c1_231, %c1_232, %c0_233, %c0_234] : memref<2x3x64x16xf32, #tpu.memory_space<vmem>>, vector<1x1x64x16xf32>
    %305 = vector.shape_cast %304 : vector<1x1x64x16xf32> to vector<64x16xf32>
    %306 = arith.addf %303, %305 : vector<64x16xf32>
    %c1_235 = arith.constant 1 : index
    %c2_236 = arith.constant 2 : index
    %c0_237 = arith.constant 0 : index
    %c0_238 = arith.constant 0 : index
    %c0_239 = arith.constant 0 : index
    %307 = vector.load %arg9[%c1_235, %c2_236, %c0_237, %c0_238, %c0_239] : memref<2x3x4x64x16xbf16, #tpu.memory_space<vmem>>, vector<1x1x1x64x16xbf16>
    %308 = vector.shape_cast %307 : vector<1x1x1x64x16xbf16> to vector<64x16xbf16>
    %309 = arith.truncf %266 : vector<16x64xf32> to vector<16x64xbf16>
    %cst_240 = arith.constant dense<0.000000e+00> : vector<16x16xf32>
    %310 = tpu.matmul %309, %308, %cst_240 {dimension_numbers = #tpu.dot_dimension_numbers<[1], [0], [0], [1], [0, 0, 1, 1], [], []>} : vector<16x64xbf16>, vector<64x16xbf16>, vector<16x16xf32> -> vector<16x16xf32>
    %c1_241 = arith.constant 1 : index
    %c2_242 = arith.constant 2 : index
    %c1_243 = arith.constant 1 : index
    %c0_244 = arith.constant 0 : index
    %c0_245 = arith.constant 0 : index
    %311 = vector.load %arg9[%c1_241, %c2_242, %c1_243, %c0_244, %c0_245] : memref<2x3x4x64x16xbf16, #tpu.memory_space<vmem>>, vector<1x1x1x64x16xbf16>
    %312 = vector.shape_cast %311 : vector<1x1x1x64x16xbf16> to vector<64x16xbf16>
    %313 = arith.truncf %266 : vector<16x64xf32> to vector<16x64xbf16>
    %cst_246 = arith.constant dense<0.000000e+00> : vector<16x16xf32>
    %314 = tpu.matmul %313, %312, %cst_246 {dimension_numbers = #tpu.dot_dimension_numbers<[1], [0], [0], [1], [0, 0, 1, 1], [], []>} : vector<16x64xbf16>, vector<64x16xbf16>, vector<16x16xf32> -> vector<16x16xf32>
    %c1_247 = arith.constant 1 : index
    %c2_248 = arith.constant 2 : index
    %c2_249 = arith.constant 2 : index
    %c0_250 = arith.constant 0 : index
    %c0_251 = arith.constant 0 : index
    %315 = vector.load %arg9[%c1_247, %c2_248, %c2_249, %c0_250, %c0_251] : memref<2x3x4x64x16xbf16, #tpu.memory_space<vmem>>, vector<1x1x1x64x16xbf16>
    %316 = vector.shape_cast %315 : vector<1x1x1x64x16xbf16> to vector<64x16xbf16>
    %317 = arith.truncf %266 : vector<16x64xf32> to vector<16x64xbf16>
    %cst_252 = arith.constant dense<0.000000e+00> : vector<16x16xf32>
    %318 = tpu.matmul %317, %316, %cst_252 {dimension_numbers = #tpu.dot_dimension_numbers<[1], [0], [0], [1], [0, 0, 1, 1], [], []>} : vector<16x64xbf16>, vector<64x16xbf16>, vector<16x16xf32> -> vector<16x16xf32>
    %c1_253 = arith.constant 1 : index
    %c2_254 = arith.constant 2 : index
    %c3_255 = arith.constant 3 : index
    %c0_256 = arith.constant 0 : index
    %c0_257 = arith.constant 0 : index
    %319 = vector.load %arg9[%c1_253, %c2_254, %c3_255, %c0_256, %c0_257] : memref<2x3x4x64x16xbf16, #tpu.memory_space<vmem>>, vector<1x1x1x64x16xbf16>
    %320 = vector.shape_cast %319 : vector<1x1x1x64x16xbf16> to vector<64x16xbf16>
    %321 = arith.truncf %266 : vector<16x64xf32> to vector<16x64xbf16>
    %cst_258 = arith.constant dense<0.000000e+00> : vector<16x16xf32>
    %322 = tpu.matmul %321, %320, %cst_258 {dimension_numbers = #tpu.dot_dimension_numbers<[1], [0], [0], [1], [0, 0, 1, 1], [], []>} : vector<16x64xbf16>, vector<64x16xbf16>, vector<16x16xf32> -> vector<16x16xf32>
    %323 = tpu.concatenate %310, %314, %318, %322 in 0 : vector<16x16xf32>, vector<16x16xf32>, vector<16x16xf32>, vector<16x16xf32> -> vector<64x16xf32>
    %c1_259 = arith.constant 1 : index
    %c2_260 = arith.constant 2 : index
    %c0_261 = arith.constant 0 : index
    %c0_262 = arith.constant 0 : index
    %324 = vector.load %arg6[%c1_259, %c2_260, %c0_261, %c0_262] : memref<2x3x64x16xf32, #tpu.memory_space<vmem>>, vector<1x1x64x16xf32>
    %325 = vector.shape_cast %324 : vector<1x1x64x16xf32> to vector<64x16xf32>
    %326 = arith.addf %323, %325 : vector<64x16xf32>
    %327 = arith.truncf %286 : vector<64x16xf32> to vector<64x16xbf16>
    %328 = arith.truncf %306 : vector<64x16xf32> to vector<64x16xbf16>
    %cst_263 = arith.constant dense<0.000000e+00> : vector<64x64xf32>
    %329 = tpu.matmul %327, %328, %cst_263 {dimension_numbers = #tpu.dot_dimension_numbers<[1], [1], [0], [0], [0, 0, 1, 0], [], []>} : vector<64x16xbf16>, vector<64x16xbf16>, vector<64x64xf32> -> vector<64x64xf32>
    %cst_264 = arith.constant 2.500000e-01 : f32
    %330 = vector.broadcast %cst_264 : f32 to vector<64x64xf32>
    %331 = arith.mulf %329, %330 : vector<64x64xf32>
    %332 = arith.addf %331, %81 : vector<64x64xf32>
    %cst_265 = arith.constant dense<0xFF800000> : vector<64xf32>
    %333 = vector.multi_reduction <maximumf>, %332, %cst_265 [1] : vector<64x64xf32> to vector<64xf32>
    %334 = vector.shape_cast %333 : vector<64xf32> to vector<64x1xf32>
    %335 = vector.broadcast %334 : vector<64x1xf32> to vector<64x64xf32>
    %336 = arith.subf %332, %335 : vector<64x64xf32>
    %337 = math.exp %336 : vector<64x64xf32>
    %cst_266 = arith.constant dense<0.000000e+00> : vector<64xf32>
    %338 = vector.multi_reduction <add>, %337, %cst_266 [1] : vector<64x64xf32> to vector<64xf32>
    %339 = vector.shape_cast %338 : vector<64xf32> to vector<64x1xf32>
    %340 = tpu.reciprocal %339 {approx = true} : vector<64x1xf32> -> vector<64x1xf32>
    %341 = vector.broadcast %340 : vector<64x1xf32> to vector<64x64xf32>
    %342 = arith.mulf %337, %341 : vector<64x64xf32>
    %343 = arith.truncf %342 : vector<64x64xf32> to vector<64x64xbf16>
    %344 = arith.truncf %326 : vector<64x16xf32> to vector<64x16xbf16>
    %cst_267 = arith.constant dense<0.000000e+00> : vector<64x16xf32>
    %345 = tpu.matmul %343, %344, %cst_267 {dimension_numbers = #tpu.dot_dimension_numbers<[1], [0], [0], [1], [0, 0, 1, 1], [], []>} : vector<64x64xbf16>, vector<64x16xbf16>, vector<64x16xf32> -> vector<64x16xf32>
    %346 = vector.extract_strided_slice %345 {offsets = [0, 0], sizes = [16, 16], strides = [1, 1]} : vector<64x16xf32> to vector<16x16xf32>
    %c1_268 = arith.constant 1 : index
    %c0_269 = arith.constant 0 : index
    %c0_270 = arith.constant 0 : index
    %c0_271 = arith.constant 0 : index
    %347 = vector.load %arg10[%c1_268, %c0_269, %c0_270, %c0_271] : memref<2x4x16x64xbf16, #tpu.memory_space<vmem>>, vector<1x1x16x64xbf16>
    %348 = vector.shape_cast %347 : vector<1x1x16x64xbf16> to vector<16x64xbf16>
    %349 = arith.truncf %346 : vector<16x16xf32> to vector<16x16xbf16>
    %cst_272 = arith.constant dense<0.000000e+00> : vector<16x64xf32>
    %350 = tpu.matmul %349, %348, %cst_272 {dimension_numbers = #tpu.dot_dimension_numbers<[1], [0], [0], [1], [0, 0, 1, 1], [], []>} : vector<16x16xbf16>, vector<16x64xbf16>, vector<16x64xf32> -> vector<16x64xf32>
    %351 = vector.extract_strided_slice %345 {offsets = [16, 0], sizes = [16, 16], strides = [1, 1]} : vector<64x16xf32> to vector<16x16xf32>
    %c1_273 = arith.constant 1 : index
    %c1_274 = arith.constant 1 : index
    %c0_275 = arith.constant 0 : index
    %c0_276 = arith.constant 0 : index
    %352 = vector.load %arg10[%c1_273, %c1_274, %c0_275, %c0_276] : memref<2x4x16x64xbf16, #tpu.memory_space<vmem>>, vector<1x1x16x64xbf16>
    %353 = vector.shape_cast %352 : vector<1x1x16x64xbf16> to vector<16x64xbf16>
    %354 = arith.truncf %351 : vector<16x16xf32> to vector<16x16xbf16>
    %cst_277 = arith.constant dense<0.000000e+00> : vector<16x64xf32>
    %355 = tpu.matmul %354, %353, %cst_277 {dimension_numbers = #tpu.dot_dimension_numbers<[1], [0], [0], [1], [0, 0, 1, 1], [], []>} : vector<16x16xbf16>, vector<16x64xbf16>, vector<16x64xf32> -> vector<16x64xf32>
    %356 = arith.addf %350, %355 : vector<16x64xf32>
    %357 = vector.extract_strided_slice %345 {offsets = [32, 0], sizes = [16, 16], strides = [1, 1]} : vector<64x16xf32> to vector<16x16xf32>
    %c1_278 = arith.constant 1 : index
    %c2_279 = arith.constant 2 : index
    %c0_280 = arith.constant 0 : index
    %c0_281 = arith.constant 0 : index
    %358 = vector.load %arg10[%c1_278, %c2_279, %c0_280, %c0_281] : memref<2x4x16x64xbf16, #tpu.memory_space<vmem>>, vector<1x1x16x64xbf16>
    %359 = vector.shape_cast %358 : vector<1x1x16x64xbf16> to vector<16x64xbf16>
    %360 = arith.truncf %357 : vector<16x16xf32> to vector<16x16xbf16>
    %cst_282 = arith.constant dense<0.000000e+00> : vector<16x64xf32>
    %361 = tpu.matmul %360, %359, %cst_282 {dimension_numbers = #tpu.dot_dimension_numbers<[1], [0], [0], [1], [0, 0, 1, 1], [], []>} : vector<16x16xbf16>, vector<16x64xbf16>, vector<16x64xf32> -> vector<16x64xf32>
    %362 = arith.addf %356, %361 : vector<16x64xf32>
    %363 = vector.extract_strided_slice %345 {offsets = [48, 0], sizes = [16, 16], strides = [1, 1]} : vector<64x16xf32> to vector<16x16xf32>
    %c1_283 = arith.constant 1 : index
    %c3_284 = arith.constant 3 : index
    %c0_285 = arith.constant 0 : index
    %c0_286 = arith.constant 0 : index
    %364 = vector.load %arg10[%c1_283, %c3_284, %c0_285, %c0_286] : memref<2x4x16x64xbf16, #tpu.memory_space<vmem>>, vector<1x1x16x64xbf16>
    %365 = vector.shape_cast %364 : vector<1x1x16x64xbf16> to vector<16x64xbf16>
    %366 = arith.truncf %363 : vector<16x16xf32> to vector<16x16xbf16>
    %cst_287 = arith.constant dense<0.000000e+00> : vector<16x64xf32>
    %367 = tpu.matmul %366, %365, %cst_287 {dimension_numbers = #tpu.dot_dimension_numbers<[1], [0], [0], [1], [0, 0, 1, 1], [], []>} : vector<16x16xbf16>, vector<16x64xbf16>, vector<16x64xf32> -> vector<16x64xf32>
    %368 = arith.addf %362, %367 : vector<16x64xf32>
    %c7 = arith.constant 7 : index
    %c0_288 = arith.constant 0 : index
    %369 = vector.load %arg5[%c7, %c0_288] : memref<18x256xf32, #tpu.memory_space<vmem>>, vector<1x64xf32>
    %370 = vector.shape_cast %369 : vector<1x64xf32> to vector<64xf32>
    %371 = vector.shape_cast %370 : vector<64xf32> to vector<1x64xf32>
    %372 = vector.broadcast %371 : vector<1x64xf32> to vector<16x64xf32>
    %373 = arith.addf %368, %372 : vector<16x64xf32>
    %374 = arith.addf %266, %373 : vector<16x64xf32>
    %c8 = arith.constant 8 : index
    %c0_289 = arith.constant 0 : index
    %375 = vector.load %arg5[%c8, %c0_289] : memref<18x256xf32, #tpu.memory_space<vmem>>, vector<1x64xf32>
    %376 = vector.shape_cast %375 : vector<1x64xf32> to vector<64xf32>
    %c9 = arith.constant 9 : index
    %c0_290 = arith.constant 0 : index
    %377 = vector.load %arg5[%c9, %c0_290] : memref<18x256xf32, #tpu.memory_space<vmem>>, vector<1x64xf32>
    %378 = vector.shape_cast %377 : vector<1x64xf32> to vector<64xf32>
    %cst_291 = arith.constant dense<0.000000e+00> : vector<16xf32>
    %379 = vector.multi_reduction <add>, %374, %cst_291 [1] : vector<16x64xf32> to vector<16xf32>
    %380 = vector.shape_cast %379 : vector<16xf32> to vector<16x1xf32>
    %cst_292 = arith.constant 6.400000e+01 : f32
    %381 = vector.broadcast %cst_292 : f32 to vector<16x1xf32>
    %382 = arith.divf %380, %381 : vector<16x1xf32>
    %383 = vector.broadcast %382 : vector<16x1xf32> to vector<16x64xf32>
    %384 = arith.subf %374, %383 : vector<16x64xf32>
    %385 = arith.mulf %384, %384 : vector<16x64xf32>
    %cst_293 = arith.constant dense<0.000000e+00> : vector<16xf32>
    %386 = vector.multi_reduction <add>, %385, %cst_293 [1] : vector<16x64xf32> to vector<16xf32>
    %387 = vector.shape_cast %386 : vector<16xf32> to vector<16x1xf32>
    %cst_294 = arith.constant 6.400000e+01 : f32
    %388 = vector.broadcast %cst_294 : f32 to vector<16x1xf32>
    %389 = arith.divf %387, %388 : vector<16x1xf32>
    %390 = vector.broadcast %382 : vector<16x1xf32> to vector<16x64xf32>
    %391 = arith.subf %374, %390 : vector<16x64xf32>
    %cst_295 = arith.constant 9.99999974E-6 : f32
    %392 = vector.broadcast %cst_295 : f32 to vector<16x1xf32>
    %393 = arith.addf %389, %392 : vector<16x1xf32>
    %394 = math.rsqrt %393 : vector<16x1xf32>
    %395 = vector.broadcast %394 : vector<16x1xf32> to vector<16x64xf32>
    %396 = arith.mulf %391, %395 : vector<16x64xf32>
    %397 = vector.shape_cast %376 : vector<64xf32> to vector<1x64xf32>
    %398 = vector.broadcast %397 : vector<1x64xf32> to vector<16x64xf32>
    %399 = arith.mulf %396, %398 : vector<16x64xf32>
    %400 = vector.shape_cast %378 : vector<64xf32> to vector<1x64xf32>
    %401 = vector.broadcast %400 : vector<1x64xf32> to vector<16x64xf32>
    %402 = arith.addf %399, %401 : vector<16x64xf32>
    %c1_296 = arith.constant 1 : index
    %c0_297 = arith.constant 0 : index
    %c0_298 = arith.constant 0 : index
    %403 = vector.load %arg11[%c1_296, %c0_297, %c0_298] : memref<2x64x256xbf16, #tpu.memory_space<vmem>>, vector<1x64x256xbf16>
    %404 = vector.shape_cast %403 : vector<1x64x256xbf16> to vector<64x256xbf16>
    %405 = arith.truncf %402 : vector<16x64xf32> to vector<16x64xbf16>
    %cst_299 = arith.constant dense<0.000000e+00> : vector<16x256xf32>
    %406 = tpu.matmul %405, %404, %cst_299 {dimension_numbers = #tpu.dot_dimension_numbers<[1], [0], [0], [1], [0, 0, 1, 1], [], []>} : vector<16x64xbf16>, vector<64x256xbf16>, vector<16x256xf32> -> vector<16x256xf32>
    %c10 = arith.constant 10 : index
    %c0_300 = arith.constant 0 : index
    %407 = vector.load %arg5[%c10, %c0_300] : memref<18x256xf32, #tpu.memory_space<vmem>>, vector<1x256xf32>
    %408 = vector.shape_cast %407 : vector<1x256xf32> to vector<256xf32>
    %409 = vector.shape_cast %408 : vector<256xf32> to vector<1x256xf32>
    %410 = vector.broadcast %409 : vector<1x256xf32> to vector<16x256xf32>
    %411 = arith.addf %406, %410 : vector<16x256xf32>
    %cst_301 = arith.constant 0.000000e+00 : f32
    %412 = vector.broadcast %cst_301 : f32 to vector<16x256xf32>
    %413 = arith.maximumf %411, %412 : vector<16x256xf32>
    %c1_302 = arith.constant 1 : index
    %c0_303 = arith.constant 0 : index
    %c0_304 = arith.constant 0 : index
    %414 = vector.load %arg12[%c1_302, %c0_303, %c0_304] : memref<2x256x64xbf16, #tpu.memory_space<vmem>>, vector<1x256x64xbf16>
    %415 = vector.shape_cast %414 : vector<1x256x64xbf16> to vector<256x64xbf16>
    %416 = arith.truncf %413 : vector<16x256xf32> to vector<16x256xbf16>
    %cst_305 = arith.constant dense<0.000000e+00> : vector<16x64xf32>
    %417 = tpu.matmul %416, %415, %cst_305 {dimension_numbers = #tpu.dot_dimension_numbers<[1], [0], [0], [1], [0, 0, 1, 1], [], []>} : vector<16x256xbf16>, vector<256x64xbf16>, vector<16x64xf32> -> vector<16x64xf32>
    %c11 = arith.constant 11 : index
    %c0_306 = arith.constant 0 : index
    %418 = vector.load %arg5[%c11, %c0_306] : memref<18x256xf32, #tpu.memory_space<vmem>>, vector<1x64xf32>
    %419 = vector.shape_cast %418 : vector<1x64xf32> to vector<64xf32>
    %420 = vector.shape_cast %419 : vector<64xf32> to vector<1x64xf32>
    %421 = vector.broadcast %420 : vector<1x64xf32> to vector<16x64xf32>
    %422 = arith.addf %417, %421 : vector<16x64xf32>
    %423 = arith.addf %402, %422 : vector<16x64xf32>
    %c12 = arith.constant 12 : index
    %c0_307 = arith.constant 0 : index
    %424 = vector.load %arg5[%c12, %c0_307] : memref<18x256xf32, #tpu.memory_space<vmem>>, vector<1x64xf32>
    %425 = vector.shape_cast %424 : vector<1x64xf32> to vector<64xf32>
    %c13 = arith.constant 13 : index
    %c0_308 = arith.constant 0 : index
    %426 = vector.load %arg5[%c13, %c0_308] : memref<18x256xf32, #tpu.memory_space<vmem>>, vector<1x64xf32>
    %427 = vector.shape_cast %426 : vector<1x64xf32> to vector<64xf32>
    %cst_309 = arith.constant dense<0.000000e+00> : vector<16xf32>
    %428 = vector.multi_reduction <add>, %423, %cst_309 [1] : vector<16x64xf32> to vector<16xf32>
    %429 = vector.shape_cast %428 : vector<16xf32> to vector<16x1xf32>
    %cst_310 = arith.constant 6.400000e+01 : f32
    %430 = vector.broadcast %cst_310 : f32 to vector<16x1xf32>
    %431 = arith.divf %429, %430 : vector<16x1xf32>
    %432 = vector.broadcast %431 : vector<16x1xf32> to vector<16x64xf32>
    %433 = arith.subf %423, %432 : vector<16x64xf32>
    %434 = arith.mulf %433, %433 : vector<16x64xf32>
    %cst_311 = arith.constant dense<0.000000e+00> : vector<16xf32>
    %435 = vector.multi_reduction <add>, %434, %cst_311 [1] : vector<16x64xf32> to vector<16xf32>
    %436 = vector.shape_cast %435 : vector<16xf32> to vector<16x1xf32>
    %cst_312 = arith.constant 6.400000e+01 : f32
    %437 = vector.broadcast %cst_312 : f32 to vector<16x1xf32>
    %438 = arith.divf %436, %437 : vector<16x1xf32>
    %439 = vector.broadcast %431 : vector<16x1xf32> to vector<16x64xf32>
    %440 = arith.subf %423, %439 : vector<16x64xf32>
    %cst_313 = arith.constant 9.99999974E-6 : f32
    %441 = vector.broadcast %cst_313 : f32 to vector<16x1xf32>
    %442 = arith.addf %438, %441 : vector<16x1xf32>
    %443 = math.rsqrt %442 : vector<16x1xf32>
    %444 = vector.broadcast %443 : vector<16x1xf32> to vector<16x64xf32>
    %445 = arith.mulf %440, %444 : vector<16x64xf32>
    %446 = vector.shape_cast %425 : vector<64xf32> to vector<1x64xf32>
    %447 = vector.broadcast %446 : vector<1x64xf32> to vector<16x64xf32>
    %448 = arith.mulf %445, %447 : vector<16x64xf32>
    %449 = vector.shape_cast %427 : vector<64xf32> to vector<1x64xf32>
    %450 = vector.broadcast %449 : vector<1x64xf32> to vector<16x64xf32>
    %451 = arith.addf %448, %450 : vector<16x64xf32>
    %c0_314 = arith.constant 0 : index
    %c0_315 = arith.constant 0 : index
    %452 = vector.load %arg4[%c0_314, %c0_315] : memref<2x16xf32, #tpu.memory_space<vmem>>, vector<2x16xf32>
    %cst_316 = arith.constant dense<0.000000e+00> : vector<2x64xf32>
    %453 = tpu.matmul %452, %451, %cst_316 {dimension_numbers = #tpu.dot_dimension_numbers<[1], [0], [0], [1], [0, 0, 1, 1], [], []>} : vector<2x16xf32>, vector<16x64xf32>, vector<2x64xf32> -> vector<2x64xf32>
    %c14 = arith.constant 14 : index
    %c0_317 = arith.constant 0 : index
    %454 = vector.load %arg5[%c14, %c0_317] : memref<18x256xf32, #tpu.memory_space<vmem>>, vector<1x64xf32>
    %455 = vector.shape_cast %454 : vector<1x64xf32> to vector<64xf32>
    %c15 = arith.constant 15 : index
    %c0_318 = arith.constant 0 : index
    %456 = vector.load %arg5[%c15, %c0_318] : memref<18x256xf32, #tpu.memory_space<vmem>>, vector<1x64xf32>
    %457 = vector.shape_cast %456 : vector<1x64xf32> to vector<64xf32>
    %cst_319 = arith.constant dense<0.000000e+00> : vector<2xf32>
    %458 = vector.multi_reduction <add>, %453, %cst_319 [1] : vector<2x64xf32> to vector<2xf32>
    %459 = vector.shape_cast %458 : vector<2xf32> to vector<2x1xf32>
    %cst_320 = arith.constant 6.400000e+01 : f32
    %460 = vector.broadcast %cst_320 : f32 to vector<2x1xf32>
    %461 = arith.divf %459, %460 : vector<2x1xf32>
    %462 = vector.broadcast %461 : vector<2x1xf32> to vector<2x64xf32>
    %463 = arith.subf %453, %462 : vector<2x64xf32>
    %464 = arith.mulf %463, %463 : vector<2x64xf32>
    %cst_321 = arith.constant dense<0.000000e+00> : vector<2xf32>
    %465 = vector.multi_reduction <add>, %464, %cst_321 [1] : vector<2x64xf32> to vector<2xf32>
    %466 = vector.shape_cast %465 : vector<2xf32> to vector<2x1xf32>
    %cst_322 = arith.constant 6.400000e+01 : f32
    %467 = vector.broadcast %cst_322 : f32 to vector<2x1xf32>
    %468 = arith.divf %466, %467 : vector<2x1xf32>
    %469 = vector.broadcast %461 : vector<2x1xf32> to vector<2x64xf32>
    %470 = arith.subf %453, %469 : vector<2x64xf32>
    %cst_323 = arith.constant 9.99999974E-6 : f32
    %471 = vector.broadcast %cst_323 : f32 to vector<2x1xf32>
    %472 = arith.addf %468, %471 : vector<2x1xf32>
    %473 = math.rsqrt %472 : vector<2x1xf32>
    %474 = vector.broadcast %473 : vector<2x1xf32> to vector<2x64xf32>
    %475 = arith.mulf %470, %474 : vector<2x64xf32>
    %476 = vector.shape_cast %455 : vector<64xf32> to vector<1x64xf32>
    %477 = vector.broadcast %476 : vector<1x64xf32> to vector<2x64xf32>
    %478 = arith.mulf %475, %477 : vector<2x64xf32>
    %479 = vector.shape_cast %457 : vector<64xf32> to vector<1x64xf32>
    %480 = vector.broadcast %479 : vector<1x64xf32> to vector<2x64xf32>
    %481 = arith.addf %478, %480 : vector<2x64xf32>
    %c0_324 = arith.constant 0 : index
    %c0_325 = arith.constant 0 : index
    %482 = vector.load %arg13[%c0_324, %c0_325] : memref<64x32xbf16, #tpu.memory_space<vmem>>, vector<64x32xbf16>
    %483 = arith.truncf %481 : vector<2x64xf32> to vector<2x64xbf16>
    %cst_326 = arith.constant dense<0.000000e+00> : vector<2x32xf32>
    %484 = tpu.matmul %483, %482, %cst_326 {dimension_numbers = #tpu.dot_dimension_numbers<[1], [0], [0], [1], [0, 0, 1, 1], [], []>} : vector<2x64xbf16>, vector<64x32xbf16>, vector<2x32xf32> -> vector<2x32xf32>
    %c16 = arith.constant 16 : index
    %c0_327 = arith.constant 0 : index
    %485 = vector.load %arg5[%c16, %c0_327] : memref<18x256xf32, #tpu.memory_space<vmem>>, vector<1x32xf32>
    %486 = vector.shape_cast %485 : vector<1x32xf32> to vector<32xf32>
    %487 = vector.shape_cast %486 : vector<32xf32> to vector<1x32xf32>
    %488 = vector.broadcast %487 : vector<1x32xf32> to vector<2x32xf32>
    %489 = arith.addf %484, %488 : vector<2x32xf32>
    %cst_328 = arith.constant 0.000000e+00 : f32
    %490 = vector.broadcast %cst_328 : f32 to vector<2x32xf32>
    %491 = arith.maximumf %489, %490 : vector<2x32xf32>
    %c0_329 = arith.constant 0 : index
    %c0_330 = arith.constant 0 : index
    %492 = vector.load %arg14[%c0_329, %c0_330] : memref<32x1xbf16, #tpu.memory_space<vmem>>, vector<32x1xbf16>
    %493 = arith.truncf %491 : vector<2x32xf32> to vector<2x32xbf16>
    %cst_331 = arith.constant dense<0.000000e+00> : vector<2x1xf32>
    %494 = tpu.matmul %493, %492, %cst_331 {dimension_numbers = #tpu.dot_dimension_numbers<[1], [0], [0], [1], [0, 0, 1, 1], [], []>} : vector<2x32xbf16>, vector<32x1xbf16>, vector<2x1xf32> -> vector<2x1xf32>
    %c17 = arith.constant 17 : index
    %c0_332 = arith.constant 0 : index
    %495 = vector.load %arg5[%c17, %c0_332] : memref<18x256xf32, #tpu.memory_space<vmem>>, vector<1x1xf32>
    %496 = vector.shape_cast %495 : vector<1x1xf32> to vector<1xf32>
    %497 = vector.shape_cast %496 : vector<1xf32> to vector<1x1xf32>
    %498 = vector.broadcast %497 : vector<1x1xf32> to vector<2x1xf32>
    %499 = arith.addf %494, %498 : vector<2x1xf32>
    %c0_333 = arith.constant 0 : index
    %c0_334 = arith.constant 0 : index
    %500 = vector.load %arg15[%c0_333, %c0_334] : memref<2x1xf32, #tpu.memory_space<vmem>>, vector<2x1xf32>
    tpu.vector_store %arg15[%c0_333, %c0_334], %499 {strides = array<i32>} : memref<2x1xf32, #tpu.memory_space<vmem>>, vector<2x1xf32>,
    return
  }
}

</mosaic_0001>

<bundles_post_ra>
// kernel: informer_forward.1
= control target key start
LH: loop header
LB: loop body
LE: loop exit
PB: predicated region body
PF: predicated region fallthrough
CT: control target
= control target key end

     0   :  { %vm53_vm0 = vcmask 130048   ;;  %v4335_v12 = vmov 16.0   ;;  %vm289_vm2 = vcmask 1041408   ;;  %vm285_vm3 = vcmask 31744   ;;  %s5544_s0 = inlined_call_operand.vmem [shape: f32[3,16,16], index: 0, kind: input, shape index: {}]   ;;  %s5545_s8 = inlined_call_operand.vmem [shape: bf16[4,64], index: 8, kind: input, shape index: {}]   ;;  %s5546_s7 = inlined_call_operand.vmem [shape: bf16[3,16,64], index: 7, kind: input, shape index: {}]   ;;  %s5547_s1 = inlined_call_operand.vmem [shape: f32[16,4], index: 1, kind: input, shape index: {}]   ;;  %s5548_s9 = inlined_call_operand.vmem [shape: bf16[2,3,4,64,16], index: 9, kind: input, shape index: {}]   ;;  %s5549_s2 = inlined_call_operand.vmem [shape: f32[16,64], index: 2, kind: input, shape index: {}]   ;;  %s5550_s6 = inlined_call_operand.vmem [shape: f32[2,3,64,16], index: 6, kind: input, shape index: {}]   ;;  %s5551_s3 = inlined_call_operand.vmem [shape: f32[64,64], index: 3, kind: input, shape index: {}]   ;;  %s5552_s10 = inlined_call_operand.vmem [shape: bf16[2,4,16,64], index: 10, kind: input, shape index: {}]   ;;  %s5553_s5 = inlined_call_operand.vmem [shape: f32[18,256], index: 5, kind: input, shape index: {}]   ;;  %s5554_s11 = inlined_call_operand.vmem [shape: bf16[2,64,256], index: 11, kind: input, shape index: {}]   ;;  %s5555_s12 = inlined_call_operand.vmem [shape: bf16[2,256,64], index: 12, kind: input, shape index: {}]   ;;  %s5556_s4 = inlined_call_operand.vmem [shape: f32[2,16], index: 4, kind: input, shape index: {}]   ;;  %s5557_s13 = inlined_call_operand.vmem [shape: bf16[64,32], index: 13, kind: input, shape index: {}]   ;;  %s5558_s14 = inlined_call_operand.vmem [shape: bf16[32,1], index: 14, kind: input, shape index: {}]   ;;  %s5559_s15 = inlined_call_operand.vmem [shape: f32[2,1], index: 15, kind: output, shape index: {}]  }
   0x1   :  { %v3089_v0 = vld [vmem:[%s5544_s0 + $0x20] sm:$0xff]  ;;  %v3075_v1 = vld [vmem:[%s5544_s0 + $0x10] sm:$0xff]  ;;  %v3090_v6 = vld [vmem:[%s5544_s0 + $0x28] sm:$0xff]  ;;  %4229 = vrcp.f32 %v4335_v12 }
   0x2   :  { %v51_v2 = vld [vmem:[%s5544_s0] sm:$0xff]  ;;  %v208_v3 = vsel %vm53_vm0, %v3089_v0, 0.0  ;;  %v111_v4 = vsel %vm53_vm0, %v3075_v1, 0.0  ;;  %v3076_v7 = vld [vmem:[%s5544_s0 + $0x18] sm:$0xff]  ;;  %v52_v8 = vld [vmem:[%s5544_s0 + $0x8] sm:$0xff]  ;;  %v211_v9 = vsel %vm53_vm0, %v3090_v6, 0.0 }
   0x3   :  { %v54_v5 = vsel %vm53_vm0, %v51_v2, 0.0  ;;  %209 = vadd.xlane.f32.xlu0 %v208_v3  ;;  %112 = vadd.xlane.f32.xlu2 %v111_v4  ;;  %v114_v10 = vsel %vm53_vm0, %v3076_v7, 0.0  ;;  %v57_v11 = vsel %vm53_vm0, %v52_v8, 0.0  ;;  %v283_v49 = vld [vmem:[%s5545_s8] sm:$0x3]  ;;  %v4068_v53 = vld [vmem:[%s5546_s7 + $0x10] sm:$0xff] }
   0x4   :  { %55 = vadd.xlane.f32.xlu1 %v54_v5  ;;  %v291_v50 = vsel %vm289_vm2, %v283_v49, 0  ;;  %v4066_v52 = vld [vmem:[%s5546_s7] sm:$0xff]  ;;  %v282_v57 = vld [vmem:[%s5547_s1 + $0x8] sm:$0xff]  ;;  %272 = vmatpush.bf16.msra.mxu2 %v4068_v53 }
   0x5   :  { %300 = vmatpush.bf16.msra.mxu3 %v291_v50  ;;  %v281_v54 = vld [vmem:[%s5547_s1] sm:$0xff]  ;;  %198 = vmatpush.bf16.msra.mxu1 %v4066_v52  ;;  %v4067_v62 = vld [vmem:[%s5546_s7 + $0x8] sm:$0xff] }
   0x6   :  { %v284_v59 = vpack.c.bf16 %v282_v57, %v281_v54  ;;  %175 = vmatpush.bf16.msra.mxu0 %v4067_v62 }
   0x7   :  { %v4230_v13 = vpop.eup %4229 }
   0x8   :  { %v61_v14 = vmul.f32 16.0, %v4230_v13  ;;  %vm65_vm1 = vweird.f32 %v4230_v13  ;;  %3098 = vmatmul.msk.bf16.vlgmr.msra.gmra.mxu3 %vm285_vm3, %v284_v59 }
   0xa   :  { %v62_v15 = vsub.f32 1.0, %v61_v14 }
   0xb   :  { %212 = vadd.xlane.f32.xlu0 %v211_v9  ;;  %115 = vadd.xlane.f32.xlu2 %v114_v10 }
   0xc   :  { %58 = vadd.xlane.f32.xlu1 %v57_v11  ;;  %v63_v16 = vmul.f32 %v4230_v13, %v62_v15 }
   0xe   :  { %v64_v17 = vadd.f32 %v4230_v13, %v63_v16 }
  0x10   :  { %v4441_v18 = vsel %vm65_vm1, %v4230_v13, %v64_v17 }
  0x76   :  { %v210_v19 = vpop.xlane.xlu0 %209  ;;  %v113_v20 = vpop.xlane.xlu2 %112 }
  0x77   :  { %v214_v21 = vmul.f32 %v210_v19, %v4441_v18  ;;  %v56_v22 = vpop.xlane.xlu1 %55  ;;  %v117_v36 = vmul.f32 %v113_v20, %v4441_v18 }
  0x78   :  { %v67_v23 = vmul.f32 %v4441_v18, %v56_v22 }
  0x79   :  { %v4445_v24 = vsub.f32 %v3089_v0, %v214_v21  ;;  %v4471_v43 = vsub.f32 %v3075_v1, %v117_v36 }
  0x7a   :  { %v4447_v25 = vsub.f32 %v51_v2, %v67_v23 }
  0x7b   :  { %v218_v26 = vmul.f32 %v4445_v24, %v4445_v24  ;;  %v121_v47 = vmul.f32 %v4471_v43, %v4471_v43 }
  0x7c   :  { %v71_v27 = vmul.f32 %v4447_v25, %v4447_v25 }
  0x7d   :  { %v220_v28 = vsel %vm53_vm0, %v218_v26, 0.0  ;;  %v123_v48 = vsel %vm53_vm0, %v121_v47, 0.0 }
  0x7e   :  { %221 = vadd.xlane.f32.xlu0 %v220_v28  ;;  %v213_v29 = vpop.xlane.xlu0 %212  ;;  %v116_v30 = vpop.xlane.xlu2 %115  ;;  %v73_v31 = vsel %vm53_vm0, %v71_v27, 0.0 }
  0x7f   :  { %v215_v32 = vmul.f32 %v213_v29, %v4441_v18  ;;  %v118_v33 = vmul.f32 %v116_v30, %v4441_v18  ;;  %74 = vadd.xlane.f32.xlu2 %v73_v31  ;;  %v59_v34 = vpop.xlane.xlu1 %58 }
  0x80   :  { %v68_v35 = vmul.f32 %v4441_v18, %v59_v34 }
  0x81   :  { %v4459_v37 = vsub.f32 %v3090_v6, %v215_v32  ;;  %v4461_v38 = vsub.f32 %v3076_v7, %v118_v33 }
  0x82   :  { %v4463_v39 = vsub.f32 %v52_v8, %v68_v35 }
  0x83   :  { %v219_v40 = vmul.f32 %v4459_v37, %v4459_v37  ;;  %v122_v41 = vmul.f32 %v4461_v38, %v4461_v38 }
  0x84   :  { %v72_v42 = vmul.f32 %v4463_v39, %v4463_v39 }
  0x85   :  { %v223_v44 = vsel %vm53_vm0, %v219_v40, 0.0  ;;  %v126_v45 = vsel %vm53_vm0, %v122_v41, 0.0 }
  0x86   :  { %224 = vadd.xlane.f32.xlu1 %v223_v44  ;;  %v76_v46 = vsel %vm53_vm0, %v72_v42, 0.0 }
  0x87   :  { %127 = vadd.xlane.f32.xlu2 %v126_v45  ;;  %77 = vadd.xlane.f32.xlu0 %v76_v46 }
  0x8e   :  { %124 = vadd.xlane.f32.xlu1 %v123_v48 }
  0xf1   :  { %v222_v51 = vpop.xlane.xlu0 %221 }
  0xf2   :  { %v226_v55 = vmul.f32 %v222_v51, %v4441_v18  ;;  %v75_v56 = vpop.xlane.xlu2 %74 }
  0xf3   :  { %v79_v58 = vmul.f32 %v75_v56, %v4441_v18 }
  0xf4   :  { %v228_v60 = vadd.f32 1e-05, %v226_v55 }
  0xf5   :  { %v81_v61 = vadd.f32 1e-05, %v79_v58 }
  0xf6   :  { %4231 = vrsqrt.f32 %v228_v60  ;;  %vm236_vm5 = vweird.f32 %v228_v60 }
  0xf7   :  { %4233 = vrsqrt.f32 %v81_v61  ;;  %vm89_vm6 = vweird.f32 %v81_v61 }
  0xf9   :  { %v225_v63 = vpop.xlane.xlu1 %224 }
  0xfa   :  { %v128_v0 = vpop.xlane.xlu2 %127  ;;  %v78_v1 = vpop.xlane.xlu0 %77  ;;  %v227_v2 = vmul.f32 %v225_v63, %v4441_v18 }
  0xfb   :  { %v130_v3 = vmul.f32 %v128_v0, %v4441_v18  ;;  %v80_v4 = vmul.f32 %v78_v1, %v4441_v18 }
  0xfc   :  { %v4232_v5 = vpop.eup %4231  ;;  %v229_v6 = vadd.f32 1e-05, %v227_v2 }
  0xfd   :  { %v4502_v7 = vpop.eup %4233  ;;  %v231_v8 = vmul.f32 %v4232_v5, %v228_v60  ;;  %v4504_v9 = vadd.f32 1e-05, %v130_v3  ;;  %v82_v10 = vadd.f32 1e-05, %v80_v4  ;;  %vm237_vm4 = vweird.f32 %v4232_v5  ;;  %v4076_v3 = vld [vmem:[%s5548_s9 + $0x38] sm:$0xff] }
  0xfe   :  { %v84_v11 = vmul.f32 %v4502_v7, %v81_v61  ;;  %4235 = vrsqrt.f32 %v229_v6  ;;  %vm90_vm7 = vweird.f32 %v4502_v7  ;;  %vm4512_vm8 = vmor %vm236_vm5, %vm237_vm4  ;;  %vm246_vm12 = vweird.f32 %v229_v6  ;;  %v4080_v4 = vld [vmem:[%s5548_s9 + $0x58] sm:$0xff]  ;;  %409 = vmatpush.bf16.msrb.mxu1 %v4076_v3  ;;  %v4109_v3 = vld [vmem:[%s5548_s9 + $0x140] sm:$0xff] }
  0xff   :  { %v232_v12 = vmul.f32 %v4232_v5, %v231_v8  ;;  %4237 = vrsqrt.f32 %v4504_v9  ;;  %vm99_vm10 = vweird.f32 %v82_v10  ;;  %vm4519_vm13 = vmor %vm89_vm6, %vm90_vm7  ;;  %vm149_vm15 = vweird.f32 %v4504_v9  ;;  %456 = vmatpush.bf16.msrb.mxu2 %v4080_v4  ;;  %v4070_v8 = vld [vmem:[%s5548_s9 + $0x8] sm:$0xff]  ;;  %v4113_v4 = vld [vmem:[%s5548_s9 + $0x160] sm:$0xff] }
 0x100   :  { %v85_v13 = vmul.f32 %v4502_v7, %v84_v11  ;;  %4239 = vrsqrt.f32 %v82_v10  ;;  %v4082_v11 = vld [vmem:[%s5548_s9 + $0x68] sm:$0xff]  ;;  %vm354_vm7 = vcmask 523264  }
 0x101   :  { %v233_v14 = vmul.f32 0.5, %v232_v12  ;;  %v125_v15 = vpop.xlane.xlu1 %124  ;;  %v4069_v12 = vld [vmem:[%s5548_s9] sm:$0xff] }
 0x102   :  { %v129_v16 = vmul.f32 %v125_v15, %v4441_v18  ;;  %v86_v17 = vmul.f32 0.5, %v85_v13  ;;  %v4073_v13 = vld [vmem:[%s5548_s9 + $0x20] sm:$0xff] }
 0x103   :  { %v234_v20 = vsub.f32 1.5, %v233_v14  ;;  %v4077_v14 = vld [vmem:[%s5548_s9 + $0x40] sm:$0xff] }
 0x104   :  { %v4236_v19 = vpop.eup %4235  ;;  %v131_v21 = vadd.f32 1e-05, %v129_v16  ;;  %v87_v28 = vsub.f32 1.5, %v86_v17  ;;  %v4081_v15 = vld [vmem:[%s5548_s9 + $0x60] sm:$0xff]  ;;  %v4088_v16 = vld [vmem:[%s5548_s9 + $0x98] sm:$0xff] }
 0x105   :  { %v4238_v22 = vpop.eup %4237  ;;  %v241_v23 = vmul.f32 %v4236_v19, %v229_v6  ;;  %v235_v31 = vmul.f32 %v4232_v5, %v234_v20  ;;  %vm247_vm9 = vweird.f32 %v4236_v19  ;;  %v4079_v6 = vld [vmem:[%s5548_s9 + $0x50] sm:$0xff]  ;;  %v4092_v17 = vld [vmem:[%s5548_s9 + $0xb8] sm:$0xff] }
 0x106   :  { %v4240_v26 = vpop.eup %4239  ;;  %v144_v27 = vmul.f32 %v4238_v22, %v4504_v9  ;;  %4241 = vrsqrt.f32 %v131_v21  ;;  %v88_v36 = vmul.f32 %v4502_v7, %v87_v28  ;;  %vm248_vm14 = vmor %vm246_vm12, %vm247_vm9  ;;  %vm150_vm2 = vweird.f32 %v4238_v22  ;;  %457 = vmatpush.bf16.msrb.mxu2 %v4079_v6  ;;  %v4074_v9 = vld [vmem:[%s5548_s9 + $0x28] sm:$0xff]  ;;  %v4100_v20 = vld [vmem:[%s5548_s9 + $0xf8] sm:$0xff] }
 0x107   :  { %v94_v29 = vmul.f32 %v4240_v26, %v82_v10  ;;  %v242_v30 = vmul.f32 %v4236_v19, %v241_v23  ;;  %vm100_vm11 = vweird.f32 %v4240_v26  ;;  %v239_v44 = vsel %vm4512_vm8, %v4232_v5, %v235_v31  ;;  %vm151_vm4 = vmor %vm149_vm15, %vm150_vm2  ;;  %v4075_v5 = vld [vmem:[%s5548_s9 + $0x30] sm:$0xff]  ;;  %v4078_v10 = vld [vmem:[%s5548_s9 + $0x48] sm:$0xff] }
 0x108   :  { %v145_v32 = vmul.f32 %v4238_v22, %v144_v27  ;;  %v92_v52 = vsel %vm4519_vm13, %v4502_v7, %v88_v36  ;;  %vm101_vm1 = vmor %vm99_vm10, %vm100_vm11  ;;  %v250_v54 = vmul.f32 %v239_v44, %v4445_v24  ;;  %vm139_vm5 = vweird.f32 %v131_v21  ;;  %v4083_v7 = vld [vmem:[%s5548_s9 + $0x70] sm:$0xff]  ;;  %410 = vmatpush.bf16.msrb.mxu1 %v4075_v5  ;;  %v4086_v27 = vld [vmem:[%s5548_s9 + $0x88] sm:$0xff] }
 0x109   :  { %v95_v33 = vmul.f32 %v4240_v26, %v94_v29  ;;  %v243_v34 = vmul.f32 0.5, %v242_v30  ;;  %v103_v59 = vmul.f32 %v92_v52, %v4447_v25  ;;  %v4095_v23 = vld [vmem:[%s5548_s9 + $0xd0] sm:$0xff]  ;;  %v4090_v28 = vld [vmem:[%s5548_s9 + $0xa8] sm:$0xff] }
 0x10a   :  { %v146_v18 = vmul.f32 0.5, %v145_v32  ;;  %458 = vmatpush.bf16.msrb.mxu2 %v4078_v10  ;;  %v4094_v29 = vld [vmem:[%s5548_s9 + $0xc8] sm:$0xff]  ;;  %v4085_v32 = vld [vmem:[%s5548_s9 + $0x80] sm:$0xff] }
 0x10b   :  { %v96_v40 = vmul.f32 0.5, %v95_v33  ;;  %v244_v41 = vsub.f32 1.5, %v243_v34  ;;  %v4098_v30 = vld [vmem:[%s5548_s9 + $0xe8] sm:$0xff]  ;;  %v4089_v33 = vld [vmem:[%s5548_s9 + $0xa0] sm:$0xff] }
 0x10c   :  { %v4242_v42 = vpop.eup %4241  ;;  %v147_v46 = vsub.f32 1.5, %v146_v18  ;;  %411 = vmatpush.bf16.msrb.mxu1 %v4074_v9  ;;  %v4093_v34 = vld [vmem:[%s5548_s9 + $0xc0] sm:$0xff]  ;;  %v310_v52 = vld [vmem:[%s5549_s2 + $0x8] sm:$0xff] }
 0x10d   :  { %v97_v47 = vsub.f32 1.5, %v96_v40  ;;  %v245_v48 = vmul.f32 %v4236_v19, %v244_v41  ;;  %v134_v49 = vmul.f32 %v4242_v42, %v131_v21  ;;  %vm140_vm3 = vweird.f32 %v4242_v42  ;;  %v4087_v21 = vld [vmem:[%s5548_s9 + $0x90] sm:$0xff]  ;;  %v4097_v18 = vld [vmem:[%s5548_s9 + $0xe0] sm:$0xff]  ;;  %v302_v40 = vpop.f32.mrf.mxu3 }
 0x10e   :  { %v148_v56 = vmul.f32 %v4238_v22, %v147_v46  ;;  %vm141_vm6 = vmor %vm139_vm5, %vm140_vm3  ;;  %459 = vmatpush.bf16.msrb.mxu2 %v4077_v14 }
 0x10f   :  { %v98_v50 = vmul.f32 %v4240_v26, %v97_v47  ;;  %v135_v51 = vmul.f32 %v4242_v42, %v134_v49  ;;  %v249_v53 = vsel %vm248_vm14, %v4236_v19, %v245_v48  ;;  %v4096_v19 = vld [vmem:[%s5548_s9 + $0xd8] sm:$0xff] }
 0x110   :  { %v251_v55 = vmul.f32 %v249_v53, %v4459_v37  ;;  %v152_v24 = vsel %vm151_vm4, %v4238_v22, %v148_v56  ;;  %412 = vmatpush.bf16.msrb.mxu1 %v4073_v13  ;;  %v4091_v22 = vld [vmem:[%s5548_s9 + $0xb0] sm:$0xff] }
 0x111   :  { %v136_v57 = vmul.f32 0.5, %v135_v51  ;;  %v102_v58 = vsel %vm101_vm1, %v4240_v26, %v98_v50  ;;  %v154_v25 = vmul.f32 %v152_v24, %v4461_v38  ;;  %v4071_v38 = vld [vmem:[%s5548_s9 + $0x10] sm:$0xff]  ;;  %v309_v50 = vld [vmem:[%s5549_s2] sm:$0xff]  ;;  %v4102_v24 = vld [vmem:[%s5548_s9 + $0x108] sm:$0xff] }
 0x112   :  { %v104_v60 = vmul.f32 %v102_v58, %v4463_v39  ;;  %v255_v61 = vpack.c.bf16 %v251_v55, %v250_v54  ;;  %v4072_v39 = vld [vmem:[%s5548_s9 + $0x18] sm:$0xff]  ;;  %v4099_v26 = vld [vmem:[%s5548_s9 + $0xf0] sm:$0xff] }
 0x113   :  { %v137_v62 = vsub.f32 1.5, %v136_v57  ;;  %362 = vmatpush.bf16.msrb.mxu0 %v4072_v39  ;;  %v4104_v57 = vld [vmem:[%s5548_s9 + $0x118] sm:$0xff]  ;;  %v4105_v39 = vld [vmem:[%s5548_s9 + $0x120] sm:$0xff] }
 0x114   :  { %v107_v63 = vpack.c.bf16 %v104_v60, %v103_v59  ;;  %3097 = vmatmul.msk.bf16.vlgmr.msra.gmra.mxu2 %vm53_vm0, %v255_v61  ;;  %v4108_v58 = vld [vmem:[%s5548_s9 + $0x138] sm:$0xff]  ;;  %v4103_v61 = vld [vmem:[%s5548_s9 + $0x110] sm:$0xff] }
 0x115   :  { %v138_v0 = vmul.f32 %v4242_v42, %v137_v62  ;;  %660 = vmatpush.bf16.msra.mxu2 %v4096_v19  ;;  %v304_v51 = vpop.f32.mrf.mxu3  ;;  %v4112_v59 = vld [vmem:[%s5548_s9 + $0x158] sm:$0xff]  ;;  %v4107_v62 = vld [vmem:[%s5548_s9 + $0x130] sm:$0xff] }
 0x116   :  { %3088 = vmatmul.msk.bf16.vlgmr.msra.gmra.mxu1 %vm53_vm0, %v107_v63  ;;  %v4116_v60 = vld [vmem:[%s5548_s9 + $0x178] sm:$0xff]  ;;  %v4111_v63 = vld [vmem:[%s5548_s9 + $0x150] sm:$0xff] }
 0x117   :  { %v142_v37 = vsel %vm141_vm6, %v4242_v42, %v138_v0  ;;  %363 = vmatpush.bf16.msrb.mxu0 %v4071_v38  ;;  %613 = vmatpush.bf16.msra.mxu1 %v4092_v17  ;;  %v4115_v0 = vld [vmem:[%s5548_s9 + $0x170] sm:$0xff] }
 0x118   :  { %v153_v1 = vmul.f32 %v142_v37, %v4471_v43  ;;  %v4084_v43 = vld [vmem:[%s5548_s9 + $0x78] sm:$0xff]  ;;  %v4106_v37 = vld [vmem:[%s5548_s9 + $0x128] sm:$0xff] }
 0x119   :  { %503 = vmatpush.bf16.msrb.mxu3 %v4084_v43  ;;  %661 = vmatpush.bf16.msra.mxu2 %v4095_v23  ;;  %v3296_v23 = vld [vmem:[%s5550_s6 + $0x68] sm:$0xff] }
 0x11a   :  { %v158_v2 = vpack.c.bf16 %v154_v25, %v153_v1  ;;  %v4110_v1 = vld [vmem:[%s5548_s9 + $0x148] sm:$0xff] }
 0x11b   :  { %364 = vmatpush.bf16.msrb.mxu0 %v4070_v8  ;;  %614 = vmatpush.bf16.msra.mxu1 %v4091_v22  ;;  %v4114_v25 = vld [vmem:[%s5548_s9 + $0x168] sm:$0xff] }
 0x11c   :  { %3083 = vmatmul.msk.bf16.vlgmr.msra.gmra.mxu0 %vm53_vm0, %v158_v2  ;;  %v4101_v2 = vld [vmem:[%s5548_s9 + $0x100] sm:$0xff] }
 0x11d   :  { %504 = vmatpush.bf16.msrb.mxu3 %v4083_v7  ;;  %662 = vmatpush.bf16.msra.mxu2 %v4094_v29 }
 0x11f   :  { %365 = vmatpush.bf16.msrb.mxu0 %v4069_v12  ;;  %615 = vmatpush.bf16.msra.mxu1 %v4090_v28 }
 0x121   :  { %505 = vmatpush.bf16.msrb.mxu3 %v4082_v11  ;;  %663 = vmatpush.bf16.msra.mxu2 %v4093_v34 }
 0x123   :  { %566 = vmatpush.bf16.msra.mxu0 %v4088_v16  ;;  %616 = vmatpush.bf16.msra.mxu1 %v4089_v33  ;;  %v3298_v16 = vld [vmem:[%s5550_s6 + $0x78] sm:$0xff] }
 0x125   :  { %506 = vmatpush.bf16.msrb.mxu3 %v4081_v15  ;;  %v3297_v15 = vld [vmem:[%s5550_s6 + $0x70] sm:$0xff] }
 0x127   :  { %567 = vmatpush.bf16.msra.mxu0 %v4087_v21 }
 0x129   :  { %707 = vmatpush.bf16.msra.mxu3 %v4100_v20 }
 0x12b   :  { %568 = vmatpush.bf16.msra.mxu0 %v4086_v27  ;;  %v3295_v27 = vld [vmem:[%s5550_s6 + $0x60] sm:$0xff] }
 0x12d   :  { %708 = vmatpush.bf16.msra.mxu3 %v4099_v26 }
 0x12f   :  { %569 = vmatpush.bf16.msra.mxu0 %v4085_v32 }
 0x131   :  { %709 = vmatpush.bf16.msra.mxu3 %v4098_v30 }
 0x135   :  { %710 = vmatpush.bf16.msra.mxu3 %v4097_v18  ;;  %v3294_v18 = vld [vmem:[%s5550_s6 + $0x58] sm:$0xff] }
 0x193   :  { %v200_v31 = vpop.f32.mrf.mxu1 }
 0x197   :  { %v274_v35 = vpop.f32.mrf.mxu2 }
 0x199   :  { %v177_v36 = vpop.f32.mrf.mxu0 }
 0x19a   :  { %v201_v41 = vadd.f32 %v200_v31, %v177_v36  ;;  %v3293_v36 = vld [vmem:[%s5550_s6 + $0x50] sm:$0xff] }
 0x19b   :  { %v202_v44 = vpop.f32.mrf.mxu1 }
 0x19c   :  { %v279_v42 = vadd.f32 %v274_v35, %v201_v41 }
 0x19e   :  { %v307_v48 = vadd.f32 %v302_v40, %v279_v42 }
 0x19f   :  { %v276_v47 = vpop.f32.mrf.mxu2 }
 0x1a0   :  { %v4639_v54 = vadd.f32 %v309_v50, %v307_v48  ;;  %v3404_v48 = vld [vmem:[%s5550_s6 + $0xa8] sm:$0xff] }
 0x1a1   :  { %v179_v45 = vpop.f32.mrf.mxu0 }
 0x1a2   :  { %v203_v46 = vadd.f32 %v202_v44, %v179_v45  ;;  %v3405_v44 = vld [vmem:[%s5550_s6 + $0xb0] sm:$0xff]  ;;  %v3406_v45 = vld [vmem:[%s5550_s6 + $0xb8] sm:$0xff] }
 0x1a4   :  { %v280_v49 = vadd.f32 %v276_v47, %v203_v46 }
 0x1a6   :  { %v308_v53 = vadd.f32 %v304_v51, %v280_v49 }
 0x1a8   :  { %v4641_v55 = vadd.f32 %v310_v52, %v308_v53  ;;  %v3292_v53 = vld [vmem:[%s5550_s6 + $0x48] sm:$0xff] }
 0x1aa   :  { %v329_v56 = vpack.c.bf16 %v4641_v55, %v4639_v54 }
 0x1ac   :  { %3115 = vmatmul.msk.bf16.vlgmr.msrb.gmra.mxu0 %vm354_vm7, %v329_v56  ;;  %3140 = vmatmul.msk.bf16.vlgmr.msrb.gmra.mxu1 %vm354_vm7, %v329_v56 }
 0x1ad   :  { %3165 = vmatmul.msk.bf16.vlgmr.msrb.gmra.mxu2 %vm354_vm7, %v329_v56  ;;  %3190 = vmatmul.msk.bf16.vlgmr.msrb.gmra.mxu3 %vm354_vm7, %v329_v56 }
 0x1ae   :  { %771 = vmatpush.bf16.msrb.mxu0 %v4104_v57  ;;  %818 = vmatpush.bf16.msrb.mxu1 %v4108_v58 }
 0x1af   :  { %865 = vmatpush.bf16.msrb.mxu2 %v4112_v59  ;;  %912 = vmatpush.bf16.msrb.mxu3 %v4116_v60  ;;  %v3291_v59 = vld [vmem:[%s5550_s6 + $0x40] sm:$0xff] }
 0x1b2   :  { %772 = vmatpush.bf16.msrb.mxu0 %v4103_v61  ;;  %819 = vmatpush.bf16.msrb.mxu1 %v4107_v62  ;;  %v3402_v61 = vld [vmem:[%s5550_s6 + $0x98] sm:$0xff] }
 0x1b3   :  { %866 = vmatpush.bf16.msrb.mxu2 %v4111_v63  ;;  %913 = vmatpush.bf16.msrb.mxu3 %v4115_v0 }
 0x1b6   :  { %773 = vmatpush.bf16.msrb.mxu0 %v4102_v24  ;;  %820 = vmatpush.bf16.msrb.mxu1 %v4106_v37  ;;  %v3401_v24 = vld [vmem:[%s5550_s6 + $0x90] sm:$0xff] }
 0x1b7   :  { %867 = vmatpush.bf16.msrb.mxu2 %v4110_v1  ;;  %914 = vmatpush.bf16.msrb.mxu3 %v4114_v25 }
 0x1ba   :  { %774 = vmatpush.bf16.msrb.mxu0 %v4101_v2  ;;  %821 = vmatpush.bf16.msrb.mxu1 %v4105_v39  ;;  %v3400_v39 = vld [vmem:[%s5550_s6 + $0x88] sm:$0xff] }
 0x1bb   :  { %868 = vmatpush.bf16.msrb.mxu2 %v4109_v3  ;;  %915 = vmatpush.bf16.msrb.mxu3 %v4113_v4 }
 0x1bc   :  { %3215 = vmatmul.msk.bf16.vlgmr.msra.gmra.mxu0 %vm354_vm7, %v329_v56  ;;  %3240 = vmatmul.msk.bf16.vlgmr.msra.gmra.mxu1 %vm354_vm7, %v329_v56 }
 0x1bd   :  { %3265 = vmatmul.msk.bf16.vlgmr.msra.gmra.mxu2 %vm354_vm7, %v329_v56  ;;  %3290 = vmatmul.msk.bf16.vlgmr.msra.gmra.mxu3 %vm354_vm7, %v329_v56 }
 0x1cc   :  { %3323 = vmatmul.msk.bf16.vlgmr.msrb.gmra.mxu0 %vm354_vm7, %v329_v56  ;;  %3348 = vmatmul.msk.bf16.vlgmr.msrb.gmra.mxu1 %vm354_vm7, %v329_v56 }
 0x1cd   :  { %3373 = vmatmul.msk.bf16.vlgmr.msrb.gmra.mxu2 %vm354_vm7, %v329_v56  ;;  %3398 = vmatmul.msk.bf16.vlgmr.msrb.gmra.mxu3 %vm354_vm7, %v329_v56  ;;  %v3403_v56 = vld [vmem:[%s5550_s6 + $0xa0] sm:$0xff] }
 0x229   :  { %v4705_v43 = vpop.f32.mrf.mxu1  ;;  %v4707_v38 = vpop.f32.mrf.mxu0 }
 0x230   :  { %v4709_v5 = vpop.f32.mrf.mxu2  ;;  %v4711_v6 = vpop.f32.mrf.mxu3 }
 0x231   :  { %v4713_v7 = vpop.f32.mrf.mxu1  ;;  %v4715_v8 = vpop.f32.mrf.mxu0 }
 0x238   :  { %v4717_v9 = vpop.f32.mrf.mxu2  ;;  %v4719_v10 = vpop.f32.mrf.mxu3 }
 0x239   :  { %v618_v11 = vpop.f32.mrf.mxu1  ;;  %v571_v14 = vpop.f32.mrf.mxu0 }
 0x23a   :  { %v728_v46 = vadd.f32 %v3293_v36, %v618_v11  ;;  %v726_v37 = vadd.f32 %v3291_v59, %v571_v14  ;;  %v3399_v11 = vld [vmem:[%s5550_s6 + $0x80] sm:$0xff]  ;;  %v514_v14 = vld [vmem:[%s5550_s6 + $0x8] sm:$0xff] }
 0x240   :  { %v665_v12 = vpop.f32.mrf.mxu2  ;;  %v712_v13 = vpop.f32.mrf.mxu3 }
 0x241   :  { %v620_v17 = vpop.f32.mrf.mxu1  ;;  %v732_v21 = vadd.f32 %v3297_v15, %v712_v13  ;;  %v573_v28 = vpop.f32.mrf.mxu0  ;;  %v730_v31 = vadd.f32 %v3295_v27, %v665_v12 }
 0x242   :  { %v729_v40 = vadd.f32 %v3294_v18, %v620_v17  ;;  %v727_v62 = vadd.f32 %v3292_v53, %v573_v28  ;;  %v513_v17 = vld [vmem:[%s5550_s6] sm:$0xff] }
 0x244   :  { %v944_v52 = vpack.c.bf16 %v729_v40, %v728_v46  ;;  %v943_v4 = vpack.c.bf16 %v727_v62, %v726_v37  ;;  %v315_v46 = vld [vmem:[%s5551_s3 + $0x10] sm:$0xff] }
 0x246   :  { %v963_v0 = vsel %vm53_vm0, %v944_v52, 0 }
 0x248   :  { %v667_v19 = vpop.f32.mrf.mxu2  ;;  %v714_v20 = vpop.f32.mrf.mxu3 }
 0x249   :  { %v733_v22 = vadd.f32 %v3298_v16, %v714_v20  ;;  %v731_v29 = vadd.f32 %v3296_v23, %v667_v19  ;;  %v823_v35 = vpop.f32.mrf.mxu1  ;;  %v776_v42 = vpop.f32.mrf.mxu0  ;;  %v960_v16 = vsel %vm53_vm0, %v943_v4, 0  ;;  %v522_v19 = vadd.f32 %v514_v14, %v4715_v8  ;;  %v516_v23 = vld [vmem:[%s5550_s6 + $0x18] sm:$0xff] }
 0x24a   :  { %v933_v3 = vadd.f32 %v3401_v24, %v823_v35  ;;  %v931_v15 = vadd.f32 %v3399_v11, %v776_v42  ;;  %v524_v27 = vadd.f32 %v516_v23, %v4713_v7  ;;  %v519_v7 = vld [vmem:[%s5550_s6 + $0x30] sm:$0xff]  ;;  %v320_v11 = vld [vmem:[%s5551_s3 + $0x38] sm:$0xff] }
 0x24b   :  { %v946_v26 = vpack.c.bf16 %v733_v22, %v732_v21  ;;  %v945_v34 = vpack.c.bf16 %v731_v29, %v730_v31  ;;  %v521_v21 = vadd.f32 %v513_v17, %v4707_v38  ;;  %v518_v38 = vld [vmem:[%s5550_s6 + $0x28] sm:$0xff]  ;;  %v517_v29 = vld [vmem:[%s5550_s6 + $0x20] sm:$0xff] }
 0x24c   :  { %v525_v31 = vadd.f32 %v517_v29, %v4709_v5  ;;  %v313_v5 = vld [vmem:[%s5551_s3] sm:$0xff] }
 0x24d   :  { %v969_v30 = vsel %vm53_vm0, %v946_v26, 0  ;;  %v966_v41 = vsel %vm53_vm0, %v945_v34, 0  ;;  %v939_v22 = vpack.c.bf16 %v522_v19, %v521_v21  ;;  %v515_v26 = vld [vmem:[%s5550_s6 + $0x10] sm:$0xff]  ;;  %v527_v34 = vadd.f32 %v519_v7, %v4711_v6 }
 0x24e   :  { %975 = vmatpush.bf16.xpose.msra.mxu0 %v969_v30  ;;  %v523_v28 = vadd.f32 %v515_v26, %v4705_v43  ;;  %v526_v30 = vadd.f32 %v518_v38, %v4717_v9  ;;  %v520_v43 = vld [vmem:[%s5550_s6 + $0x38] sm:$0xff] }
 0x250   :  { %v870_v32 = vpop.f32.mrf.mxu2  ;;  %v917_v33 = vpop.f32.mrf.mxu3  ;;  %v940_v8 = vpack.c.bf16 %v524_v27, %v523_v28 }
 0x251   :  { %v937_v50 = vadd.f32 %v3405_v44, %v917_v33  ;;  %v825_v60 = vpop.f32.mrf.mxu1  ;;  %v935_v63 = vadd.f32 %v3403_v56, %v870_v32  ;;  %v778_v2 = vpop.f32.mrf.mxu0  ;;  %v941_v32 = vpack.c.bf16 %v526_v30, %v525_v31  ;;  %v528_v33 = vadd.f32 %v520_v43, %v4719_v10  ;;  %v314_v10 = vld [vmem:[%s5551_s3 + $0x8] sm:$0xff] }
 0x252   :  { %v934_v1 = vadd.f32 %v3402_v61, %v825_v60  ;;  %v932_v12 = vadd.f32 %v3400_v39, %v778_v2 }
 0x253   :  { %v942_v18 = vpack.c.bf16 %v528_v33, %v527_v34 }
 0x254   :  { %v1109_v13 = vpack.c.bf16 %v934_v1, %v933_v3  ;;  %v1108_v20 = vpack.c.bf16 %v932_v12, %v931_v15 }
 0x256   :  { %976 = vmatpush.bf16.xpose.msra.mxu0 %v966_v41 }
 0x258   :  { %v872_v47 = vpop.f32.mrf.mxu2  ;;  %v919_v49 = vpop.f32.mrf.mxu3 }
 0x259   :  { %v938_v51 = vadd.f32 %v3406_v45, %v919_v49  ;;  %v936_v57 = vadd.f32 %v3404_v48, %v872_v47 }
 0x25b   :  { %v1111_v58 = vpack.c.bf16 %v938_v51, %v937_v50  ;;  %v1110_v25 = vpack.c.bf16 %v936_v57, %v935_v63  ;;  %v316_v51 = vld [vmem:[%s5551_s3 + $0x18] sm:$0xff]  ;;  %v318_v63 = vld [vmem:[%s5551_s3 + $0x28] sm:$0xff] }
 0x25d   :  { %1128 = vmatpush.bf16.msra.mxu1 %v1111_v58  ;;  %v317_v58 = vld [vmem:[%s5551_s3 + $0x20] sm:$0xff] }
 0x25e   :  { %977 = vmatpush.bf16.xpose.msra.mxu0 %v963_v0 }
 0x261   :  { %1129 = vmatpush.bf16.msra.mxu1 %v1110_v25  ;;  %v319_v25 = vld [vmem:[%s5551_s3 + $0x30] sm:$0xff] }
 0x265   :  { %1130 = vmatpush.bf16.msra.mxu1 %v1109_v13 }
 0x266   :  { %978 = vmatpush.bf16.xpose.msra.mxu0 %v960_v16 }
 0x269   :  { %1131 = vmatpush.bf16.msra.mxu1 %v1108_v20 }
 0x26d   :  { %3407 = vmatmul.msk.bf16.vlgmr.msra.gmra.mxu0 %vm53_vm0, %v939_v22 }
 0x27d   :  { %3408 = vmatmul.msk.bf16.gmra.mxu0 %vm53_vm0, %v940_v8 }
 0x28d   :  { %3409 = vmatmul.msk.bf16.gmra.mxu0 %vm53_vm0, %v941_v32 }
 0x29d   :  { %3410 = vmatmul.msk.bf16.gmra.mxu0 %vm53_vm0, %v942_v18 }
 0x2ea   :  { %v980_v9 = vpop.f32.mrf.mxu0 }
 0x2eb   :  { %v1000_v35 = vmul.f32 0.25, %v980_v9 }
 0x2ed   :  { %v1008_v36 = vadd.f32 %v1000_v35, %v313_v5 }
 0x2ef   :  { %v1016_v40 = vsel %vm354_vm7, %v1008_v36, -inf }
 0x2f0   :  { %1017 = vmax.xlane.f32.xlu0 %v1016_v40 }
 0x2f2   :  { %v982_v41 = vpop.f32.mrf.mxu0 }
 0x2f3   :  { %v1001_v42 = vmul.f32 0.25, %v982_v41 }
 0x2f5   :  { %v1009_v6 = vadd.f32 %v1001_v42, %v314_v10 }
 0x2f7   :  { %v1019_v44 = vsel %vm354_vm7, %v1009_v6, -inf }
 0x2f8   :  { %1020 = vmax.xlane.f32.xlu1 %v1019_v44 }
 0x2fa   :  { %v985_v45 = vpop.f32.mrf.mxu0 }
 0x2fb   :  { %v1002_v47 = vmul.f32 0.25, %v985_v45 }
 0x2fd   :  { %v1010_v48 = vadd.f32 %v1002_v47, %v315_v46 }
 0x2ff   :  { %v1022_v49 = vsel %vm354_vm7, %v1010_v48, -inf }
 0x300   :  { %1023 = vmax.xlane.f32.xlu2 %v1022_v49 }
 0x302   :  { %v987_v50 = vpop.f32.mrf.mxu0 }
 0x303   :  { %v1003_v52 = vmul.f32 0.25, %v987_v50 }
 0x305   :  { %v1011_v53 = vadd.f32 %v1003_v52, %v316_v51 }
 0x307   :  { %v1025_v56 = vsel %vm354_vm7, %v1011_v53, -inf }
 0x308   :  { %1026 = vmax.xlane.f32.xlu0 %v1025_v56 }
 0x30a   :  { %v990_v57 = vpop.f32.mrf.mxu0 }
 0x30b   :  { %v1004_v59 = vmul.f32 0.25, %v990_v57 }
 0x30d   :  { %v1012_v60 = vadd.f32 %v1004_v59, %v317_v58 }
 0x30f   :  { %v1028_v61 = vsel %vm354_vm7, %v1012_v60, -inf }
 0x310   :  { %1029 = vmax.xlane.f32.xlu1 %v1028_v61 }
 0x312   :  { %v992_v62 = vpop.f32.mrf.mxu0 }
 0x313   :  { %v1005_v0 = vmul.f32 0.25, %v992_v62 }
 0x315   :  { %v1013_v24 = vadd.f32 %v1005_v0, %v318_v63 }
 0x317   :  { %v1031_v37 = vsel %vm354_vm7, %v1013_v24, -inf }
 0x318   :  { %1032 = vmax.xlane.f32.xlu2 %v1031_v37 }
 0x31a   :  { %v995_v1 = vpop.f32.mrf.mxu0 }
 0x31b   :  { %v1006_v2 = vmul.f32 0.25, %v995_v1 }
 0x31d   :  { %v1014_v39 = vadd.f32 %v1006_v2, %v319_v25 }
 0x31f   :  { %v1034_v3 = vsel %vm354_vm7, %v1014_v39, -inf }
 0x320   :  { %1035 = vmax.xlane.f32.xlu0 %v1034_v3 }
 0x322   :  { %v997_v4 = vpop.f32.mrf.mxu0 }
 0x323   :  { %v1007_v12 = vmul.f32 0.25, %v997_v4 }
 0x325   :  { %v1015_v13 = vadd.f32 %v1007_v12, %v320_v11 }
 0x327   :  { %v1037_v14 = vsel %vm354_vm7, %v1015_v13, -inf }
 0x328   :  { %1038 = vmax.xlane.f32.xlu1 %v1037_v14 }
 0x363   :  { %v1018_v15 = vpop.xlane.xlu0 %1017 }
 0x364   :  { %v1040_v16 = vsub.f32 %v1008_v36, %v1018_v15 }
 0x366   :  { %v1048_v17 = vmul.f32 1.442695, %v1040_v16 }
 0x368   :  { %4243 = vpow2.f32 %v1048_v17 }
 0x36b   :  { %v1021_v19 = vpop.xlane.xlu1 %1020 }
 0x36c   :  { %v1041_v20 = vsub.f32 %v1009_v6, %v1021_v19 }
 0x36e   :  { %v4244_v21 = vpop.eup %4243  ;;  %v1050_v22 = vmul.f32 1.442695, %v1041_v20 }
 0x36f   :  { %v1064_v23 = vsel %vm354_vm7, %v4244_v21, 0.0 }
 0x370   :  { %4245 = vpow2.f32 %v1050_v22  ;;  %1065 = vadd.xlane.f32.xlu2 %v1064_v23  ;;  %v4117_v22 = vld [vmem:[%s5552_s10] sm:$0xff]  ;;  %v4118_v23 = vld [vmem:[%s5552_s10 + $0x8] sm:$0xff] }
 0x371   :  { %1199 = vmatpush.bf16.msra.mxu3 %v4117_v22  ;;  %1176 = vmatpush.bf16.msra.mxu2 %v4118_v23  ;;  %v3462_v22 = vld [vmem:[%s5554_s11 + $0x28] sm:$0xf0] }
 0x373   :  { %v1024_v26 = vpop.xlane.xlu2 %1023 }
 0x374   :  { %v1042_v27 = vsub.f32 %v1010_v48, %v1024_v26 }
 0x376   :  { %v4246_v28 = vpop.eup %4245  ;;  %v1052_v8 = vmul.f32 1.442695, %v1042_v27  ;;  %v4119_v27 = vld [vmem:[%s5552_s10 + $0x10] sm:$0xff] }
 0x377   :  { %v1067_v38 = vsel %vm354_vm7, %v4246_v28, 0.0  ;;  %1226 = vmatpush.bf16.msrb.mxu2 %v4119_v27  ;;  %v4124_v27 = vld [vmem:[%s5554_s11 + $0x14] sm:$0xf0] }
 0x378   :  { %4247 = vpow2.f32 %v1052_v8  ;;  %1068 = vadd.xlane.f32.xlu0 %v1067_v38 }
 0x37b   :  { %v1027_v29 = vpop.xlane.xlu0 %1026 }
 0x37c   :  { %v1043_v30 = vsub.f32 %v1011_v53, %v1027_v29  ;;  %v4120_v29 = vld [vmem:[%s5552_s10 + $0x18] sm:$0xff] }
 0x37d   :  { %1255 = vmatpush.bf16.msrb.mxu3 %v4120_v29 }
 0x37e   :  { %v4248_v31 = vpop.eup %4247  ;;  %v1054_v32 = vmul.f32 1.442695, %v1043_v30 }
 0x37f   :  { %v1070_v43 = vsel %vm354_vm7, %v4248_v31, 0.0 }
 0x380   :  { %4249 = vpow2.f32 %v1054_v32  ;;  %1071 = vadd.xlane.f32.xlu1 %v1070_v43 }
 0x383   :  { %v1030_v7 = vpop.xlane.xlu1 %1029 }
 0x384   :  { %v1044_v33 = vsub.f32 %v1012_v60, %v1030_v7 }
 0x386   :  { %v4250_v34 = vpop.eup %4249  ;;  %v1056_v18 = vmul.f32 1.442695, %v1044_v33 }
 0x387   :  { %v1073_v9 = vsel %vm354_vm7, %v4250_v34, 0.0 }
 0x388   :  { %4251 = vpow2.f32 %v1056_v18  ;;  %1074 = vadd.xlane.f32.xlu2 %v1073_v9 }
 0x38b   :  { %v1033_v5 = vpop.xlane.xlu2 %1032 }
 0x38c   :  { %v1045_v35 = vsub.f32 %v1013_v24, %v1033_v5 }
 0x38e   :  { %v4252_v36 = vpop.eup %4251  ;;  %v1058_v40 = vmul.f32 1.442695, %v1045_v35 }
 0x38f   :  { %v1076_v41 = vsel %vm354_vm7, %v4252_v36, 0.0 }
 0x390   :  { %4253 = vpow2.f32 %v1058_v40  ;;  %1077 = vadd.xlane.f32.xlu0 %v1076_v41 }
 0x393   :  { %v1036_v10 = vpop.xlane.xlu0 %1035 }
 0x394   :  { %v1046_v42 = vsub.f32 %v1014_v39, %v1036_v10 }
 0x396   :  { %v4254_v6 = vpop.eup %4253  ;;  %v1060_v44 = vmul.f32 1.442695, %v1046_v42 }
 0x397   :  { %v1079_v45 = vsel %vm354_vm7, %v4254_v6, 0.0 }
 0x398   :  { %4255 = vpow2.f32 %v1060_v44  ;;  %1080 = vadd.xlane.f32.xlu1 %v1079_v45 }
 0x39b   :  { %v1039_v46 = vpop.xlane.xlu1 %1038 }
 0x39c   :  { %v1047_v47 = vsub.f32 %v1015_v13, %v1039_v46 }
 0x39e   :  { %v4256_v48 = vpop.eup %4255  ;;  %v1062_v49 = vmul.f32 1.442695, %v1047_v47 }
 0x39f   :  { %v1082_v50 = vsel %vm354_vm7, %v4256_v48, 0.0 }
 0x3a0   :  { %4257 = vpow2.f32 %v1062_v49  ;;  %1083 = vadd.xlane.f32.xlu2 %v1082_v50 }
 0x3a6   :  { %v4258_v51 = vpop.eup %4257 }
 0x3a7   :  { %v1085_v52 = vsel %vm354_vm7, %v4258_v51, 0.0 }
 0x3a8   :  { %1086 = vadd.xlane.f32.xlu0 %v1085_v52 }
 0x3e3   :  { %v1066_v53 = vpop.xlane.xlu2 %1065 }
 0x3e4   :  { %4259 = vrcp.f32 %v1066_v53 }
 0x3ea   :  { %v4260_v57 = vpop.eup %4259 }
 0x3eb   :  { %v1069_v56 = vpop.xlane.xlu0 %1068  ;;  %v1096_v59 = vmul.f32 %v4260_v57, %v4244_v21 }
 0x3ec   :  { %4261 = vrcp.f32 %v1069_v56 }
 0x3f2   :  { %v4262_v58 = vpop.eup %4261 }
 0x3f3   :  { %v1097_v60 = vmul.f32 %v4262_v58, %v4246_v28  ;;  %v1072_v62 = vpop.xlane.xlu1 %1071  ;;  %v4336_v58 = vmov 64.0  }
 0x3f4   :  { %4263 = vrcp.f32 %v1072_v62 }
 0x3f5   :  { %v1104_v61 = vpack.c.bf16 %v1097_v60, %v1096_v59 }
 0x3f7   :  { %3411 = vmatmul.msk.bf16.vlgmr.msra.gmra.mxu1 %vm354_vm7, %v1104_v61 }
 0x3fa   :  { %v4264_v0 = vpop.eup %4263 }
 0x3fb   :  { %v1075_v63 = vpop.xlane.xlu2 %1074  ;;  %v1098_v37 = vmul.f32 %v4264_v0, %v4248_v31 }
 0x3fc   :  { %4265 = vrcp.f32 %v1075_v63 }
 0x402   :  { %v4266_v24 = vpop.eup %4265 }
 0x403   :  { %v1099_v1 = vmul.f32 %v4266_v24, %v4250_v34  ;;  %v1078_v2 = vpop.xlane.xlu0 %1077 }
 0x404   :  { %4267 = vrcp.f32 %v1078_v2 }
 0x405   :  { %v1105_v25 = vpack.c.bf16 %v1099_v1, %v1098_v37 }
 0x407   :  { %3412 = vmatmul.msk.bf16.gmra.mxu1 %vm354_vm7, %v1105_v25 }
 0x40a   :  { %v4268_v3 = vpop.eup %4267 }
 0x40b   :  { %v1081_v39 = vpop.xlane.xlu1 %1080  ;;  %v1100_v11 = vmul.f32 %v4268_v3, %v4252_v36 }
 0x40c   :  { %4269 = vrcp.f32 %v1081_v39 }
 0x412   :  { %v4270_v4 = vpop.eup %4269 }
 0x413   :  { %v1101_v12 = vmul.f32 %v4270_v4, %v4254_v6  ;;  %v1084_v14 = vpop.xlane.xlu2 %1083  ;;  %v1264_v6 = vld [vmem:[%s5553_s5] ss:$0 sm:$0xff] }
 0x414   :  { %4271 = vrcp.f32 %v1084_v14 }
 0x415   :  { %v1106_v13 = vpack.c.bf16 %v1101_v12, %v1100_v11  ;;  %v3468_v11 = vld [vmem:[%s5554_s11 + $0x30] sm:$0xf]  ;;  %v4128_v12 = vld [vmem:[%s5554_s11 + $0x34] sm:$0xf0] }
 0x416   :  { %v3469_v14 = vor.u32 %v4128_v12, %v3468_v11  ;;  %v4131_v11 = vld [vmem:[%s5555_s12 + $0x10] sm:$0xff] }
 0x417   :  { %3413 = vmatmul.msk.bf16.gmra.mxu1 %vm354_vm7, %v1106_v13  ;;  %v4127_v13 = vld [vmem:[%s5554_s11 + $0x34] sm:$0xf] }
 0x418   :  { %v4139_v12 = vld [vmem:[%s5555_s12 + $0x50] sm:$0xff] }
 0x41a   :  { %v4272_v16 = vpop.eup %4271 }
 0x41b   :  { %v1087_v15 = vpop.xlane.xlu0 %1086  ;;  %v1102_v19 = vmul.f32 %v4272_v16, %v4256_v48 }
 0x41c   :  { %4273 = vrcp.f32 %v1087_v15  ;;  %v3470_v15 = vld [vmem:[%s5554_s11 + $0x38] sm:$0xf0] }
 0x41d   :  { %4275 = vrcp.f32 %v4336_v58  ;;  %v3473_v16 = vor.u32 %v4127_v13, %v3470_v15  ;;  %v4130_v13 = vld [vmem:[%s5555_s12 + $0x8] sm:$0xff]  ;;  %v4129_v15 = vld [vmem:[%s5555_s12] sm:$0xff] }
 0x422   :  { %v4274_v17 = vpop.eup %4273 }
 0x423   :  { %v1103_v20 = vmul.f32 %v4274_v17, %v4258_v51  ;;  %v4276_v59 = vpop.eup %4275  ;;  %v3460_v17 = vld [vmem:[%s5554_s11 + $0x20] sm:$0xf] }
 0x424   :  { %v1278_v60 = vmul.f32 64.0, %v4276_v59  ;;  %vm1282_vm8 = vweird.f32 %v4276_v59 }
 0x425   :  { %v1107_v21 = vpack.c.bf16 %v1103_v20, %v1102_v19  ;;  %v4126_v19 = vld [vmem:[%s5554_s11 + $0x24] sm:$0xf0]  ;;  %v4125_v20 = vld [vmem:[%s5554_s11 + $0x24] sm:$0xf] }
 0x426   :  { %v1279_v61 = vsub.f32 1.0, %v1278_v60  ;;  %v3465_v23 = vor.u32 %v4125_v20, %v3462_v22 }
 0x427   :  { %3414 = vmatmul.msk.bf16.gmra.mxu1 %vm354_vm7, %v1107_v21  ;;  %v3461_v21 = vor.u32 %v4126_v19, %v3460_v17  ;;  %v3441_v17 = vld [vmem:[%s5553_s5 + $0x3] ss:$8 sm:$0x3] }
 0x428   :  { %v1280_v62 = vmul.f32 %v4276_v59, %v1279_v61  ;;  %v1339_v22 = vperm.slane %v3441_v17, 1 }
 0x42a   :  { %v1281_v63 = vadd.f32 %v4276_v59, %v1280_v62  ;;  %v1269_v62 = vld [vmem:[%s5553_s5 + $0x1] ss:$0 sm:$0xff] }
 0x474   :  { %v1133_v26 = vpop.f32.mrf.mxu1 }
 0x47c   :  { %v1135_v28 = vpop.f32.mrf.mxu1 }
 0x47d   :  { %v1155_v8 = vpack.c.bf16 %v1135_v28, %v1133_v26  ;;  %v3452_v26 = vld [vmem:[%s5554_s11 + $0x10] sm:$0xf]  ;;  %v4123_v28 = vld [vmem:[%s5554_s11 + $0x14] sm:$0xf] }
 0x47f   :  { %3426 = vmatmul.msk.bf16.vlgmr.msra.gmra.mxu3 %vm53_vm0, %v1155_v8  ;;  %v3453_v8 = vor.u32 %v4124_v27, %v3452_v26 }
 0x480   :  { %1403 = vmatpush.bf16.msra.mxu3 %v3473_v16  ;;  %v4137_v16 = vld [vmem:[%s5555_s12 + $0x40] sm:$0xff] }
 0x484   :  { %v1138_v38 = vpop.f32.mrf.mxu1  ;;  %1404 = vmatpush.bf16.msra.mxu3 %v3465_v23 }
 0x48c   :  { %v1140_v30 = vpop.f32.mrf.mxu1 }
 0x48d   :  { %v1159_v31 = vpack.c.bf16 %v1140_v30, %v1138_v38  ;;  %v3454_v38 = vld [vmem:[%s5554_s11 + $0x18] sm:$0xf0] }
 0x48e   :  { %v3457_v30 = vor.u32 %v4123_v28, %v3454_v38 }
 0x48f   :  { %3421 = vmatmul.msk.bf16.vlgmr.msra.gmra.mxu2 %vm53_vm0, %v1159_v31 }
 0x490   :  { %1389 = vmatpush.bf16.msra.mxu2 %v3469_v14  ;;  %1405 = vmatpush.bf16.msra.mxu3 %v3457_v30  ;;  %v4138_v14 = vld [vmem:[%s5555_s12 + $0x48] sm:$0xff] }
 0x494   :  { %v1143_v32 = vpop.f32.mrf.mxu1  ;;  %1390 = vmatpush.bf16.msra.mxu2 %v3461_v21  ;;  %v1338_v21 = vperm.slane %v3441_v17, 0  ;;  %v4180_v17 = vld [vmem:[%s5548_s9 + $0x298] sm:$0xff] }
 0x498   :  { %1391 = vmatpush.bf16.msra.mxu2 %v3453_v8 }
 0x49c   :  { %v1145_v43 = vpop.f32.mrf.mxu1 }
 0x49d   :  { %v1209_v7 = vpack.c.bf16 %v1145_v43, %v1143_v32  ;;  %v3444_v32 = vld [vmem:[%s5554_s11] sm:$0xf]  ;;  %v4122_v43 = vld [vmem:[%s5554_s11 + $0x4] sm:$0xf0] }
 0x49f   :  { %3433 = vmatmul.msk.bf16.vlgmr.msrb.gmra.mxu2 %vm53_vm0, %v1209_v7  ;;  %v4121_v7 = vld [vmem:[%s5554_s11 + $0x4] sm:$0xf] }
 0x4a4   :  { %v1148_v33 = vpop.f32.mrf.mxu1 }
 0x4ac   :  { %v1150_v34 = vpop.f32.mrf.mxu1 }
 0x4ad   :  { %v1238_v18 = vpack.c.bf16 %v1150_v34, %v1148_v33  ;;  %v3445_v34 = vor.u32 %v4122_v43, %v3444_v32 }
 0x4af   :  { %3440 = vmatmul.msk.bf16.vlgmr.msrb.gmra.mxu3 %vm53_vm0, %v1238_v18  ;;  %v3446_v18 = vld [vmem:[%s5554_s11 + $0x8] sm:$0xf0]  ;;  %1392 = vmatpush.bf16.msra.mxu2 %v3445_v34  ;;  %v1451_v34 = vld [vmem:[%s5553_s5 + $0x4] ss:$0 sm:$0xff] }
 0x502   :  { %v1201_v5 = vpop.f32.mrf.mxu3 }
 0x50a   :  { %v1203_v36 = vpop.f32.mrf.mxu3 }
 0x512   :  { %v1178_v9 = vpop.f32.mrf.mxu2 }
 0x513   :  { %v1202_v41 = vadd.f32 %v1201_v5, %v1178_v9  ;;  %v3449_v9 = vor.u32 %v4121_v7, %v3446_v18  ;;  %v4136_v5 = vld [vmem:[%s5555_s12 + $0x38] sm:$0xff] }
 0x514   :  { %1548 = vmatpush.bf16.msrb.mxu1 %v4136_v5 }
 0x515   :  { %1406 = vmatpush.bf16.msra.mxu3 %v3449_v9 }
 0x51a   :  { %v1180_v35 = vpop.f32.mrf.mxu2 }
 0x51b   :  { %v1204_v47 = vadd.f32 %v1203_v36, %v1180_v35  ;;  %v4144_v36 = vld [vmem:[%s5555_s12 + $0x78] sm:$0xff] }
 0x51c   :  { %1562 = vmatpush.bf16.msrb.mxu2 %v4144_v36 }
 0x522   :  { %v1228_v40 = vpop.f32.mrf.mxu2 }
 0x523   :  { %v1233_v10 = vadd.f32 %v1228_v40, %v1202_v41  ;;  %v4135_v41 = vld [vmem:[%s5555_s12 + $0x30] sm:$0xff] }
 0x524   :  { %1549 = vmatpush.bf16.msrb.mxu1 %v4135_v41 }
 0x52a   :  { %v1230_v46 = vpop.f32.mrf.mxu2 }
 0x52b   :  { %v1234_v49 = vadd.f32 %v1230_v46, %v1204_v47  ;;  %v4142_v47 = vld [vmem:[%s5555_s12 + $0x68] sm:$0xff] }
 0x532   :  { %v1257_v42 = vpop.f32.mrf.mxu3 }
 0x533   :  { %v1262_v44 = vadd.f32 %v1257_v42, %v1233_v10  ;;  %v4143_v10 = vld [vmem:[%s5555_s12 + $0x70] sm:$0xff] }
 0x534   :  { %1563 = vmatpush.bf16.msrb.mxu2 %v4143_v10 }
 0x535   :  { %v1265_v45 = vadd.f32 %v1264_v6, %v1262_v44 }
 0x537   :  { %v1267_v48 = vadd.f32 %v1265_v45, %v4639_v54  ;;  %v4876_v54 = vsel %vm1282_vm8, %v4276_v59, %v1281_v63  ;;  %v4134_v45 = vld [vmem:[%s5555_s12 + $0x28] sm:$0xff] }
 0x538   :  { %1550 = vmatpush.bf16.msrb.mxu1 %v4134_v45  ;;  %1564 = vmatpush.bf16.msrb.mxu2 %v4142_v47 }
 0x539   :  { %v1271_v50 = vsel %vm354_vm7, %v1267_v48, 0.0 }
 0x53a   :  { %1272 = vadd.xlane.f32.xlu1 %v1271_v50  ;;  %v1259_v51 = vpop.f32.mrf.mxu3 }
 0x53b   :  { %v1263_v52 = vadd.f32 %v1259_v51, %v1234_v49  ;;  %v4133_v49 = vld [vmem:[%s5555_s12 + $0x20] sm:$0xff] }
 0x53c   :  { %v4141_v51 = vld [vmem:[%s5555_s12 + $0x60] sm:$0xff]  ;;  %1551 = vmatpush.bf16.msrb.mxu1 %v4133_v49 }
 0x53d   :  { %v1266_v53 = vadd.f32 %v1264_v6, %v1263_v52  ;;  %1565 = vmatpush.bf16.msrb.mxu2 %v4141_v51 }
 0x53f   :  { %v1268_v56 = vadd.f32 %v1266_v53, %v4641_v55 }
 0x541   :  { %v1274_v57 = vsel %vm354_vm7, %v1268_v56, 0.0 }
 0x542   :  { %1275 = vadd.xlane.f32.xlu2 %v1274_v57 }
 0x5ad   :  { %v1273_v0 = vpop.xlane.xlu1 %1272 }
 0x5ae   :  { %v1284_v24 = vmul.f32 %v4876_v54, %v1273_v0 }
 0x5b0   :  { %v4879_v37 = vsub.f32 %v1267_v48, %v1284_v24 }
 0x5b2   :  { %v1288_v55 = vmul.f32 %v4879_v37, %v4879_v37 }
 0x5b4   :  { %v1290_v1 = vsel %vm354_vm7, %v1288_v55, 0.0 }
 0x5b5   :  { %1291 = vadd.xlane.f32.xlu0 %v1290_v1  ;;  %v1276_v25 = vpop.xlane.xlu2 %1275  ;;  %v1270_v1 = vld [vmem:[%s5553_s5 + $0x2] ss:$0 sm:$0xff] }
 0x5b6   :  { %v1285_v2 = vmul.f32 %v4876_v54, %v1276_v25 }
 0x5b8   :  { %v4885_v39 = vsub.f32 %v1268_v56, %v1285_v2 }
 0x5ba   :  { %v1289_v3 = vmul.f32 %v4885_v39, %v4885_v39 }
 0x5bc   :  { %v1293_v4 = vsel %vm354_vm7, %v1289_v3, 0.0 }
 0x5bd   :  { %1294 = vadd.xlane.f32.xlu1 %v1293_v4 }
 0x628   :  { %v1292_v29 = vpop.xlane.xlu0 %1291 }
 0x629   :  { %v1296_v31 = vmul.f32 %v1292_v29, %v4876_v54 }
 0x62b   :  { %v1298_v33 = vadd.f32 1e-05, %v1296_v31 }
 0x62d   :  { %4277 = vrsqrt.f32 %v1298_v33  ;;  %vm1306_vm10 = vweird.f32 %v1298_v33 }
 0x630   :  { %v1295_v35 = vpop.xlane.xlu1 %1294 }
 0x631   :  { %v1297_v40 = vmul.f32 %v1295_v35, %v4876_v54 }
 0x633   :  { %v4278_v42 = vpop.eup %4277  ;;  %v1299_v6 = vadd.f32 1e-05, %v1297_v40 }
 0x634   :  { %v1301_v44 = vmul.f32 %v4278_v42, %v1298_v33  ;;  %vm1307_vm9 = vweird.f32 %v4278_v42 }
 0x635   :  { %4279 = vrsqrt.f32 %v1299_v6  ;;  %vm1308_vm11 = vmor %vm1306_vm10, %vm1307_vm9  ;;  %vm1316_vm13 = vweird.f32 %v1299_v6 }
 0x636   :  { %v1302_v46 = vmul.f32 %v4278_v42, %v1301_v44 }
 0x638   :  { %v1303_v48 = vmul.f32 0.5, %v1302_v46 }
 0x63a   :  { %v1304_v50 = vsub.f32 1.5, %v1303_v48 }
 0x63b   :  { %v4280_v52 = vpop.eup %4279 }
 0x63c   :  { %v1305_v53 = vmul.f32 %v4278_v42, %v1304_v50  ;;  %v1311_v56 = vmul.f32 %v4280_v52, %v1299_v6  ;;  %vm1317_vm12 = vweird.f32 %v4280_v52 }
 0x63d   :  { %vm1318_vm14 = vmor %vm1316_vm13, %vm1317_vm12 }
 0x63e   :  { %v1312_v57 = vmul.f32 %v4280_v52, %v1311_v56  ;;  %v1309_v58 = vsel %vm1308_vm11, %v4278_v42, %v1305_v53 }
 0x63f   :  { %v1320_v61 = vmul.f32 %v1309_v58, %v4879_v37  ;;  %v4132_v37 = vld [vmem:[%s5555_s12 + $0x18] sm:$0xff] }
 0x640   :  { %v1313_v59 = vmul.f32 0.5, %v1312_v57  ;;  %1552 = vmatpush.bf16.msrb.mxu1 %v4132_v37  ;;  %v4156_v57 = vld [vmem:[%s5548_s9 + $0x1d8] sm:$0xff]  ;;  %v4145_v37 = vld [vmem:[%s5548_s9 + $0x180] sm:$0xff] }
 0x641   :  { %v1322_v24 = vmul.f32 %v1320_v61, %v1269_v62  ;;  %v4148_v58 = vld [vmem:[%s5548_s9 + $0x198] sm:$0xff]  ;;  %1763 = vmatpush.bf16.msrb.mxu0 %v4156_v57  ;;  %v4155_v61 = vld [vmem:[%s5548_s9 + $0x1d0] sm:$0xff] }
 0x642   :  { %v1314_v60 = vsub.f32 1.5, %v1313_v59  ;;  %v4160_v59 = vld [vmem:[%s5548_s9 + $0x1f8] sm:$0xff]  ;;  %1669 = vmatpush.bf16.msrb.mxu3 %v4148_v58  ;;  %v4167_v58 = vld [vmem:[%s5548_s9 + $0x230] sm:$0xff] }
 0x643   :  { %v1324_v2 = vadd.f32 %v1322_v24, %v1270_v1  ;;  %v4146_v24 = vld [vmem:[%s5548_s9 + $0x188] sm:$0xff]  ;;  %v4192_v57 = vld [vmem:[%s5548_s9 + $0x2f8] sm:$0xff] }
 0x644   :  { %v1315_v63 = vmul.f32 %v4280_v52, %v1314_v60  ;;  %1553 = vmatpush.bf16.msrb.mxu1 %v4131_v11  ;;  %v4164_v60 = vld [vmem:[%s5548_s9 + $0x218] sm:$0xff]  ;;  %v4157_v11 = vld [vmem:[%s5548_s9 + $0x1e0] sm:$0xff] }
 0x645   :  { %1764 = vmatpush.bf16.msrb.mxu0 %v4155_v61  ;;  %v4166_v61 = vld [vmem:[%s5548_s9 + $0x228] sm:$0xff] }
 0x646   :  { %v1319_v0 = vsel %vm1318_vm14, %v4280_v52, %v1315_v63  ;;  %v4159_v63 = vld [vmem:[%s5548_s9 + $0x1f0] sm:$0xff] }
 0x647   :  { %v1321_v55 = vmul.f32 %v1319_v0, %v4885_v39  ;;  %v4140_v39 = vld [vmem:[%s5555_s12 + $0x58] sm:$0xff]  ;;  %v4163_v0 = vld [vmem:[%s5548_s9 + $0x210] sm:$0xff] }
 0x648   :  { %1566 = vmatpush.bf16.msrb.mxu2 %v4140_v39  ;;  %1554 = vmatpush.bf16.msrb.mxu1 %v4130_v13  ;;  %v4153_v39 = vld [vmem:[%s5548_s9 + $0x1c0] sm:$0xff]  ;;  %v4152_v13 = vld [vmem:[%s5548_s9 + $0x1b8] sm:$0xff] }
 0x649   :  { %v1323_v25 = vmul.f32 %v1321_v55, %v1269_v62  ;;  %v4147_v62 = vld [vmem:[%s5548_s9 + $0x190] sm:$0xff]  ;;  %v4154_v55 = vld [vmem:[%s5548_s9 + $0x1c8] sm:$0xff] }
 0x64a   :  { %1670 = vmatpush.bf16.msrb.mxu3 %v4147_v62  ;;  %1765 = vmatpush.bf16.msrb.mxu0 %v4154_v55  ;;  %v4186_v62 = vld [vmem:[%s5548_s9 + $0x2c8] sm:$0xff]  ;;  %v4189_v55 = vld [vmem:[%s5548_s9 + $0x2e0] sm:$0xff] }
 0x64b   :  { %v1325_v3 = vadd.f32 %v1323_v25, %v1270_v1  ;;  %v4158_v1 = vld [vmem:[%s5548_s9 + $0x1e8] sm:$0xff] }
 0x64c   :  { %1567 = vmatpush.bf16.msrb.mxu2 %v4139_v12  ;;  %1555 = vmatpush.bf16.msrb.mxu1 %v4129_v15  ;;  %v4161_v12 = vld [vmem:[%s5548_s9 + $0x200] sm:$0xff]  ;;  %v4176_v15 = vld [vmem:[%s5548_s9 + $0x278] sm:$0xff] }
 0x64d   :  { %v1334_v4 = vpack.c.bf16 %v1325_v3, %v1324_v2 }
 0x64e   :  { %1671 = vmatpush.bf16.msrb.mxu3 %v4146_v24  ;;  %1766 = vmatpush.bf16.msrb.mxu0 %v4153_v39  ;;  %v4185_v24 = vld [vmem:[%s5548_s9 + $0x2c0] sm:$0xff] }
 0x64f   :  { %3474 = vmatmul.msk.bf16.vlgmr.msra.gmra.mxu2 %vm354_vm7, %v1334_v4  ;;  %3475 = vmatmul.msk.bf16.vlgmr.msra.gmra.mxu3 %vm354_vm7, %v1334_v4  ;;  %v3644_v39 = vld [vmem:[%s5550_s6 + $0xe0] sm:$0xff] }
 0x650   :  { %1568 = vmatpush.bf16.msrb.mxu2 %v4138_v14  ;;  %1810 = vmatpush.bf16.msra.mxu1 %v4160_v59  ;;  %v4172_v14 = vld [vmem:[%s5548_s9 + $0x258] sm:$0xff]  ;;  %v4187_v59 = vld [vmem:[%s5548_s9 + $0x2d0] sm:$0xff] }
 0x652   :  { %1672 = vmatpush.bf16.msrb.mxu3 %v4145_v37  ;;  %1968 = vmatpush.bf16.msra.mxu0 %v4172_v14  ;;  %v3647_v14 = vld [vmem:[%s5550_s6 + $0xf8] sm:$0xff] }
 0x654   :  { %1569 = vmatpush.bf16.msrb.mxu2 %v4137_v16  ;;  %1811 = vmatpush.bf16.msra.mxu1 %v4159_v63  ;;  %v4190_v63 = vld [vmem:[%s5548_s9 + $0x2e8] sm:$0xff] }
 0x656   :  { %1716 = vmatpush.bf16.msra.mxu3 %v4152_v13  ;;  %v3646_v13 = vld [vmem:[%s5550_s6 + $0xf0] sm:$0xff] }
 0x658   :  { %1874 = vmatpush.bf16.msra.mxu2 %v4164_v60  ;;  %1812 = vmatpush.bf16.msra.mxu1 %v4158_v1  ;;  %v4191_v60 = vld [vmem:[%s5548_s9 + $0x2f0] sm:$0xff]  ;;  %v4184_v1 = vld [vmem:[%s5548_s9 + $0x2b8] sm:$0xff] }
 0x65c   :  { %1875 = vmatpush.bf16.msra.mxu2 %v4163_v0  ;;  %1813 = vmatpush.bf16.msra.mxu1 %v4157_v11  ;;  %v4165_v0 = vld [vmem:[%s5548_s9 + $0x220] sm:$0xff] }
 0x6d2   :  { %v1394_v19 = vpop.f32.mrf.mxu2  ;;  %v1408_v20 = vpop.f32.mrf.mxu3 }
 0x6d3   :  { %v1395_v23 = vadd.f32 %v1394_v19, %v1338_v21  ;;  %v1409_v26 = vadd.f32 %v1408_v20, %v1339_v22  ;;  %v4151_v20 = vld [vmem:[%s5548_s9 + $0x1b0] sm:$0xff] }
 0x6d4   :  { %1717 = vmatpush.bf16.msra.mxu3 %v4151_v20 }
 0x6d5   :  { %v1413_v29 = vmax.f32 %v1395_v23, 0.0  ;;  %v1414_v30 = vmax.f32 %v1409_v26, 0.0  ;;  %v4179_v23 = vld [vmem:[%s5548_s9 + $0x290] sm:$0xff] }
 0x6da   :  { %v1396_v27 = vpop.f32.mrf.mxu2  ;;  %v1410_v28 = vpop.f32.mrf.mxu3 }
 0x6db   :  { %v1397_v8 = vadd.f32 %v1396_v27, %v1338_v21  ;;  %v1411_v38 = vadd.f32 %v1410_v28, %v1339_v22  ;;  %v4171_v21 = vld [vmem:[%s5548_s9 + $0x250] sm:$0xff] }
 0x6dc   :  { %v4175_v22 = vld [vmem:[%s5548_s9 + $0x270] sm:$0xff]  ;;  %1969 = vmatpush.bf16.msra.mxu0 %v4171_v21 }
 0x6dd   :  { %v1415_v31 = vmax.f32 %v1397_v8, 0.0  ;;  %v1416_v32 = vmax.f32 %v1411_v38, 0.0  ;;  %v4150_v8 = vld [vmem:[%s5548_s9 + $0x1a8] sm:$0xff] }
 0x6de   :  { %v4170_v38 = vld [vmem:[%s5548_s9 + $0x248] sm:$0xff]  ;;  %1718 = vmatpush.bf16.msra.mxu3 %v4150_v8 }
 0x6df   :  { %v1449_v43 = vpack.c.bf16 %v1415_v31, %v1413_v29  ;;  %v1450_v7 = vpack.c.bf16 %v1416_v32, %v1414_v30  ;;  %v4174_v30 = vld [vmem:[%s5548_s9 + $0x268] sm:$0xff] }
 0x6e0   :  { %v4178_v31 = vld [vmem:[%s5548_s9 + $0x288] sm:$0xff]  ;;  %1970 = vmatpush.bf16.msra.mxu0 %v4170_v38  ;;  %v3754_v38 = vld [vmem:[%s5550_s6 + $0x130] sm:$0xff] }
 0x6e1   :  { %1556 = vmatmul.bf16.vlgmr.msrb.gmra.mxu1 %v1449_v43  ;;  %1570 = vmatmul.bf16.vlgmr.msrb.gmra.mxu2 %v1450_v7  ;;  %v4149_v43 = vld [vmem:[%s5548_s9 + $0x1a0] sm:$0xff] }
 0x6e2   :  { %2015 = vmatpush.bf16.msrb.mxu1 %v4176_v15  ;;  %v4169_v7 = vld [vmem:[%s5548_s9 + $0x240] sm:$0xff]  ;;  %1719 = vmatpush.bf16.msra.mxu3 %v4149_v43 }
 0x6e4   :  { %1971 = vmatpush.bf16.msra.mxu0 %v4169_v7  ;;  %v3753_v7 = vld [vmem:[%s5550_s6 + $0x128] sm:$0xff] }
 0x6e6   :  { %2016 = vmatpush.bf16.msrb.mxu1 %v4175_v22 }
 0x6ea   :  { %2017 = vmatpush.bf16.msrb.mxu1 %v4174_v30 }
 0x75e   :  { %v1557_v33 = vpop.f32.mrf.mxu1 }
 0x75f   :  { %v1558_v18 = vadd.f32 %v1557_v33, %v1451_v34 }
 0x764   :  { %v1571_v9 = vpop.f32.mrf.mxu2 }
 0x765   :  { %v1572_v5 = vadd.f32 %v1571_v9, %v1558_v18  ;;  %v4177_v18 = vld [vmem:[%s5548_s9 + $0x280] sm:$0xff] }
 0x766   :  { %v1559_v36 = vpop.f32.mrf.mxu1 }
 0x767   :  { %v1576_v35 = vadd.f32 %v1572_v5, %v1324_v2  ;;  %v1560_v41 = vadd.f32 %v1559_v36, %v1451_v34  ;;  %v4162_v2 = vld [vmem:[%s5548_s9 + $0x208] sm:$0xff]  ;;  %v4173_v34 = vld [vmem:[%s5548_s9 + $0x260] sm:$0xff] }
 0x768   :  { %1876 = vmatpush.bf16.msra.mxu2 %v4162_v2  ;;  %2018 = vmatpush.bf16.msrb.mxu1 %v4173_v34  ;;  %v4182_v2 = vld [vmem:[%s5548_s9 + $0x2a8] sm:$0xff]  ;;  %v3752_v34 = vld [vmem:[%s5550_s6 + $0x120] sm:$0xff] }
 0x769   :  { %v1580_v40 = vsel %vm354_vm7, %v1576_v35, 0.0 }
 0x76a   :  { %1581 = vadd.xlane.f32.xlu2 %v1580_v40 }
 0x76c   :  { %v1573_v10 = vpop.f32.mrf.mxu2  ;;  %1877 = vmatpush.bf16.msra.mxu2 %v4161_v12  ;;  %v3645_v12 = vld [vmem:[%s5550_s6 + $0xe8] sm:$0xff] }
 0x76d   :  { %v1574_v42 = vadd.f32 %v1573_v10, %v1560_v41 }
 0x76f   :  { %v1577_v6 = vadd.f32 %v1574_v42, %v1325_v3 }
 0x770   :  { %2079 = vmatpush.bf16.msrb.mxu2 %v4180_v17 }
 0x771   :  { %v1583_v44 = vsel %vm354_vm7, %v1577_v6, 0.0 }
 0x772   :  { %1584 = vadd.xlane.f32.xlu0 %v1583_v44 }
 0x774   :  { %2080 = vmatpush.bf16.msrb.mxu2 %v4179_v23 }
 0x778   :  { %2081 = vmatpush.bf16.msrb.mxu2 %v4178_v31 }
 0x77c   :  { %2082 = vmatpush.bf16.msrb.mxu2 %v4177_v18 }
 0x7dd   :  { %v1582_v45 = vpop.xlane.xlu2 %1581 }
 0x7de   :  { %v1586_v46 = vmul.f32 %v1582_v45, %v4876_v54 }
 0x7e0   :  { %v5007_v47 = vsub.f32 %v1576_v35, %v1586_v46 }
 0x7e2   :  { %v1590_v48 = vmul.f32 %v5007_v47, %v5007_v47 }
 0x7e4   :  { %v1592_v49 = vsel %vm354_vm7, %v1590_v48, 0.0 }
 0x7e5   :  { %v1585_v50 = vpop.xlane.xlu0 %1584  ;;  %1593 = vadd.xlane.f32.xlu1 %v1592_v49  ;;  %v1579_v49 = vld [vmem:[%s5553_s5 + $0x6] ss:$0 sm:$0xff] }
 0x7e6   :  { %v1587_v51 = vmul.f32 %v1585_v50, %v4876_v54 }
 0x7e8   :  { %v5013_v52 = vsub.f32 %v1577_v6, %v1587_v51  ;;  %v1578_v6 = vld [vmem:[%s5553_s5 + $0x5] ss:$0 sm:$0xff] }
 0x7ea   :  { %v1591_v53 = vmul.f32 %v5013_v52, %v5013_v52 }
 0x7ec   :  { %v1595_v56 = vsel %vm354_vm7, %v1591_v53, 0.0 }
 0x7ed   :  { %1596 = vadd.xlane.f32.xlu2 %v1595_v56  ;;  %v4168_v56 = vld [vmem:[%s5548_s9 + $0x238] sm:$0xff] }
 0x858   :  { %v1594_v25 = vpop.xlane.xlu1 %1593 }
 0x859   :  { %v1598_v3 = vmul.f32 %v1594_v25, %v4876_v54  ;;  %v4183_v25 = vld [vmem:[%s5548_s9 + $0x2b0] sm:$0xff] }
 0x85b   :  { %v1600_v4 = vadd.f32 1e-05, %v1598_v3  ;;  %v4181_v3 = vld [vmem:[%s5548_s9 + $0x2a0] sm:$0xff] }
 0x85d   :  { %4281 = vrsqrt.f32 %v1600_v4  ;;  %vm1608_vm1 = vweird.f32 %v1600_v4 }
 0x860   :  { %v1597_v16 = vpop.xlane.xlu2 %1596 }
 0x861   :  { %v1599_v19 = vmul.f32 %v1597_v16, %v4876_v54 }
 0x863   :  { %v4282_v26 = vpop.eup %4281  ;;  %v1601_v27 = vadd.f32 1e-05, %v1599_v19 }
 0x864   :  { %v1603_v28 = vmul.f32 %v4282_v26, %v1600_v4  ;;  %vm1609_vm15 = vweird.f32 %v4282_v26 }
 0x865   :  { %4283 = vrsqrt.f32 %v1601_v27  ;;  %vm1610_vm2 = vmor %vm1608_vm1, %vm1609_vm15  ;;  %vm1618_vm4 = vweird.f32 %v1601_v27 }
 0x866   :  { %v1604_v29 = vmul.f32 %v4282_v26, %v1603_v28 }
 0x868   :  { %v1605_v32 = vmul.f32 0.5, %v1604_v29  ;;  %v3755_v29 = vld [vmem:[%s5550_s6 + $0x138] sm:$0xff] }
 0x86a   :  { %v1606_v33 = vsub.f32 1.5, %v1605_v32 }
 0x86b   :  { %v4284_v9 = vpop.eup %4283 }
 0x86c   :  { %v1607_v5 = vmul.f32 %v4282_v26, %v1606_v33  ;;  %v1613_v35 = vmul.f32 %v4284_v9, %v1601_v27  ;;  %vm1619_vm3 = vweird.f32 %v4284_v9 }
 0x86d   :  { %vm1620_vm5 = vmor %vm1618_vm4, %vm1619_vm3  ;;  %vm2958_vm4 = vcmask 517120  }
 0x86e   :  { %v1614_v36 = vmul.f32 %v4284_v9, %v1613_v35  ;;  %v1611_v40 = vsel %vm1610_vm2, %v4282_v26, %v1607_v5 }
 0x86f   :  { %v1622_v42 = vmul.f32 %v1611_v40, %v5007_v47 }
 0x870   :  { %v1615_v41 = vmul.f32 0.5, %v1614_v36 }
 0x871   :  { %v1624_v46 = vmul.f32 %v1622_v42, %v1578_v6 }
 0x872   :  { %v1616_v10 = vsub.f32 1.5, %v1615_v41 }
 0x873   :  { %v5124_v51 = vadd.f32 %v1624_v46, %v1579_v49 }
 0x874   :  { %v1617_v44 = vmul.f32 %v4284_v9, %v1616_v10 }
 0x876   :  { %v1621_v45 = vsel %vm1620_vm5, %v4284_v9, %v1617_v44  ;;  %v3862_v44 = vld [vmem:[%s5550_s6 + $0x170] sm:$0xff] }
 0x877   :  { %v1623_v48 = vmul.f32 %v1621_v45, %v5013_v52  ;;  %v4188_v52 = vld [vmem:[%s5548_s9 + $0x2d8] sm:$0xff] }
 0x878   :  { %v3863_v45 = vld [vmem:[%s5550_s6 + $0x178] sm:$0xff] }
 0x879   :  { %v1625_v50 = vmul.f32 %v1623_v48, %v1578_v6  ;;  %v3861_v48 = vld [vmem:[%s5550_s6 + $0x168] sm:$0xff] }
 0x87b   :  { %v5126_v53 = vadd.f32 %v1625_v50, %v1579_v49 }
 0x87d   :  { %v1637_v47 = vpack.c.bf16 %v5126_v53, %v5124_v51 }
 0x87f   :  { %3564 = vmatmul.msk.bf16.vlgmr.msrb.gmra.mxu3 %vm354_vm7, %v1637_v47  ;;  %3614 = vmatmul.msk.bf16.vlgmr.msrb.gmra.mxu0 %vm354_vm7, %v1637_v47 }
 0x880   :  { %3639 = vmatmul.msk.bf16.vlgmr.msra.gmra.mxu1 %vm354_vm7, %v1637_v47  ;;  %3672 = vmatmul.msk.bf16.vlgmr.msra.gmra.mxu2 %vm354_vm7, %v1637_v47 }
 0x881   :  { %1921 = vmatpush.bf16.msrb.mxu3 %v4168_v56  ;;  %2173 = vmatpush.bf16.msrb.mxu0 %v4188_v52  ;;  %v3860_v52 = vld [vmem:[%s5550_s6 + $0x160] sm:$0xff] }
 0x882   :  { %2220 = vmatpush.bf16.msra.mxu1 %v4192_v57  ;;  %v3750_v57 = vld [vmem:[%s5550_s6 + $0x110] sm:$0xff] }
 0x885   :  { %1922 = vmatpush.bf16.msrb.mxu3 %v4167_v58  ;;  %2174 = vmatpush.bf16.msrb.mxu0 %v4187_v59 }
 0x886   :  { %2221 = vmatpush.bf16.msra.mxu1 %v4191_v60  ;;  %v3751_v60 = vld [vmem:[%s5550_s6 + $0x118] sm:$0xff] }
 0x889   :  { %1923 = vmatpush.bf16.msrb.mxu3 %v4166_v61  ;;  %2175 = vmatpush.bf16.msrb.mxu0 %v4186_v62 }
 0x88a   :  { %2222 = vmatpush.bf16.msra.mxu1 %v4190_v63 }
 0x88d   :  { %1924 = vmatpush.bf16.msrb.mxu3 %v4165_v0  ;;  %2176 = vmatpush.bf16.msrb.mxu0 %v4185_v24  ;;  %v3749_v24 = vld [vmem:[%s5550_s6 + $0x108] sm:$0xff] }
 0x88e   :  { %2223 = vmatpush.bf16.msra.mxu1 %v4189_v55 }
 0x88f   :  { %3589 = vmatmul.msk.bf16.vlgmr.msra.gmra.mxu3 %vm354_vm7, %v1637_v47  ;;  %3722 = vmatmul.msk.bf16.vlgmr.msra.gmra.mxu0 %vm354_vm7, %v1637_v47 }
 0x890   :  { %3747 = vmatmul.msk.bf16.vlgmr.msrb.gmra.mxu1 %vm354_vm7, %v1637_v47  ;;  %3780 = vmatmul.msk.bf16.vlgmr.msrb.gmra.mxu2 %vm354_vm7, %v1637_v47 }
 0x891   :  { %2126 = vmatpush.bf16.msra.mxu3 %v4184_v1 }
 0x895   :  { %2127 = vmatpush.bf16.msra.mxu3 %v4183_v25  ;;  %v3748_v25 = vld [vmem:[%s5550_s6 + $0x100] sm:$0xff] }
 0x899   :  { %2128 = vmatpush.bf16.msra.mxu3 %v4182_v2 }
 0x89d   :  { %2129 = vmatpush.bf16.msra.mxu3 %v4181_v3 }
 0x89f   :  { %3697 = vmatmul.msk.bf16.vlgmr.msrb.gmra.mxu3 %vm354_vm7, %v1637_v47  ;;  %3830 = vmatmul.msk.bf16.vlgmr.msrb.gmra.mxu0 %vm354_vm7, %v1637_v47 }
 0x8a0   :  { %3855 = vmatmul.msk.bf16.vlgmr.msra.gmra.mxu1 %vm354_vm7, %v1637_v47 }
 0x8af   :  { %3805 = vmatmul.msk.bf16.vlgmr.msra.gmra.mxu3 %vm354_vm7, %v1637_v47 }
 0x8fc   :  { %v1768_v4 = vpop.f32.mrf.mxu0 }
 0x8fd   :  { %v1815_v37 = vpop.f32.mrf.mxu1  ;;  %v5204_v16 = vadd.f32 %v3644_v39, %v1768_v4 }
 0x8fe   :  { %v5208_v20 = vadd.f32 %v3646_v13, %v1815_v37  ;;  %v3641_v13 = vld [vmem:[%s5550_s6 + $0xc8] sm:$0xff] }
 0x902   :  { %v5193_v11 = vpop.f32.mrf.mxu3 }
 0x903   :  { %v1879_v35 = vpop.f32.mrf.mxu2 }
 0x904   :  { %v1770_v15 = vpop.f32.mrf.mxu0  ;;  %v2034_v37 = vadd.f32 %v3748_v25, %v1879_v35  ;;  %v3643_v35 = vld [vmem:[%s5550_s6 + $0xd8] sm:$0xff] }
 0x905   :  { %v5206_v17 = vadd.f32 %v3645_v12, %v1770_v15  ;;  %v1817_v19 = vpop.f32.mrf.mxu1  ;;  %v3640_v15 = vld [vmem:[%s5550_s6 + $0xc0] sm:$0xff] }
 0x906   :  { %v5210_v21 = vadd.f32 %v3647_v14, %v1817_v19  ;;  %v3858_v19 = vld [vmem:[%s5550_s6 + $0x150] sm:$0xff] }
 0x907   :  { %v2249_v22 = vpack.c.bf16 %v5206_v17, %v5204_v16  ;;  %v4328_v16 = vld [vmem:[%s5551_s3 + $0x8] sm:$0xff] }
 0x908   :  { %v2250_v23 = vpack.c.bf16 %v5210_v21, %v5208_v20 }
 0x90a   :  { %v1676_v26 = vpop.f32.mrf.mxu3 }
 0x90b   :  { %v1881_v50 = vpop.f32.mrf.mxu2 }
 0x90c   :  { %v1973_v27 = vpop.f32.mrf.mxu0  ;;  %v2035_v2 = vadd.f32 %v3749_v24, %v1881_v50 }
 0x90d   :  { %v2020_v28 = vpop.f32.mrf.mxu1  ;;  %v2038_v36 = vadd.f32 %v3752_v34, %v1973_v27  ;;  %v3859_v27 = vld [vmem:[%s5550_s6 + $0x158] sm:$0xff] }
 0x90e   :  { %v2040_v32 = vadd.f32 %v3754_v38, %v2020_v28  ;;  %v2251_v12 = vpack.c.bf16 %v2035_v2, %v2034_v37  ;;  %v1830_v28 = vadd.f32 %v3641_v13, %v1676_v26  ;;  %v4333_v2 = vld [vmem:[%s5551_s3 + $0x30] sm:$0xff] }
 0x910   :  { %v2268_v14 = vsel %vm53_vm0, %v2251_v12, 0  ;;  %v4334_v12 = vld [vmem:[%s5551_s3 + $0x38] sm:$0xff] }
 0x912   :  { %v5216_v8 = vpop.f32.mrf.mxu3 }
 0x913   :  { %v2084_v4 = vpop.f32.mrf.mxu2 }
 0x914   :  { %v1975_v30 = vpop.f32.mrf.mxu0 }
 0x915   :  { %v2022_v31 = vpop.f32.mrf.mxu1  ;;  %v2039_v18 = vadd.f32 %v3753_v7, %v1975_v30  ;;  %v3856_v7 = vld [vmem:[%s5550_s6 + $0x140] sm:$0xff] }
 0x916   :  { %v2041_v43 = vadd.f32 %v3755_v29, %v2022_v31  ;;  %v3857_v29 = vld [vmem:[%s5550_s6 + $0x148] sm:$0xff]  ;;  %v1829_v31 = vadd.f32 %v3640_v15, %v5193_v11  ;;  %v3642_v11 = vld [vmem:[%s5550_s6 + $0xd0] sm:$0xff] }
 0x917   :  { %v2253_v10 = vpack.c.bf16 %v2039_v18, %v2038_v36 }
 0x918   :  { %v2254_v33 = vpack.c.bf16 %v2041_v43, %v2040_v32 }
 0x919   :  { %v2274_v6 = vsel %vm53_vm0, %v2253_v10, 0 }
 0x91a   :  { %v5230_v9 = vpop.f32.mrf.mxu3  ;;  %v2277_v5 = vsel %vm53_vm0, %v2254_v33, 0  ;;  %v2247_v33 = vpack.c.bf16 %v1830_v28, %v1829_v31 }
 0x91b   :  { %2283 = vmatpush.bf16.xpose.msra.mxu2 %v2277_v5  ;;  %v2086_v38 = vpop.f32.mrf.mxu2  ;;  %v2239_v5 = vadd.f32 %v3856_v7, %v2084_v4  ;;  %v1832_v36 = vadd.f32 %v3643_v35, %v5230_v9  ;;  %v4327_v9 = vld [vmem:[%s5551_s3] sm:$0xff] }
 0x91c   :  { %v2178_v40 = vpop.f32.mrf.mxu0  ;;  %v2240_v34 = vadd.f32 %v3857_v29, %v2086_v38 }
 0x91d   :  { %v2225_v41 = vpop.f32.mrf.mxu1  ;;  %v2243_v61 = vadd.f32 %v3860_v52, %v2178_v40  ;;  %v1831_v40 = vadd.f32 %v3642_v11, %v5216_v8 }
 0x91e   :  { %v2245_v47 = vadd.f32 %v3862_v44, %v2225_v41  ;;  %v2416_v26 = vpack.c.bf16 %v2240_v34, %v2239_v5 }
 0x91f   :  { %v2248_v41 = vpack.c.bf16 %v1832_v36, %v1831_v40 }
 0x922   :  { %v1926_v42 = vpop.f32.mrf.mxu3 }
 0x923   :  { %2284 = vmatpush.bf16.xpose.msra.mxu2 %v2274_v6  ;;  %v2036_v63 = vadd.f32 %v3750_v57, %v1926_v42 }
 0x924   :  { %v2180_v46 = vpop.f32.mrf.mxu0 }
 0x925   :  { %v2227_v49 = vpop.f32.mrf.mxu1  ;;  %v2244_v58 = vadd.f32 %v3861_v48, %v2180_v46 }
 0x926   :  { %v2246_v56 = vadd.f32 %v3863_v45, %v2227_v49 }
 0x927   :  { %v2418_v55 = vpack.c.bf16 %v2244_v58, %v2243_v61 }
 0x928   :  { %v2419_v59 = vpack.c.bf16 %v2246_v56, %v2245_v47  ;;  %v4330_v47 = vld [vmem:[%s5551_s3 + $0x18] sm:$0xff] }
 0x92a   :  { %2436 = vmatpush.bf16.msrb.mxu3 %v2419_v59  ;;  %v1928_v62 = vpop.f32.mrf.mxu3  ;;  %v4331_v59 = vld [vmem:[%s5551_s3 + $0x20] sm:$0xff] }
 0x92b   :  { %v2037_v0 = vadd.f32 %v3751_v60, %v1928_v62 }
 0x92d   :  { %v2252_v1 = vpack.c.bf16 %v2037_v0, %v2036_v63  ;;  %v4332_v0 = vld [vmem:[%s5551_s3 + $0x28] sm:$0xff] }
 0x92e   :  { %2437 = vmatpush.bf16.msrb.mxu3 %v2418_v55 }
 0x92f   :  { %v2271_v3 = vsel %vm53_vm0, %v2252_v1, 0 }
 0x930   :  { %2285 = vmatpush.bf16.xpose.msra.mxu2 %v2271_v3 }
 0x932   :  { %v2131_v39 = vpop.f32.mrf.mxu3 }
 0x933   :  { %v2241_v32 = vadd.f32 %v3858_v19, %v2131_v39 }
 0x938   :  { %2286 = vmatpush.bf16.xpose.msra.mxu2 %v2268_v14 }
 0x93a   :  { %v2133_v30 = vpop.f32.mrf.mxu3 }
 0x93b   :  { %v2242_v43 = vadd.f32 %v3859_v27, %v2133_v30 }
 0x93d   :  { %v2417_v18 = vpack.c.bf16 %v2242_v43, %v2241_v32 }
 0x93f   :  { %3864 = vmatmul.msk.bf16.vlgmr.msra.gmra.mxu2 %vm53_vm0, %v2247_v33  ;;  %2438 = vmatpush.bf16.msrb.mxu3 %v2417_v18 }
 0x943   :  { %2439 = vmatpush.bf16.msrb.mxu3 %v2416_v26 }
 0x94f   :  { %3865 = vmatmul.msk.bf16.gmra.mxu2 %vm53_vm0, %v2248_v41 }
 0x95f   :  { %3866 = vmatmul.msk.bf16.gmra.mxu2 %vm53_vm0, %v2249_v22 }
 0x96f   :  { %3867 = vmatmul.msk.bf16.gmra.mxu2 %vm53_vm0, %v2250_v23  ;;  %v4329_v23 = vld [vmem:[%s5551_s3 + $0x10] sm:$0xff] }
 0x9c2   :  { %v2288_v10 = vpop.f32.mrf.mxu2 }
 0x9c3   :  { %v2308_v42 = vmul.f32 0.25, %v2288_v10 }
 0x9c5   :  { %v2316_v8 = vadd.f32 %v4327_v9, %v2308_v42 }
 0x9c7   :  { %v2324_v6 = vsel %vm354_vm7, %v2316_v8, -inf }
 0x9c8   :  { %2325 = vmax.xlane.f32.xlu0 %v2324_v6 }
 0x9ca   :  { %v2290_v44 = vpop.f32.mrf.mxu2 }
 0x9cb   :  { %v2309_v45 = vmul.f32 0.25, %v2290_v44 }
 0x9cd   :  { %v2317_v17 = vadd.f32 %v4328_v16, %v2309_v45 }
 0x9cf   :  { %v2327_v20 = vsel %vm354_vm7, %v2317_v17, -inf }
 0x9d0   :  { %2328 = vmax.xlane.f32.xlu1 %v2327_v20 }
 0x9d2   :  { %v2293_v21 = vpop.f32.mrf.mxu2 }
 0x9d3   :  { %v2310_v22 = vmul.f32 0.25, %v2293_v21 }
 0x9d5   :  { %v2318_v46 = vadd.f32 %v4329_v23, %v2310_v22 }
 0x9d7   :  { %v2330_v48 = vsel %vm354_vm7, %v2318_v46, -inf }
 0x9d8   :  { %2331 = vmax.xlane.f32.xlu2 %v2330_v48 }
 0x9da   :  { %v2295_v49 = vpop.f32.mrf.mxu2 }
 0x9db   :  { %v2311_v50 = vmul.f32 0.25, %v2295_v49 }
 0x9dd   :  { %v2319_v56 = vadd.f32 %v4330_v47, %v2311_v50 }
 0x9df   :  { %v2333_v52 = vsel %vm354_vm7, %v2319_v56, -inf }
 0x9e0   :  { %2334 = vmax.xlane.f32.xlu0 %v2333_v52 }
 0x9e2   :  { %v2298_v57 = vpop.f32.mrf.mxu2 }
 0x9e3   :  { %v2312_v58 = vmul.f32 0.25, %v2298_v57 }
 0x9e5   :  { %v2320_v60 = vadd.f32 %v4331_v59, %v2312_v58 }
 0x9e7   :  { %v2336_v61 = vsel %vm354_vm7, %v2320_v60, -inf }
 0x9e8   :  { %2337 = vmax.xlane.f32.xlu1 %v2336_v61 }
 0x9ea   :  { %v2300_v62 = vpop.f32.mrf.mxu2 }
 0x9eb   :  { %v2313_v63 = vmul.f32 0.25, %v2300_v62 }
 0x9ed   :  { %v2321_v24 = vadd.f32 %v4332_v0, %v2313_v63 }
 0x9ef   :  { %v2339_v55 = vsel %vm354_vm7, %v2321_v24, -inf }
 0x9f0   :  { %2340 = vmax.xlane.f32.xlu2 %v2339_v55 }
 0x9f2   :  { %v2303_v1 = vpop.f32.mrf.mxu2 }
 0x9f3   :  { %v2314_v25 = vmul.f32 0.25, %v2303_v1 }
 0x9f5   :  { %v2322_v3 = vadd.f32 %v4333_v2, %v2314_v25 }
 0x9f7   :  { %v2342_v4 = vsel %vm354_vm7, %v2322_v3, -inf }
 0x9f8   :  { %2343 = vmax.xlane.f32.xlu0 %v2342_v4 }
 0x9fa   :  { %v2305_v37 = vpop.f32.mrf.mxu2 }
 0x9fb   :  { %v2315_v39 = vmul.f32 0.25, %v2305_v37 }
 0x9fd   :  { %v2323_v13 = vadd.f32 %v4334_v12, %v2315_v39 }
 0x9ff   :  { %v2345_v14 = vsel %vm354_vm7, %v2323_v13, -inf }
 0xa00   :  { %2346 = vmax.xlane.f32.xlu1 %v2345_v14 }
 0xa3b   :  { %v2326_v15 = vpop.xlane.xlu0 %2325 }
 0xa3c   :  { %v2348_v19 = vsub.f32 %v2316_v8, %v2326_v15 }
 0xa3e   :  { %v2356_v27 = vmul.f32 1.442695, %v2348_v19 }
 0xa40   :  { %4285 = vpow2.f32 %v2356_v27 }
 0xa43   :  { %v2329_v28 = vpop.xlane.xlu1 %2328 }
 0xa44   :  { %v2349_v38 = vsub.f32 %v2317_v17, %v2329_v28 }
 0xa46   :  { %v4286_v29 = vpop.eup %4285  ;;  %v2358_v30 = vmul.f32 1.442695, %v2349_v38 }
 0xa47   :  { %v2372_v31 = vsel %vm354_vm7, %v4286_v29, 0.0 }
 0xa48   :  { %4287 = vpow2.f32 %v2358_v30  ;;  %2373 = vadd.xlane.f32.xlu2 %v2372_v31  ;;  %v4193_v31 = vld [vmem:[%s5552_s10 + $0x20] sm:$0xff] }
 0xa49   :  { %2508 = vmatpush.bf16.msrb.mxu1 %v4193_v31  ;;  %v3921_v31 = vld [vmem:[%s5554_s11 + $0x58] sm:$0xf0] }
 0xa4b   :  { %v2332_v32 = vpop.xlane.xlu2 %2331 }
 0xa4c   :  { %v2350_v43 = vsub.f32 %v2318_v46, %v2332_v32  ;;  %v4194_v32 = vld [vmem:[%s5552_s10 + $0x28] sm:$0xff] }
 0xa4d   :  { %2485 = vmatpush.bf16.msra.mxu0 %v4194_v32 }
 0xa4e   :  { %v4288_v7 = vpop.eup %4287  ;;  %v2360_v33 = vmul.f32 1.442695, %v2350_v43 }
 0xa4f   :  { %v2375_v34 = vsel %vm354_vm7, %v4288_v7, 0.0 }
 0xa50   :  { %4289 = vpow2.f32 %v2360_v33  ;;  %2376 = vadd.xlane.f32.xlu0 %v2375_v34 }
 0xa53   :  { %v2335_v18 = vpop.xlane.xlu0 %2334 }
 0xa54   :  { %v2351_v5 = vsub.f32 %v2319_v56, %v2335_v18 }
 0xa56   :  { %v4290_v26 = vpop.eup %4289  ;;  %v2362_v35 = vmul.f32 1.442695, %v2351_v5  ;;  %v4196_v5 = vld [vmem:[%s5552_s10 + $0x38] sm:$0xff] }
 0xa57   :  { %v2378_v11 = vsel %vm354_vm7, %v4290_v26, 0.0  ;;  %2564 = vmatpush.bf16.msra.mxu1 %v4196_v5 }
 0xa58   :  { %4291 = vpow2.f32 %v2362_v35  ;;  %2379 = vadd.xlane.f32.xlu1 %v2378_v11 }
 0xa5b   :  { %v2338_v36 = vpop.xlane.xlu1 %2337 }
 0xa5c   :  { %v2352_v40 = vsub.f32 %v2320_v60, %v2338_v36 }
 0xa5e   :  { %v4292_v41 = vpop.eup %4291  ;;  %v2364_v10 = vmul.f32 1.442695, %v2352_v40 }
 0xa5f   :  { %v2381_v42 = vsel %vm354_vm7, %v4292_v41, 0.0 }
 0xa60   :  { %4293 = vpow2.f32 %v2364_v10  ;;  %2382 = vadd.xlane.f32.xlu2 %v2381_v42 }
 0xa63   :  { %v2341_v9 = vpop.xlane.xlu2 %2340 }
 0xa64   :  { %v2353_v8 = vsub.f32 %v2321_v24, %v2341_v9 }
 0xa66   :  { %v4294_v6 = vpop.eup %4293  ;;  %v2366_v44 = vmul.f32 1.442695, %v2353_v8 }
 0xa67   :  { %v2384_v45 = vsel %vm354_vm7, %v4294_v6, 0.0 }
 0xa68   :  { %4295 = vpow2.f32 %v2366_v44  ;;  %2385 = vadd.xlane.f32.xlu0 %v2384_v45 }
 0xa6b   :  { %v2344_v16 = vpop.xlane.xlu0 %2343 }
 0xa6c   :  { %v2354_v17 = vsub.f32 %v2322_v3, %v2344_v16 }
 0xa6e   :  { %v4296_v20 = vpop.eup %4295  ;;  %v2368_v21 = vmul.f32 1.442695, %v2354_v17 }
 0xa6f   :  { %v2387_v22 = vsel %vm354_vm7, %v4296_v20, 0.0 }
 0xa70   :  { %4297 = vpow2.f32 %v2368_v21  ;;  %2388 = vadd.xlane.f32.xlu1 %v2387_v22  ;;  %v2573_v21 = vld [vmem:[%s5553_s5 + $0x7] ss:$0 sm:$0xff] }
 0xa73   :  { %v2347_v23 = vpop.xlane.xlu1 %2346 }
 0xa74   :  { %v2355_v46 = vsub.f32 %v2323_v13, %v2347_v23 }
 0xa76   :  { %v4298_v48 = vpop.eup %4297  ;;  %v2370_v49 = vmul.f32 1.442695, %v2355_v46 }
 0xa77   :  { %v2390_v50 = vsel %vm354_vm7, %v4298_v48, 0.0 }
 0xa78   :  { %4299 = vpow2.f32 %v2370_v49  ;;  %2391 = vadd.xlane.f32.xlu2 %v2390_v50 }
 0xa7e   :  { %v4300_v47 = vpop.eup %4299 }
 0xa7f   :  { %v2393_v56 = vsel %vm354_vm7, %v4300_v47, 0.0 }
 0xa80   :  { %2394 = vadd.xlane.f32.xlu0 %v2393_v56 }
 0xabb   :  { %v2374_v52 = vpop.xlane.xlu2 %2373 }
 0xabc   :  { %4301 = vrcp.f32 %v2374_v52 }
 0xac2   :  { %v4302_v58 = vpop.eup %4301 }
 0xac3   :  { %v2377_v57 = vpop.xlane.xlu0 %2376  ;;  %v2404_v60 = vmul.f32 %v4302_v58, %v4286_v29 }
 0xac4   :  { %4303 = vrcp.f32 %v2377_v57 }
 0xaca   :  { %v4304_v59 = vpop.eup %4303 }
 0xacb   :  { %v2405_v61 = vmul.f32 %v4304_v59, %v4288_v7  ;;  %v2380_v63 = vpop.xlane.xlu1 %2379  ;;  %v4195_v7 = vld [vmem:[%s5552_s10 + $0x30] sm:$0xff] }
 0xacc   :  { %4305 = vrcp.f32 %v2380_v63  ;;  %2535 = vmatpush.bf16.msrb.mxu0 %v4195_v7 }
 0xacd   :  { %v2412_v62 = vpack.c.bf16 %v2405_v61, %v2404_v60 }
 0xacf   :  { %3868 = vmatmul.msk.bf16.vlgmr.msrb.gmra.mxu3 %vm354_vm7, %v2412_v62 }
 0xad2   :  { %v4306_v24 = vpop.eup %4305 }
 0xad3   :  { %v2383_v0 = vpop.xlane.xlu2 %2382  ;;  %v2406_v1 = vmul.f32 %v4306_v24, %v4290_v26 }
 0xad4   :  { %4307 = vrcp.f32 %v2383_v0 }
 0xada   :  { %v4308_v55 = vpop.eup %4307 }
 0xadb   :  { %v2407_v25 = vmul.f32 %v4308_v55, %v4292_v41  ;;  %v2386_v3 = vpop.xlane.xlu0 %2385 }
 0xadc   :  { %4309 = vrcp.f32 %v2386_v3  ;;  %v4203_v3 = vld [vmem:[%s5554_s11 + $0x74] sm:$0xf] }
 0xadd   :  { %v2413_v2 = vpack.c.bf16 %v2407_v25, %v2406_v1  ;;  %v3935_v25 = vld [vmem:[%s5554_s11 + $0x70] sm:$0xf] }
 0xadf   :  { %3869 = vmatmul.msk.bf16.gmra.mxu3 %vm354_vm7, %v2413_v2  ;;  %v4204_v2 = vld [vmem:[%s5554_s11 + $0x74] sm:$0xf0] }
 0xae2   :  { %v4310_v37 = vpop.eup %4309 }
 0xae3   :  { %v2389_v4 = vpop.xlane.xlu1 %2388  ;;  %v2408_v12 = vmul.f32 %v4310_v37, %v4294_v6  ;;  %v3937_v37 = vld [vmem:[%s5554_s11 + $0x78] sm:$0xf0] }
 0xae4   :  { %4311 = vrcp.f32 %v2389_v4  ;;  %v3936_v4 = vor.u32 %v4204_v2, %v3935_v25  ;;  %v4215_v2 = vld [vmem:[%s5555_s12 + $0xd0] sm:$0xff] }
 0xaea   :  { %v4312_v39 = vpop.eup %4311 }
 0xaeb   :  { %v2409_v13 = vmul.f32 %v4312_v39, %v4296_v20  ;;  %v2392_v15 = vpop.xlane.xlu2 %2391  ;;  %v3940_v39 = vor.u32 %v4203_v3, %v3937_v37  ;;  %v4206_v3 = vld [vmem:[%s5555_s12 + $0x88] sm:$0xff]  ;;  %v4205_v37 = vld [vmem:[%s5555_s12 + $0x80] sm:$0xff] }
 0xaec   :  { %4313 = vrcp.f32 %v2392_v15 }
 0xaed   :  { %v2414_v14 = vpack.c.bf16 %v2409_v13, %v2408_v12  ;;  %v3927_v12 = vld [vmem:[%s5554_s11 + $0x60] sm:$0xf]  ;;  %v4202_v13 = vld [vmem:[%s5554_s11 + $0x64] sm:$0xf0] }
 0xaee   :  { %v3928_v15 = vor.u32 %v4202_v13, %v3927_v12  ;;  %v3908_v12 = vld [vmem:[%s5553_s5 + $0x12] ss:$8 sm:$0x3] }
 0xaef   :  { %3870 = vmatmul.msk.bf16.gmra.mxu3 %vm354_vm7, %v2414_v14  ;;  %v4201_v14 = vld [vmem:[%s5554_s11 + $0x64] sm:$0xf] }
 0xaf2   :  { %v4314_v27 = vpop.eup %4313 }
 0xaf3   :  { %v2395_v19 = vpop.xlane.xlu0 %2394  ;;  %v2410_v38 = vmul.f32 %v4314_v27, %v4298_v48 }
 0xaf4   :  { %4315 = vrcp.f32 %v2395_v19  ;;  %v3929_v19 = vld [vmem:[%s5554_s11 + $0x68] sm:$0xf0] }
 0xaf5   :  { %v3932_v27 = vor.u32 %v4201_v14, %v3929_v19  ;;  %v2642_v19 = vperm.slane %v3908_v12, 1 }
 0xafa   :  { %v4316_v28 = vpop.eup %4315 }
 0xafb   :  { %v2411_v29 = vmul.f32 %v4316_v28, %v4300_v47  ;;  %v3919_v28 = vld [vmem:[%s5554_s11 + $0x50] sm:$0xf] }
 0xafd   :  { %v2415_v30 = vpack.c.bf16 %v2411_v29, %v2410_v38  ;;  %v4200_v38 = vld [vmem:[%s5554_s11 + $0x54] sm:$0xf0]  ;;  %v4199_v29 = vld [vmem:[%s5554_s11 + $0x54] sm:$0xf] }
 0xaff   :  { %3871 = vmatmul.msk.bf16.gmra.mxu3 %vm354_vm7, %v2415_v30  ;;  %v3920_v30 = vor.u32 %v4200_v38, %v3919_v28 }
 0xb52   :  { %v2441_v43 = vpop.f32.mrf.mxu3 }
 0xb5a   :  { %v2443_v33 = vpop.f32.mrf.mxu3 }
 0xb5b   :  { %v2464_v34 = vpack.c.bf16 %v2443_v33, %v2441_v43  ;;  %v3924_v43 = vor.u32 %v4199_v29, %v3921_v31  ;;  %v3911_v33 = vld [vmem:[%s5554_s11 + $0x40] sm:$0xf] }
 0xb5d   :  { %3885 = vmatmul.msk.bf16.vlgmr.msrb.gmra.mxu1 %vm53_vm0, %v2464_v34  ;;  %v4198_v34 = vld [vmem:[%s5554_s11 + $0x44] sm:$0xf0] }
 0xb5e   :  { %2706 = vmatpush.bf16.msrb.mxu1 %v3940_v39  ;;  %v4213_v39 = vld [vmem:[%s5555_s12 + $0xc0] sm:$0xff] }
 0xb62   :  { %v2446_v18 = vpop.f32.mrf.mxu3  ;;  %2707 = vmatpush.bf16.msrb.mxu1 %v3932_v27 }
 0xb66   :  { %2708 = vmatpush.bf16.msrb.mxu1 %v3924_v43 }
 0xb6a   :  { %v2448_v26 = vpop.f32.mrf.mxu3 }
 0xb6b   :  { %v2468_v35 = vpack.c.bf16 %v2448_v26, %v2446_v18  ;;  %v4197_v18 = vld [vmem:[%s5554_s11 + $0x44] sm:$0xf]  ;;  %v3912_v26 = vor.u32 %v4198_v34, %v3911_v33 }
 0xb6d   :  { %3880 = vmatmul.msk.bf16.vlgmr.msra.gmra.mxu0 %vm53_vm0, %v2468_v35  ;;  %v3913_v35 = vld [vmem:[%s5554_s11 + $0x48] sm:$0xf0] }
 0xb6e   :  { %2692 = vmatpush.bf16.msra.mxu0 %v3936_v4  ;;  %v4214_v4 = vld [vmem:[%s5555_s12 + $0xc8] sm:$0xff] }
 0xb72   :  { %v2451_v11 = vpop.f32.mrf.mxu3  ;;  %2693 = vmatpush.bf16.msra.mxu0 %v3928_v15  ;;  %v2641_v15 = vperm.slane %v3908_v12, 0 }
 0xb76   :  { %2694 = vmatpush.bf16.msra.mxu0 %v3920_v30 }
 0xb7a   :  { %v2453_v36 = vpop.f32.mrf.mxu3  ;;  %2695 = vmatpush.bf16.msra.mxu0 %v3912_v26 }
 0xb7b   :  { %v2518_v40 = vpack.c.bf16 %v2453_v36, %v2451_v11  ;;  %v3916_v11 = vor.u32 %v4197_v18, %v3913_v35  ;;  %v4212_v36 = vld [vmem:[%s5555_s12 + $0xb8] sm:$0xff] }
 0xb7c   :  { %2852 = vmatpush.bf16.msra.mxu3 %v4212_v36 }
 0xb7d   :  { %3892 = vmatmul.msk.bf16.vlgmr.msrb.gmra.mxu0 %vm53_vm0, %v2518_v40  ;;  %2709 = vmatpush.bf16.msrb.mxu1 %v3916_v11 }
 0xb82   :  { %v2456_v41 = vpop.f32.mrf.mxu3 }
 0xb8a   :  { %v2458_v10 = vpop.f32.mrf.mxu3 }
 0xb8b   :  { %v2547_v42 = vpack.c.bf16 %v2458_v10, %v2456_v41  ;;  %v4220_v41 = vld [vmem:[%s5555_s12 + $0xf8] sm:$0xff] }
 0xb8c   :  { %2866 = vmatpush.bf16.msrb.mxu0 %v4220_v41 }
 0xb8d   :  { %3899 = vmatmul.msk.bf16.vlgmr.msra.gmra.mxu1 %vm53_vm0, %v2547_v42  ;;  %v4211_v42 = vld [vmem:[%s5555_s12 + $0xb0] sm:$0xff] }
 0xb8e   :  { %2853 = vmatpush.bf16.msra.mxu3 %v4211_v42 }
 0xbda   :  { %v2510_v8 = vpop.f32.mrf.mxu1 }
 0xbe2   :  { %v2512_v44 = vpop.f32.mrf.mxu1 }
 0xbea   :  { %v2487_v9 = vpop.f32.mrf.mxu0 }
 0xbeb   :  { %v2511_v16 = vadd.f32 %v2510_v8, %v2487_v9  ;;  %v4219_v9 = vld [vmem:[%s5555_s12 + $0xf0] sm:$0xff] }
 0xbec   :  { %2867 = vmatpush.bf16.msrb.mxu0 %v4219_v9 }
 0xbf2   :  { %v2489_v6 = vpop.f32.mrf.mxu0 }
 0xbf3   :  { %v2513_v48 = vadd.f32 %v2512_v44, %v2489_v6 }
 0xbfa   :  { %v2537_v45 = vpop.f32.mrf.mxu0 }
 0xbfb   :  { %v2542_v17 = vadd.f32 %v2537_v45, %v2511_v16  ;;  %v4210_v45 = vld [vmem:[%s5555_s12 + $0xa8] sm:$0xff] }
 0xbfc   :  { %2854 = vmatpush.bf16.msra.mxu3 %v4210_v45 }
 0xc02   :  { %v2539_v46 = vpop.f32.mrf.mxu0 }
 0xc03   :  { %v2543_v50 = vadd.f32 %v2539_v46, %v2513_v48 }
 0xc0a   :  { %v2566_v20 = vpop.f32.mrf.mxu1 }
 0xc0b   :  { %v2571_v22 = vadd.f32 %v2566_v20, %v2542_v17  ;;  %v4218_v17 = vld [vmem:[%s5555_s12 + $0xe8] sm:$0xff] }
 0xc0c   :  { %2868 = vmatpush.bf16.msrb.mxu0 %v4218_v17 }
 0xc0d   :  { %v2574_v23 = vadd.f32 %v2573_v21, %v2571_v22 }
 0xc0f   :  { %v2576_v49 = vadd.f32 %v2574_v23, %v5124_v51  ;;  %v4217_v23 = vld [vmem:[%s5555_s12 + $0xe0] sm:$0xff] }
 0xc10   :  { %2869 = vmatpush.bf16.msrb.mxu0 %v4217_v23 }
 0xc11   :  { %v2580_v47 = vsel %vm354_vm7, %v2576_v49, 0.0 }
 0xc12   :  { %2581 = vadd.xlane.f32.xlu1 %v2580_v47  ;;  %v2568_v56 = vpop.f32.mrf.mxu1 }
 0xc13   :  { %v2572_v52 = vadd.f32 %v2568_v56, %v2543_v50  ;;  %v4208_v50 = vld [vmem:[%s5555_s12 + $0x98] sm:$0xff] }
 0xc15   :  { %v2575_v57 = vadd.f32 %v2573_v21, %v2572_v52  ;;  %v4209_v21 = vld [vmem:[%s5555_s12 + $0xa0] sm:$0xff] }
 0xc16   :  { %2855 = vmatpush.bf16.msra.mxu3 %v4209_v21 }
 0xc17   :  { %v2577_v58 = vadd.f32 %v2575_v57, %v5126_v53 }
 0xc19   :  { %v2583_v59 = vsel %vm354_vm7, %v2577_v58, 0.0 }
 0xc1a   :  { %2584 = vadd.xlane.f32.xlu2 %v2583_v59  ;;  %2856 = vmatpush.bf16.msra.mxu3 %v4208_v50  ;;  %v2578_v59 = vld [vmem:[%s5553_s5 + $0x10] ss:$0 sm:$0xff] }
 0xc85   :  { %v2582_v60 = vpop.xlane.xlu1 %2581 }
 0xc86   :  { %v2586_v61 = vmul.f32 %v2582_v60, %v4876_v54 }
 0xc88   :  { %v5365_v62 = vsub.f32 %v2576_v49, %v2586_v61 }
 0xc8a   :  { %v2590_v51 = vmul.f32 %v5365_v62, %v5365_v62 }
 0xc8c   :  { %v2592_v63 = vsel %vm354_vm7, %v2590_v51, 0.0 }
 0xc8d   :  { %2593 = vadd.xlane.f32.xlu0 %v2592_v63  ;;  %v2585_v0 = vpop.xlane.xlu2 %2584 }
 0xc8e   :  { %v2587_v24 = vmul.f32 %v2585_v0, %v4876_v54  ;;  %v2579_v0 = vld [vmem:[%s5553_s5 + $0x11] ss:$0 sm:$0xff] }
 0xc90   :  { %v5371_v55 = vsub.f32 %v2577_v58, %v2587_v24 }
 0xc92   :  { %v2591_v53 = vmul.f32 %v5371_v55, %v5371_v55 }
 0xc94   :  { %v2595_v1 = vsel %vm354_vm7, %v2591_v53, 0.0 }
 0xc95   :  { %2596 = vadd.xlane.f32.xlu1 %v2595_v1 }
 0xd00   :  { %v2594_v32 = vpop.xlane.xlu0 %2593 }
 0xd01   :  { %v2598_v7 = vmul.f32 %v2594_v32, %v4876_v54 }
 0xd03   :  { %v2600_v5 = vadd.f32 1e-05, %v2598_v7 }
 0xd05   :  { %4317 = vrsqrt.f32 %v2600_v5  ;;  %vm2608_vm8 = vweird.f32 %v2600_v5 }
 0xd08   :  { %v2597_v40 = vpop.xlane.xlu1 %2596 }
 0xd09   :  { %v2599_v10 = vmul.f32 %v2597_v40, %v4876_v54 }
 0xd0b   :  { %v4318_v8 = vpop.eup %4317  ;;  %v2601_v6 = vadd.f32 1e-05, %v2599_v10 }
 0xd0c   :  { %v2603_v44 = vmul.f32 %v4318_v8, %v2600_v5  ;;  %vm2609_vm6 = vweird.f32 %v4318_v8  ;;  %v2755_v5 = vld [vmem:[%s5553_s5 + $0x13] ss:$0 sm:$0xff] }
 0xd0d   :  { %4319 = vrsqrt.f32 %v2601_v6  ;;  %vm2610_vm9 = vmor %vm2608_vm8, %vm2609_vm6  ;;  %vm2618_vm11 = vweird.f32 %v2601_v6  ;;  %vm3052_vm8 = vcmask 261120  }
 0xd0e   :  { %v2604_v16 = vmul.f32 %v4318_v8, %v2603_v44 }
 0xd10   :  { %v2605_v20 = vmul.f32 0.5, %v2604_v16 }
 0xd12   :  { %v2606_v22 = vsub.f32 1.5, %v2605_v20 }
 0xd13   :  { %v4320_v46 = vpop.eup %4319 }
 0xd14   :  { %v2607_v48 = vmul.f32 %v4318_v8, %v2606_v22  ;;  %v2613_v49 = vmul.f32 %v4320_v46, %v2601_v6  ;;  %vm2619_vm10 = vweird.f32 %v4320_v46 }
 0xd15   :  { %vm2620_vm12 = vmor %vm2618_vm11, %vm2619_vm10 }
 0xd16   :  { %v2614_v47 = vmul.f32 %v4320_v46, %v2613_v49  ;;  %v2611_v56 = vsel %vm2610_vm9, %v4318_v8, %v2607_v48  ;;  %vm3069_vm9 = vcmask 1024  }
 0xd17   :  { %v2622_v58 = vmul.f32 %v2611_v56, %v5365_v62  ;;  %v4216_v62 = vld [vmem:[%s5555_s12 + $0xd8] sm:$0xff] }
 0xd18   :  { %v2615_v52 = vmul.f32 0.5, %v2614_v47  ;;  %2870 = vmatpush.bf16.msrb.mxu0 %v4216_v62 }
 0xd19   :  { %v2624_v51 = vmul.f32 %v2622_v58, %v2578_v59 }
 0xd1a   :  { %v2616_v57 = vsub.f32 1.5, %v2615_v52 }
 0xd1b   :  { %v2626_v53 = vadd.f32 %v2624_v51, %v2579_v0 }
 0xd1c   :  { %v2617_v60 = vmul.f32 %v4320_v46, %v2616_v57  ;;  %2871 = vmatpush.bf16.msrb.mxu0 %v4215_v2 }
 0xd1e   :  { %v2621_v61 = vsel %vm2620_vm12, %v4320_v46, %v2617_v60 }
 0xd1f   :  { %v2623_v63 = vmul.f32 %v2621_v61, %v5371_v55  ;;  %v4207_v55 = vld [vmem:[%s5555_s12 + $0x90] sm:$0xff] }
 0xd20   :  { %2857 = vmatpush.bf16.msra.mxu3 %v4207_v55  ;;  %2872 = vmatpush.bf16.msrb.mxu0 %v4214_v4 }
 0xd21   :  { %v2625_v24 = vmul.f32 %v2623_v63, %v2578_v59 }
 0xd23   :  { %v2627_v1 = vadd.f32 %v2625_v24, %v2579_v0 }
 0xd24   :  { %2858 = vmatpush.bf16.msra.mxu3 %v4206_v3  ;;  %2873 = vmatpush.bf16.msrb.mxu0 %v4213_v39 }
 0xd25   :  { %v2637_v25 = vpack.c.bf16 %v2627_v1, %v2626_v53 }
 0xd27   :  { %3941 = vmatmul.msk.bf16.vlgmr.msra.gmra.mxu0 %vm354_vm7, %v2637_v25  ;;  %3942 = vmatmul.msk.bf16.vlgmr.msrb.gmra.mxu1 %vm354_vm7, %v2637_v25 }
 0xd28   :  { %2859 = vmatpush.bf16.msra.mxu3 %v4205_v37  ;;  %v2882_v37 = vld [vmem:[%s5553_s5 + $0x14] ss:$0 sm:$0xff] }
 0xda4   :  { %v2697_v13 = vpop.f32.mrf.mxu0  ;;  %v2711_v14 = vpop.f32.mrf.mxu1 }
 0xda5   :  { %v2698_v27 = vadd.f32 %v2697_v13, %v2641_v15  ;;  %v2712_v28 = vadd.f32 %v2711_v14, %v2642_v19  ;;  %v2883_v14 = vld [vmem:[%s5553_s5 + $0x15] ss:$0 sm:$0xff] }
 0xda7   :  { %v2716_v32 = vmax.f32 %v2698_v27, 0.0  ;;  %v2717_v43 = vmax.f32 %v2712_v28, 0.0  ;;  %v2932_v27 = vld [vmem:[%s5556_s4] sm:$0x3] }
 0xdac   :  { %v2699_v38 = vpop.f32.mrf.mxu0  ;;  %v2713_v29 = vpop.f32.mrf.mxu1 }
 0xdad   :  { %v2700_v30 = vadd.f32 %v2699_v38, %v2641_v15  ;;  %v2714_v31 = vadd.f32 %v2713_v29, %v2642_v19 }
 0xdaf   :  { %v2718_v7 = vmax.f32 %v2700_v30, 0.0  ;;  %v2719_v33 = vmax.f32 %v2714_v31, 0.0 }
 0xdb1   :  { %v2753_v34 = vpack.c.bf16 %v2718_v7, %v2716_v32  ;;  %v2754_v18 = vpack.c.bf16 %v2719_v33, %v2717_v43  ;;  %v4224_v7 = vld [vmem:[%s5557_s13 + $0x18] sm:$0xff]  ;;  %v4223_v33 = vld [vmem:[%s5557_s13 + $0x10] sm:$0xff] }
 0xdb3   :  { %2860 = vmatmul.bf16.vlgmr.msra.gmra.mxu3 %v2753_v34  ;;  %2874 = vmatmul.bf16.vlgmr.msrb.gmra.mxu0 %v2754_v18  ;;  %v4222_v34 = vld [vmem:[%s5557_s13 + $0x8] sm:$0xff]  ;;  %v4221_v18 = vld [vmem:[%s5557_s13] sm:$0xff] }
 0xe30   :  { %v2875_v26 = vpop.f32.mrf.mxu0 }
 0xe36   :  { %v2861_v35 = vpop.f32.mrf.mxu3 }
 0xe37   :  { %v2862_v11 = vadd.f32 %v2861_v35, %v2755_v5 }
 0xe38   :  { %v2877_v9 = vpop.f32.mrf.mxu0 }
 0xe39   :  { %v2876_v36 = vadd.f32 %v2875_v26, %v2862_v11  ;;  %v4225_v11 = vld [vmem:[%s5558_s14] sm:$0xff] }
 0xe3b   :  { %v2880_v40 = vadd.f32 %v2876_v36, %v2626_v53 }
 0xe3d   :  { %v2884_v41 = vsel %vm354_vm7, %v2880_v40, 0.0 }
 0xe3e   :  { %v2863_v10 = vpop.f32.mrf.mxu3  ;;  %2885 = vadd.xlane.f32.xlu0 %v2884_v41 }
 0xe3f   :  { %v2864_v42 = vadd.f32 %v2863_v10, %v2755_v5  ;;  %v4226_v5 = vld [vmem:[%s5558_s14 + $0x8] sm:$0xff] }
 0xe40   :  { %3062 = vmatpush.bf16.msrb.mxu2 %v4226_v5 }
 0xe41   :  { %v2878_v8 = vadd.f32 %v2877_v9, %v2864_v42 }
 0xe43   :  { %v2881_v6 = vadd.f32 %v2878_v8, %v2627_v1 }
 0xe44   :  { %3063 = vmatpush.bf16.msrb.mxu2 %v4225_v11 }
 0xe45   :  { %v2887_v44 = vsel %vm354_vm7, %v2881_v6, 0.0 }
 0xe46   :  { %2888 = vadd.xlane.f32.xlu2 %v2887_v44 }
 0xeb1   :  { %v2886_v45 = vpop.xlane.xlu0 %2885 }
 0xeb2   :  { %v2890_v16 = vmul.f32 %v2886_v45, %v4876_v54  ;;  %v2957_v45 = vld [vmem:[%s5553_s5 + $0x17] ss:$0 sm:$0xff] }
 0xeb4   :  { %v2892_v17 = vsub.f32 %v2880_v40, %v2890_v16 }
 0xeb6   :  { %v2894_v20 = vmul.f32 %v2892_v17, %v2892_v17 }
 0xeb8   :  { %v2896_v21 = vsel %vm354_vm7, %v2894_v20, 0.0 }
 0xeb9   :  { %v2889_v22 = vpop.xlane.xlu2 %2888  ;;  %2897 = vadd.xlane.f32.xlu2 %v2896_v21  ;;  %v2992_v21 = vld [vmem:[%s5553_s5 + $0x20] ss:$0 sm:$0xff] }
 0xeba   :  { %v2891_v23 = vmul.f32 %v2889_v22, %v4876_v54 }
 0xebc   :  { %v2893_v46 = vsub.f32 %v2881_v6, %v2891_v23 }
 0xebe   :  { %v2895_v48 = vmul.f32 %v2893_v46, %v2893_v46 }
 0xec0   :  { %v2899_v49 = vsel %vm354_vm7, %v2895_v48, 0.0 }
 0xec1   :  { %2900 = vadd.xlane.f32.xlu1 %v2899_v49 }
 0xf2c   :  { %v2898_v50 = vpop.xlane.xlu2 %2897 }
 0xf2d   :  { %v2902_v47 = vmul.f32 %v2898_v50, %v4876_v54  ;;  %v3039_v50 = vld [vmem:[%s5553_s5 + $0x21] ss:$0 sm:$0xff] }
 0xf2f   :  { %v2904_v56 = vadd.f32 1e-05, %v2902_v47 }
 0xf31   :  { %4321 = vrsqrt.f32 %v2904_v56  ;;  %vm2912_vm14 = vweird.f32 %v2904_v56 }
 0xf34   :  { %v2901_v52 = vpop.xlane.xlu1 %2900 }
 0xf35   :  { %v2903_v57 = vmul.f32 %v2901_v52, %v4876_v54 }
 0xf37   :  { %v4322_v58 = vpop.eup %4321  ;;  %v2905_v59 = vadd.f32 1e-05, %v2903_v57 }
 0xf38   :  { %v2907_v60 = vmul.f32 %v4322_v58, %v2904_v56  ;;  %vm2913_vm13 = vweird.f32 %v4322_v58 }
 0xf39   :  { %4323 = vrsqrt.f32 %v2905_v59  ;;  %vm2914_vm15 = vmor %vm2912_vm14, %vm2913_vm13  ;;  %vm2922_vm2 = vweird.f32 %v2905_v59 }
 0xf3a   :  { %v2908_v61 = vmul.f32 %v4322_v58, %v2907_v60 }
 0xf3c   :  { %v2909_v51 = vmul.f32 0.5, %v2908_v61 }
 0xf3e   :  { %v2910_v63 = vsub.f32 1.5, %v2909_v51 }
 0xf3f   :  { %v4324_v0 = vpop.eup %4323 }
 0xf40   :  { %v2917_v24 = vmul.f32 %v4324_v0, %v2905_v59  ;;  %v2911_v53 = vmul.f32 %v4322_v58, %v2910_v63  ;;  %vm2923_vm1 = vweird.f32 %v4324_v0 }
 0xf41   :  { %vm2924_vm3 = vmor %vm2922_vm2, %vm2923_vm1 }
 0xf42   :  { %v2918_v1 = vmul.f32 %v4324_v0, %v2917_v24  ;;  %v2915_v62 = vsel %vm2914_vm15, %v4322_v58, %v2911_v53 }
 0xf43   :  { %v2926_v3 = vmul.f32 %v2915_v62, %v2892_v17 }
 0xf44   :  { %v2919_v25 = vmul.f32 0.5, %v2918_v1 }
 0xf45   :  { %v2928_v13 = vmul.f32 %v2926_v3, %v2882_v37 }
 0xf46   :  { %v2920_v55 = vsub.f32 1.5, %v2919_v25 }
 0xf47   :  { %v2930_v19 = vadd.f32 %v2928_v13, %v2883_v14 }
 0xf48   :  { %v2921_v2 = vmul.f32 %v4324_v0, %v2920_v55 }
 0xf4a   :  { %v2925_v4 = vsel %vm2924_vm3, %v4324_v0, %v2921_v2 }
 0xf4b   :  { %v2927_v39 = vmul.f32 %v2925_v4, %v2893_v46 }
 0xf4d   :  { %v2929_v12 = vmul.f32 %v2927_v39, %v2882_v37 }
 0xf4f   :  { %v2931_v15 = vadd.f32 %v2929_v12, %v2883_v14 }
 0xf51   :  { %2950 = vmatpush.msra.mxu1 %v2931_v15 }
 0xf53   :  { %2951 = vmatpush.msra.mxu1 %v2930_v19 }
 0xf54   :  { %4039 = vmatmul.msk.f32.vlgmr.msra.gmra.mxu1 %vm53_vm0, %v2932_v27 }
 0xf55   :  { %3024 = vmatpush.bf16.msrb.mxu1 %v4224_v7 }
 0xf59   :  { %3025 = vmatpush.bf16.msrb.mxu1 %v4223_v33 }
 0xf5d   :  { %3026 = vmatpush.bf16.msrb.mxu1 %v4222_v34 }
 0xf61   :  { %3027 = vmatpush.bf16.msrb.mxu1 %v4221_v18 }
 0xfd1   :  { %v2953_v28 = vpop.f32.mrf.mxu1 }
 0xfd2   :  { %v2959_v38 = vsel %vm2958_vm4, %v2953_v28, 0.0 }
 0xfd3   :  { %2960 = vadd.xlane.f32.xlu0 %v2959_v38 }
0x1046   :  { %v2961_v29 = vpop.xlane.xlu0 %2960 }
0x1047   :  { %v2962_v30 = vmul.f32 %v2961_v29, %v4876_v54 }
0x1049   :  { %v2963_v31 = vsub.f32 %v2953_v28, %v2962_v30 }
0x104b   :  { %v2964_v32 = vmul.f32 %v2963_v31, %v2963_v31 }
0x104d   :  { %v2965_v43 = vsel %vm2958_vm4, %v2964_v32, 0.0 }
0x104e   :  { %2966 = vadd.xlane.f32.xlu1 %v2965_v43 }
0x10c1   :  { %v2967_v26 = vpop.xlane.xlu1 %2966 }
0x10c2   :  { %v2968_v35 = vmul.f32 %v2967_v26, %v4876_v54  ;;  %v2956_v54 = vld [vmem:[%s5553_s5 + $0x16] ss:$0 sm:$0xff] }
0x10c4   :  { %v2969_v36 = vadd.f32 1e-05, %v2968_v35 }
0x10c6   :  { %4325 = vrsqrt.f32 %v2969_v36  ;;  %vm2976_vm5 = vweird.f32 %v2969_v36 }
0x10cc   :  { %v4326_v40 = vpop.eup %4325 }
0x10cd   :  { %v2971_v41 = vmul.f32 %v4326_v40, %v2969_v36  ;;  %vm2977_vm0 = vweird.f32 %v4326_v40 }
0x10ce   :  { %vm2978_vm6 = vmor %vm2976_vm5, %vm2977_vm0 }
0x10cf   :  { %v2972_v10 = vmul.f32 %v4326_v40, %v2971_v41 }
0x10d1   :  { %v2973_v42 = vmul.f32 0.5, %v2972_v10 }
0x10d3   :  { %v2974_v9 = vsub.f32 1.5, %v2973_v42 }
0x10d5   :  { %v2975_v8 = vmul.f32 %v4326_v40, %v2974_v9 }
0x10d7   :  { %v2979_v6 = vsel %vm2978_vm6, %v4326_v40, %v2975_v8 }
0x10d8   :  { %v2980_v44 = vmul.f32 %v2979_v6, %v2963_v31 }
0x10da   :  { %v2981_v16 = vmul.f32 %v2980_v44, %v2956_v54 }
0x10dc   :  { %v2982_v17 = vadd.f32 %v2981_v16, %v2957_v45 }
0x10de   :  { %v2991_v20 = vpack.c.bf16 %v2982_v17, %v2982_v17 }
0x10e0   :  { %4056 = vmatmul.msk.bf16.vlgmr.msrb.gmra.mxu1 %vm354_vm7, %v2991_v20 }
0x115d   :  { %v3029_v22 = vpop.f32.mrf.mxu1 }
0x115e   :  { %v3030_v23 = vadd.f32 %v3029_v22, %v2992_v21 }
0x1160   :  { %v3033_v46 = vmax.f32 %v3030_v23, 0.0 }
0x1162   :  { %v3038_v48 = vpack.c.bf16 %v3033_v46, %v3033_v46 }
0x1164   :  { %4065 = vmatmul.msk.bf16.vlgmr.msrb.gmra.mxu2 %vm3052_vm8, %v3038_v48 }
0x1165   :  { %v3031_v49 = vpop.f32.mrf.mxu1 }
0x11e7   :  { %v3065_v47 = vpop.f32.mrf.mxu2 }
0x11e8   :  { %v3066_v56 = vadd.f32 %v3065_v47, %v3039_v50 }
0x11ea   :  { %3070 = vst.msk [vmem:[%s5559_s15] sm:$0x3] %vm3069_vm9, %v3066_v56 }
0x11ef   :  { %v3067_v52 = vpop.f32.mrf.mxu2 }

</bundles_post_ra>
